<compile_context>
chip_gen: v7x
topology: tpu7x:2x2x1
jax: 0.10.0
libtpu: 0.0.40
codegen_flags: <defaults>
</compile_context>

<pallas_src>
import functools

import jax
import jax.numpy as jnp
from jax.experimental import pallas as pl
from jax.experimental.pallas import tpu as pltpu


# --------------------------------------------------------------------------
# In-kernel building blocks (all operands are VMEM-resident)
# --------------------------------------------------------------------------

def _edge_masks(HW, W):
    """(HW,1) f32 masks: 1.0 where the pixel is not on the left / right image edge."""
    col = jax.lax.broadcasted_iota(jnp.int32, (HW, 1), 0) % W
    return ((col > 0).astype(jnp.float32), (col < W - 1).astype(jnp.float32))


def _im2col3x3(x_flat, W, masks):
    """Flat (HW, Cin) f32 -> (HW, 9*Cin) bf16 im2col buffer for a 3x3 'same' conv.

    Tap k = (dy+1)*3 + (dx+1) occupies lanes [k*Cin, (k+1)*Cin); this matches the
    (kh, kw, ci, co) -> (9*ci, co) weight reshape done in prepare_params.
    """
    HW, Cin = x_flat.shape
    P = W + 1                                     # >= |dy*W + dx| for all taps
    not_left, not_right = masks

    zpad = jnp.zeros((P, Cin), jnp.float32)
    xpad = jnp.concatenate([zpad, x_flat, zpad], axis=0)     # (HW + 2P, Cin)

    cols = []
    for dy in (-1, 0, 1):
        for dx in (-1, 0, 1):
            s = dy * W + dx
            win = xpad[P + s: P + s + HW]         # win[r] == x[r + s] (zeros off top/bottom)
            if dx == -1:
                win = win * not_left
            elif dx == 1:
                win = win * not_right
            cols.append(win)
    return jnp.concatenate(cols, axis=1).astype(jnp.bfloat16)


def _conv3x3(x_flat, w_ref, b_ref, W, masks, residual=None):
    """3x3 conv + folded-BN bias (+ residual) + ReLU as ONE im2col MXU matmul."""
    col = _im2col3x3(x_flat, W, masks)                                   # (HW, 9*Cin) bf16
    y = jnp.dot(col, w_ref[...], preferred_element_type=jnp.float32) + b_ref[...]
    if residual is not None:
        y = y + residual
    return jnp.maximum(y, 0.0)


def _maxpool2(y, W, sel_ref):
    """2x2 / stride-2 max pool on flat (HW, C): 4-shift elementwise max + 0/1 select matmul.

    Zero padding at the tail is safe because y is post-ReLU (>= 0) and the selected
    anchor rows never read past their own image anyway.
    """
    HW, C = y.shape
    ypad = jnp.concatenate([y, jnp.zeros((W + 1, C), jnp.float32)], axis=0)
    m = jnp.maximum(jnp.maximum(y, ypad[1:HW + 1]),
                    jnp.maximum(ypad[W:W + HW], ypad[W + 1:W + 1 + HW]))
    # TODO(synk): selector is O(HW^2); replace with strided sublane compaction for large images.
    return jnp.dot(sel_ref[...], m, preferred_element_type=jnp.float32)


# --------------------------------------------------------------------------
# Fused whole-network kernel
# --------------------------------------------------------------------------

def _network_kernel(hw, imgs, x_ref, w0_ref, b0_ref, w1_ref, b1_ref, w2_ref, b2_ref,
                    w3_ref, b3_ref, proj_ref, sel1_ref, sel2_ref,
                    fcw_ref, fcb_ref, o_ref):
    W0, W1, W2 = hw, hw // 2, hw // 4
    HW2 = W2 * W2

    # Edge masks hoisted: built once per resolution, reused by every conv / image.
    m0 = _edge_masks(W0 * W0, W0)
    m1 = _edge_masks(W1 * W1, W1)
    m2 = _edge_masks(HW2, W2)

    for i in range(imgs):                       # unrolled; `imgs` images per grid step
        # InitBlock: wrapper pre-im2col'ed the 3-channel input -> single K=32 matmul.
        a0 = jnp.maximum(
            jnp.dot(x_ref[i], w0_ref[...], preferred_element_type=jnp.float32)
            + b0_ref[...], 0.0)                                         # (HW0, 64)

        # Block 1: conv3x3(64->64)+BN, identity bypass, ReLU, maxpool2
        a1 = _conv3x3(a0, w1_ref, b1_ref, W0, m0, residual=a0)
        p1 = _maxpool2(a1, W0, sel1_ref)                                # (HW0/4, 64)

        # Block 2: conv3x3(64->64)+BN, identity bypass, ReLU, maxpool2
        a2 = _conv3x3(p1, w2_ref, b2_ref, W1, m1, residual=p1)
        p2 = _maxpool2(a2, W1, sel2_ref)                                # (HW0/16, 64)

        # Block 3: conv3x3(64->128)+BN, 1x1-projected bypass, ReLU, no pool
        res = jnp.dot(p2.astype(jnp.bfloat16), proj_ref[...],
                      preferred_element_type=jnp.float32)
        a3 = _conv3x3(p2, w3_ref, b3_ref, W2, m2, residual=res)         # (HW0/16, 128)

        # GAP fused into the classifier: (a3 @ fc_w) then a tiny 2-lane row mean.
        t = jnp.dot(a3.astype(jnp.bfloat16), fcw_ref[...],
                    preferred_element_type=jnp.float32)                 # (HW2, 2)
        logits = jnp.sum(t, axis=0, keepdims=True) * (1.0 / HW2) + fcb_ref[...]
        o_ref[i] = logits.astype(o_ref.dtype)


def _const_spec(shape):
    return pl.BlockSpec(shape, lambda *_: (0,) * len(shape))


def _im2col_input(x_nchw, pad_to=32):
    """NCHW input -> (N, H*W, pad_to) bf16 im2col buffer (9 taps x 3 channels, zero-padded)."""
    N, C, H, W = x_nchw.shape
    x = jnp.transpose(x_nchw, (0, 2, 3, 1))                             # NHWC
    xp = jnp.pad(x, ((0, 0), (1, 1), (1, 1), (0, 0)))
    cols = [xp[:, kh:kh + H, kw:kw + W, :] for kh in range(3) for kw in range(3)]
    col = jnp.concatenate(cols, axis=-1).reshape(N, H * W, 9 * C)       # (N, HW, 27)
    col = jnp.pad(col, ((0, 0), (0, 0), (0, pad_to - 9 * C)))
    return col.astype(jnp.bfloat16)


def network_forward(kp, x_nchw, *, images_per_step=1):
    N, C, H, W = x_nchw.shape
    assert H == W and H % 4 == 0, "square input with spatial size divisible by 4"
    assert N % images_per_step == 0
    xcol = _im2col_input(x_nchw)                                        # (N, H*W, 32) bf16

    in_specs = [
        pl.BlockSpec((images_per_step, H * W, xcol.shape[-1]), lambda n: (n, 0, 0)),
        _const_spec(kp["w0"].shape), _const_spec(kp["b0"].shape),
        _const_spec(kp["w1"].shape), _const_spec(kp["b1"].shape),
        _const_spec(kp["w2"].shape), _const_spec(kp["b2"].shape),
        _const_spec(kp["w3"].shape), _const_spec(kp["b3"].shape),
        _const_spec(kp["proj"].shape),
        _const_spec(kp["sel1"].shape), _const_spec(kp["sel2"].shape),
        _const_spec(kp["fc_w"].shape), _const_spec(kp["fc_b"].shape),
    ]
    out = pl.pallas_call(
        functools.partial(_network_kernel, H, images_per_step),
        out_shape=jax.ShapeDtypeStruct((N, 1, 2), jnp.float32),
        grid=(N // images_per_step,),
        in_specs=in_specs,
        out_specs=pl.BlockSpec((images_per_step, 1, 2), lambda n: (n, 0, 0)),
        compiler_params=pltpu.CompilerParams(
            dimension_semantics=("parallel",),
            vmem_limit_bytes=32 * 1024 * 1024),
    )(xcol, kp["w0"], kp["b0"], kp["w1"], kp["b1"], kp["w2"], kp["b2"],
      kp["w3"], kp["b3"], kp["proj"], kp["sel1"], kp["sel2"], kp["fc_w"], kp["fc_b"])
    return out.reshape(N, 2)


# --------------------------------------------------------------------------
# Parameters (raw PyTorch-style) + kernel-ready preparation (BN folding, bf16)
# --------------------------------------------------------------------------

def init_params(key):
    ks = jax.random.split(key, 10)

    def conv_w(k, cin, cout, ksz=3):
        fan_in = cin * ksz * ksz
        return jax.random.normal(k, (ksz, ksz, cin, cout), jnp.float32) / jnp.sqrt(fan_in)

    def bn_fold(k, c, eps=1e-5):
        gamma = 1.0 + 0.1 * jax.random.normal(k, (c,), jnp.float32)
        beta = 0.1 * jax.random.normal(jax.random.fold_in(k, 1), (c,), jnp.float32)
        running_mean = jnp.zeros((c,), jnp.float32)
        running_var = jnp.ones((c,), jnp.float32)
        scale = gamma / jnp.sqrt(running_var + eps)
        bias = beta - running_mean * scale
        return scale, bias

    return {
        "init_w": conv_w(ks[0], 3, 64), "init_bn": bn_fold(ks[1], 64),
        "b1_w": conv_w(ks[2], 64, 64), "b1_bn": bn_fold(ks[3], 64),
        "b2_w": conv_w(ks[4], 64, 64), "b2_bn": bn_fold(ks[5], 64),
        "b3_w": conv_w(ks[6], 64, 128), "b3_bn": bn_fold(ks[7], 128),
        "b3_proj": jax.random.normal(ks[8], (64, 128), jnp.float32) / 8.0,
        "fc_w": jax.random.normal(ks[9], (128, 2), jnp.float32) / jnp.sqrt(128.0),
        "fc_b": jnp.zeros((2,), jnp.float32),
    }


def make_pool_select(H, W):
    """(H*W/4, H*W) exact 0/1 matrix picking the even-y/even-x anchor of each 2x2 window."""
    Ho, Wo = H // 2, W // 2
    o = jnp.arange(Ho * Wo, dtype=jnp.int32)
    src = 2 * (o // Wo) * W + 2 * (o % Wo)
    cols = jnp.arange(H * W, dtype=jnp.int32)
    return (src[:, None] == cols[None, :]).astype(jnp.float32)


def prepare_params(params, hw=16):
    """Fold BN scale into conv weights, flatten taps to (9*Cin, Cout), store weights bf16."""
    def fold(w, bn, pad_k_to=None):
        scale, bias = bn
        kh, kw, ci, co = w.shape
        wf = (w * scale.reshape(1, 1, 1, co)).reshape(kh * kw * ci, co)
        if pad_k_to is not None and wf.shape[0] < pad_k_to:
            wf = jnp.pad(wf, ((0, pad_k_to - wf.shape[0]), (0, 0)))
        return wf.astype(jnp.bfloat16), bias.reshape(1, co).astype(jnp.float32)

    w0, b0 = fold(params["init_w"], params["init_bn"], pad_k_to=32)
    w1, b1 = fold(params["b1_w"], params["b1_bn"])
    w2, b2 = fold(params["b2_w"], params["b2_bn"])
    w3, b3 = fold(params["b3_w"], params["b3_bn"])
    return {
        "w0": w0, "b0": b0, "w1": w1, "b1": b1, "w2": w2, "b2": b2,
        "w3": w3, "b3": b3,
        "proj": params["b3_proj"].astype(jnp.bfloat16),
        "fc_w": params["fc_w"].astype(jnp.bfloat16),
        "fc_b": params["fc_b"].reshape(1, -1).astype(jnp.float32),
        "sel1": make_pool_select(hw, hw),
        "sel2": make_pool_select(hw // 2, hw // 2),
    }


# --------------------------------------------------------------------------
# Pure-JAX reference (unfolded f32 params) for an in-script correctness check
# --------------------------------------------------------------------------

def reference_forward(params, x_nchw):
    x = jnp.transpose(x_nchw, (0, 2, 3, 1))

    def conv_bn_relu(x, w, bn, residual=None):
        scale, bias = bn
        y = jax.lax.conv_general_dilated(
            x, w, window_strides=(1, 1), padding="SAME",
            dimension_numbers=("NHWC", "HWIO", "NHWC"))
        y = y * scale + bias
        if residual is not None:
            y = y + residual
        return jnp.maximum(y, 0.0)

    def pool(x):
        return jax.lax.reduce_window(x, -jnp.inf, jax.lax.max,
                                     (1, 2, 2, 1), (1, 2, 2, 1), "VALID")

    x = conv_bn_relu(x, params["init_w"], params["init_bn"])
    x = pool(conv_bn_relu(x, params["b1_w"], params["b1_bn"], residual=x))
    x = pool(conv_bn_relu(x, params["b2_w"], params["b2_bn"], residual=x))
    res = jnp.einsum("nhwc,cd->nhwd", x, params["b3_proj"])
    x = conv_bn_relu(x, params["b3_w"], params["b3_bn"], residual=res)
    gap = jnp.mean(x, axis=(1, 2))
    return gap @ params["fc_w"] + params["fc_b"]


if __name__ == "__main__":
    key = jax.random.PRNGKey(0)
    pkey, xkey = jax.random.split(key)
    params = init_params(pkey)
    kparams = prepare_params(params, hw=16)
    x = jax.random.normal(xkey, (2, 3, 16, 16), jnp.float32)   # NCHW, like PyTorch

    out = jax.block_until_ready(jax.jit(network_forward)(kparams, x))
    assert out.shape == (2, 2) and out.dtype == jnp.float32

    ref = jax.block_until_ready(jax.jit(reference_forward)(params, x))
    assert jnp.allclose(out, ref, rtol=5e-2, atol=5e-2), (out, ref)

    print("KERNEL_OK")
</pallas_src>

<mosaic_0001>
module attributes {stable_mosaic.version = 11 : i64} {
  func.func @_network_kernel(%arg0: i32, %arg1: memref<1x256x32xbf16, #tpu.memory_space<vmem>>, %arg2: memref<32x64xbf16, #tpu.memory_space<vmem>>, %arg3: memref<1x64xf32, #tpu.memory_space<vmem>>, %arg4: memref<576x64xbf16, #tpu.memory_space<vmem>>, %arg5: memref<1x64xf32, #tpu.memory_space<vmem>>, %arg6: memref<576x64xbf16, #tpu.memory_space<vmem>>, %arg7: memref<1x64xf32, #tpu.memory_space<vmem>>, %arg8: memref<576x128xbf16, #tpu.memory_space<vmem>>, %arg9: memref<1x128xf32, #tpu.memory_space<vmem>>, %arg10: memref<64x128xbf16, #tpu.memory_space<vmem>>, %arg11: memref<64x256xf32, #tpu.memory_space<vmem>>, %arg12: memref<16x64xf32, #tpu.memory_space<vmem>>, %arg13: memref<128x2xbf16, #tpu.memory_space<vmem>>, %arg14: memref<1x2xf32, #tpu.memory_space<vmem>>, %arg15: memref<1x1x2xf32, #tpu.memory_space<vmem>>) attributes {dimension_semantics = [#tpu.dimension_semantics<parallel>], iteration_bounds = array<i64: 2>, scalar_prefetch = 0 : i64, scratch_operands = 0 : i64, tpu.core_type = #tpu.core_type<tc>, window_params = [{transform_indices = @transform_0, window_bounds = array<i64: 1, 256, 32>}, {pipeline_mode = #tpu.pipeline_mode<synchronous>, transform_indices = @transform_1, window_bounds = array<i64: 32, 64>}, {pipeline_mode = #tpu.pipeline_mode<synchronous>, transform_indices = @transform_2, window_bounds = array<i64: 1, 64>}, {pipeline_mode = #tpu.pipeline_mode<synchronous>, transform_indices = @transform_3, window_bounds = array<i64: 576, 64>}, {pipeline_mode = #tpu.pipeline_mode<synchronous>, transform_indices = @transform_4, window_bounds = array<i64: 1, 64>}, {pipeline_mode = #tpu.pipeline_mode<synchronous>, transform_indices = @transform_5, window_bounds = array<i64: 576, 64>}, {pipeline_mode = #tpu.pipeline_mode<synchronous>, transform_indices = @transform_6, window_bounds = array<i64: 1, 64>}, {pipeline_mode = #tpu.pipeline_mode<synchronous>, transform_indices = @transform_7, window_bounds = array<i64: 576, 128>}, {pipeline_mode = #tpu.pipeline_mode<synchronous>, transform_indices = @transform_8, window_bounds = array<i64: 1, 128>}, {pipeline_mode = #tpu.pipeline_mode<synchronous>, transform_indices = @transform_9, window_bounds = array<i64: 64, 128>}, {pipeline_mode = #tpu.pipeline_mode<synchronous>, transform_indices = @transform_10, window_bounds = array<i64: 64, 256>}, {pipeline_mode = #tpu.pipeline_mode<synchronous>, transform_indices = @transform_11, window_bounds = array<i64: 16, 64>}, {pipeline_mode = #tpu.pipeline_mode<synchronous>, transform_indices = @transform_12, window_bounds = array<i64: 128, 2>}, {pipeline_mode = #tpu.pipeline_mode<synchronous>, transform_indices = @transform_13, window_bounds = array<i64: 1, 2>}, {transform_indices = @transform_14, window_bounds = array<i64: 1, 1, 2>}]} {
    %0 = tpu.iota {dimensions = array<i32: 0>} : vector<256x1xi32>
    %c16_i32 = arith.constant 16 : i32
    %c0_i32 = arith.constant 0 : i32
    %1 = arith.cmpi eq, %c16_i32, %c0_i32 : i32
    %c1_i32 = arith.constant 1 : i32
    %2 = arith.select %1, %c1_i32, %c16_i32 : i32
    %3 = vector.broadcast %2 : i32 to vector<256x1xi32>
    %4 = arith.remsi %0, %3 : vector<256x1xi32>
    %c0_i32_0 = arith.constant 0 : i32
    %5 = vector.broadcast %c0_i32_0 : i32 to vector<256x1xi32>
    %6 = arith.cmpi ne, %4, %5 : vector<256x1xi32>
    %c0_i32_1 = arith.constant 0 : i32
    %7 = vector.broadcast %c0_i32_1 : i32 to vector<256x1xi32>
    %8 = arith.cmpi slt, %4, %7 : vector<256x1xi32>
    %c0_i32_2 = arith.constant 0 : i32
    %9 = arith.cmpi slt, %2, %c0_i32_2 : i32
    %10 = vector.broadcast %9 : i1 to vector<256x1xi1>
    %11 = vector.broadcast %10 : vector<256x1xi1> to vector<256x1xi1>
    %12 = arith.xori %8, %11 : vector<256x1xi1>
    %13 = arith.andi %12, %6 : vector<256x1xi1>
    %14 = vector.broadcast %2 : i32 to vector<256x1xi32>
    %15 = arith.addi %4, %14 : vector<256x1xi32>
    %16 = arith.select %13, %15, %4 : vector<256x1xi1>, vector<256x1xi32>
    %c0_i32_3 = arith.constant 0 : i32
    %17 = vector.broadcast %c0_i32_3 : i32 to vector<256x1xi32>
    %18 = arith.cmpi sgt, %16, %17 : vector<256x1xi32>
    %19 = arith.extui %18 : vector<256x1xi1> to vector<256x1xi32>
    %20 = arith.sitofp %19 : vector<256x1xi32> to vector<256x1xf32>
    %c15_i32 = arith.constant 15 : i32
    %21 = vector.broadcast %c15_i32 : i32 to vector<256x1xi32>
    %22 = arith.cmpi slt, %16, %21 : vector<256x1xi32>
    %23 = arith.extui %22 : vector<256x1xi1> to vector<256x1xi32>
    %24 = arith.sitofp %23 : vector<256x1xi32> to vector<256x1xf32>
    %25 = tpu.iota {dimensions = array<i32: 0>} : vector<64x1xi32>
    %c8_i32 = arith.constant 8 : i32
    %c0_i32_4 = arith.constant 0 : i32
    %26 = arith.cmpi eq, %c8_i32, %c0_i32_4 : i32
    %c1_i32_5 = arith.constant 1 : i32
    %27 = arith.select %26, %c1_i32_5, %c8_i32 : i32
    %28 = vector.broadcast %27 : i32 to vector<64x1xi32>
    %29 = arith.remsi %25, %28 : vector<64x1xi32>
    %c0_i32_6 = arith.constant 0 : i32
    %30 = vector.broadcast %c0_i32_6 : i32 to vector<64x1xi32>
    %31 = arith.cmpi ne, %29, %30 : vector<64x1xi32>
    %c0_i32_7 = arith.constant 0 : i32
    %32 = vector.broadcast %c0_i32_7 : i32 to vector<64x1xi32>
    %33 = arith.cmpi slt, %29, %32 : vector<64x1xi32>
    %c0_i32_8 = arith.constant 0 : i32
    %34 = arith.cmpi slt, %27, %c0_i32_8 : i32
    %35 = vector.broadcast %34 : i1 to vector<64x1xi1>
    %36 = vector.broadcast %35 : vector<64x1xi1> to vector<64x1xi1>
    %37 = arith.xori %33, %36 : vector<64x1xi1>
    %38 = arith.andi %37, %31 : vector<64x1xi1>
    %39 = vector.broadcast %27 : i32 to vector<64x1xi32>
    %40 = arith.addi %29, %39 : vector<64x1xi32>
    %41 = arith.select %38, %40, %29 : vector<64x1xi1>, vector<64x1xi32>
    %c0_i32_9 = arith.constant 0 : i32
    %42 = vector.broadcast %c0_i32_9 : i32 to vector<64x1xi32>
    %43 = arith.cmpi sgt, %41, %42 : vector<64x1xi32>
    %44 = arith.extui %43 : vector<64x1xi1> to vector<64x1xi32>
    %45 = arith.sitofp %44 : vector<64x1xi32> to vector<64x1xf32>
    %c7_i32 = arith.constant 7 : i32
    %46 = vector.broadcast %c7_i32 : i32 to vector<64x1xi32>
    %47 = arith.cmpi slt, %41, %46 : vector<64x1xi32>
    %48 = arith.extui %47 : vector<64x1xi1> to vector<64x1xi32>
    %49 = arith.sitofp %48 : vector<64x1xi32> to vector<64x1xf32>
    %50 = tpu.iota {dimensions = array<i32: 0>} : vector<16x1xi32>
    %c4_i32 = arith.constant 4 : i32
    %c0_i32_10 = arith.constant 0 : i32
    %51 = arith.cmpi eq, %c4_i32, %c0_i32_10 : i32
    %c1_i32_11 = arith.constant 1 : i32
    %52 = arith.select %51, %c1_i32_11, %c4_i32 : i32
    %53 = vector.broadcast %52 : i32 to vector<16x1xi32>
    %54 = arith.remsi %50, %53 : vector<16x1xi32>
    %c0_i32_12 = arith.constant 0 : i32
    %55 = vector.broadcast %c0_i32_12 : i32 to vector<16x1xi32>
    %56 = arith.cmpi ne, %54, %55 : vector<16x1xi32>
    %c0_i32_13 = arith.constant 0 : i32
    %57 = vector.broadcast %c0_i32_13 : i32 to vector<16x1xi32>
    %58 = arith.cmpi slt, %54, %57 : vector<16x1xi32>
    %c0_i32_14 = arith.constant 0 : i32
    %59 = arith.cmpi slt, %52, %c0_i32_14 : i32
    %60 = vector.broadcast %59 : i1 to vector<16x1xi1>
    %61 = vector.broadcast %60 : vector<16x1xi1> to vector<16x1xi1>
    %62 = arith.xori %58, %61 : vector<16x1xi1>
    %63 = arith.andi %62, %56 : vector<16x1xi1>
    %64 = vector.broadcast %52 : i32 to vector<16x1xi32>
    %65 = arith.addi %54, %64 : vector<16x1xi32>
    %66 = arith.select %63, %65, %54 : vector<16x1xi1>, vector<16x1xi32>
    %c0_i32_15 = arith.constant 0 : i32
    %67 = vector.broadcast %c0_i32_15 : i32 to vector<16x1xi32>
    %68 = arith.cmpi sgt, %66, %67 : vector<16x1xi32>
    %69 = arith.extui %68 : vector<16x1xi1> to vector<16x1xi32>
    %70 = arith.sitofp %69 : vector<16x1xi32> to vector<16x1xf32>
    %c3_i32 = arith.constant 3 : i32
    %71 = vector.broadcast %c3_i32 : i32 to vector<16x1xi32>
    %72 = arith.cmpi slt, %66, %71 : vector<16x1xi32>
    %73 = arith.extui %72 : vector<16x1xi1> to vector<16x1xi32>
    %74 = arith.sitofp %73 : vector<16x1xi32> to vector<16x1xf32>
    %c0 = arith.constant 0 : index
    %c0_16 = arith.constant 0 : index
    %c0_17 = arith.constant 0 : index
    %75 = vector.load %arg1[%c0, %c0_16, %c0_17] : memref<1x256x32xbf16, #tpu.memory_space<vmem>>, vector<1x256x32xbf16>
    %76 = vector.shape_cast %75 : vector<1x256x32xbf16> to vector<256x32xbf16>
    %c0_18 = arith.constant 0 : index
    %c0_19 = arith.constant 0 : index
    %77 = vector.load %arg2[%c0_18, %c0_19] : memref<32x64xbf16, #tpu.memory_space<vmem>>, vector<32x64xbf16>
    %cst = arith.constant dense<0.000000e+00> : vector<256x64xf32>
    %78 = tpu.matmul %76, %77, %cst {dimension_numbers = #tpu.dot_dimension_numbers<[1], [0], [0], [1], [0, 0, 1, 1], [], []>} : vector<256x32xbf16>, vector<32x64xbf16>, vector<256x64xf32> -> vector<256x64xf32>
    %c0_20 = arith.constant 0 : index
    %c0_21 = arith.constant 0 : index
    %79 = vector.load %arg3[%c0_20, %c0_21] : memref<1x64xf32, #tpu.memory_space<vmem>>, vector<1x64xf32>
    %80 = vector.broadcast %79 : vector<1x64xf32> to vector<256x64xf32>
    %81 = arith.addf %78, %80 : vector<256x64xf32>
    %cst_22 = arith.constant 0.000000e+00 : f32
    %82 = vector.broadcast %cst_22 : f32 to vector<256x64xf32>
    %83 = arith.maximumf %81, %82 : vector<256x64xf32>
    %cst_23 = arith.constant 0.000000e+00 : f32
    %84 = vector.broadcast %cst_23 : f32 to vector<17x64xf32>
    %85 = tpu.concatenate %84, %83, %84 in 0 : vector<17x64xf32>, vector<256x64xf32>, vector<17x64xf32> -> vector<290x64xf32>
    %86 = vector.extract_strided_slice %85 {offsets = [0, 0], sizes = [256, 64], strides = [1, 1]} : vector<290x64xf32> to vector<256x64xf32>
    %87 = vector.broadcast %20 : vector<256x1xf32> to vector<256x64xf32>
    %88 = arith.mulf %86, %87 : vector<256x64xf32>
    %89 = vector.extract_strided_slice %85 {offsets = [1, 0], sizes = [256, 64], strides = [1, 1]} : vector<290x64xf32> to vector<256x64xf32>
    %90 = vector.extract_strided_slice %85 {offsets = [2, 0], sizes = [256, 64], strides = [1, 1]} : vector<290x64xf32> to vector<256x64xf32>
    %91 = vector.broadcast %24 : vector<256x1xf32> to vector<256x64xf32>
    %92 = arith.mulf %90, %91 : vector<256x64xf32>
    %93 = vector.extract_strided_slice %85 {offsets = [16, 0], sizes = [256, 64], strides = [1, 1]} : vector<290x64xf32> to vector<256x64xf32>
    %94 = vector.broadcast %20 : vector<256x1xf32> to vector<256x64xf32>
    %95 = arith.mulf %93, %94 : vector<256x64xf32>
    %96 = vector.extract_strided_slice %85 {offsets = [17, 0], sizes = [256, 64], strides = [1, 1]} : vector<290x64xf32> to vector<256x64xf32>
    %97 = vector.extract_strided_slice %85 {offsets = [18, 0], sizes = [256, 64], strides = [1, 1]} : vector<290x64xf32> to vector<256x64xf32>
    %98 = vector.broadcast %24 : vector<256x1xf32> to vector<256x64xf32>
    %99 = arith.mulf %97, %98 : vector<256x64xf32>
    %100 = vector.extract_strided_slice %85 {offsets = [32, 0], sizes = [256, 64], strides = [1, 1]} : vector<290x64xf32> to vector<256x64xf32>
    %101 = vector.broadcast %20 : vector<256x1xf32> to vector<256x64xf32>
    %102 = arith.mulf %100, %101 : vector<256x64xf32>
    %103 = vector.extract_strided_slice %85 {offsets = [33, 0], sizes = [256, 64], strides = [1, 1]} : vector<290x64xf32> to vector<256x64xf32>
    %104 = vector.extract_strided_slice %85 {offsets = [34, 0], sizes = [256, 64], strides = [1, 1]} : vector<290x64xf32> to vector<256x64xf32>
    %105 = vector.broadcast %24 : vector<256x1xf32> to vector<256x64xf32>
    %106 = arith.mulf %104, %105 : vector<256x64xf32>
    %107 = tpu.concatenate %88, %89, %92, %95, %96, %99, %102, %103, %106 in 1 : vector<256x64xf32>, vector<256x64xf32>, vector<256x64xf32>, vector<256x64xf32>, vector<256x64xf32>, vector<256x64xf32>, vector<256x64xf32>, vector<256x64xf32>, vector<256x64xf32> -> vector<256x576xf32>
    %108 = arith.truncf %107 : vector<256x576xf32> to vector<256x576xbf16>
    %c0_24 = arith.constant 0 : index
    %c0_25 = arith.constant 0 : index
    %109 = vector.load %arg4[%c0_24, %c0_25] : memref<576x64xbf16, #tpu.memory_space<vmem>>, vector<576x64xbf16>
    %cst_26 = arith.constant dense<0.000000e+00> : vector<256x64xf32>
    %110 = tpu.matmul %108, %109, %cst_26 {dimension_numbers = #tpu.dot_dimension_numbers<[1], [0], [0], [1], [0, 0, 1, 1], [], []>} : vector<256x576xbf16>, vector<576x64xbf16>, vector<256x64xf32> -> vector<256x64xf32>
    %c0_27 = arith.constant 0 : index
    %c0_28 = arith.constant 0 : index
    %111 = vector.load %arg5[%c0_27, %c0_28] : memref<1x64xf32, #tpu.memory_space<vmem>>, vector<1x64xf32>
    %112 = vector.broadcast %111 : vector<1x64xf32> to vector<256x64xf32>
    %113 = arith.addf %110, %112 : vector<256x64xf32>
    %114 = arith.addf %113, %83 : vector<256x64xf32>
    %cst_29 = arith.constant 0.000000e+00 : f32
    %115 = vector.broadcast %cst_29 : f32 to vector<256x64xf32>
    %116 = arith.maximumf %114, %115 : vector<256x64xf32>
    %cst_30 = arith.constant 0.000000e+00 : f32
    %117 = vector.broadcast %cst_30 : f32 to vector<17x64xf32>
    %118 = tpu.concatenate %116, %117 in 0 : vector<256x64xf32>, vector<17x64xf32> -> vector<273x64xf32>
    %119 = vector.extract_strided_slice %118 {offsets = [1, 0], sizes = [256, 64], strides = [1, 1]} : vector<273x64xf32> to vector<256x64xf32>
    %120 = arith.maximumf %116, %119 : vector<256x64xf32>
    %121 = vector.extract_strided_slice %118 {offsets = [16, 0], sizes = [256, 64], strides = [1, 1]} : vector<273x64xf32> to vector<256x64xf32>
    %122 = vector.extract_strided_slice %118 {offsets = [17, 0], sizes = [256, 64], strides = [1, 1]} : vector<273x64xf32> to vector<256x64xf32>
    %123 = arith.maximumf %121, %122 : vector<256x64xf32>
    %124 = arith.maximumf %120, %123 : vector<256x64xf32>
    %c0_31 = arith.constant 0 : index
    %c0_32 = arith.constant 0 : index
    %125 = vector.load %arg11[%c0_31, %c0_32] : memref<64x256xf32, #tpu.memory_space<vmem>>, vector<64x256xf32>
    %cst_33 = arith.constant dense<0.000000e+00> : vector<64x64xf32>
    %126 = tpu.matmul %125, %124, %cst_33 {dimension_numbers = #tpu.dot_dimension_numbers<[1], [0], [0], [1], [0, 0, 1, 1], [], []>} : vector<64x256xf32>, vector<256x64xf32>, vector<64x64xf32> -> vector<64x64xf32>
    %cst_34 = arith.constant 0.000000e+00 : f32
    %127 = vector.broadcast %cst_34 : f32 to vector<9x64xf32>
    %128 = tpu.concatenate %127, %126, %127 in 0 : vector<9x64xf32>, vector<64x64xf32>, vector<9x64xf32> -> vector<82x64xf32>
    %129 = vector.extract_strided_slice %128 {offsets = [0, 0], sizes = [64, 64], strides = [1, 1]} : vector<82x64xf32> to vector<64x64xf32>
    %130 = vector.broadcast %45 : vector<64x1xf32> to vector<64x64xf32>
    %131 = arith.mulf %129, %130 : vector<64x64xf32>
    %132 = vector.extract_strided_slice %128 {offsets = [1, 0], sizes = [64, 64], strides = [1, 1]} : vector<82x64xf32> to vector<64x64xf32>
    %133 = vector.extract_strided_slice %128 {offsets = [2, 0], sizes = [64, 64], strides = [1, 1]} : vector<82x64xf32> to vector<64x64xf32>
    %134 = vector.broadcast %49 : vector<64x1xf32> to vector<64x64xf32>
    %135 = arith.mulf %133, %134 : vector<64x64xf32>
    %136 = vector.extract_strided_slice %128 {offsets = [8, 0], sizes = [64, 64], strides = [1, 1]} : vector<82x64xf32> to vector<64x64xf32>
    %137 = vector.broadcast %45 : vector<64x1xf32> to vector<64x64xf32>
    %138 = arith.mulf %136, %137 : vector<64x64xf32>
    %139 = vector.extract_strided_slice %128 {offsets = [9, 0], sizes = [64, 64], strides = [1, 1]} : vector<82x64xf32> to vector<64x64xf32>
    %140 = vector.extract_strided_slice %128 {offsets = [10, 0], sizes = [64, 64], strides = [1, 1]} : vector<82x64xf32> to vector<64x64xf32>
    %141 = vector.broadcast %49 : vector<64x1xf32> to vector<64x64xf32>
    %142 = arith.mulf %140, %141 : vector<64x64xf32>
    %143 = vector.extract_strided_slice %128 {offsets = [16, 0], sizes = [64, 64], strides = [1, 1]} : vector<82x64xf32> to vector<64x64xf32>
    %144 = vector.broadcast %45 : vector<64x1xf32> to vector<64x64xf32>
    %145 = arith.mulf %143, %144 : vector<64x64xf32>
    %146 = vector.extract_strided_slice %128 {offsets = [17, 0], sizes = [64, 64], strides = [1, 1]} : vector<82x64xf32> to vector<64x64xf32>
    %147 = vector.extract_strided_slice %128 {offsets = [18, 0], sizes = [64, 64], strides = [1, 1]} : vector<82x64xf32> to vector<64x64xf32>
    %148 = vector.broadcast %49 : vector<64x1xf32> to vector<64x64xf32>
    %149 = arith.mulf %147, %148 : vector<64x64xf32>
    %150 = tpu.concatenate %131, %132, %135, %138, %139, %142, %145, %146, %149 in 1 : vector<64x64xf32>, vector<64x64xf32>, vector<64x64xf32>, vector<64x64xf32>, vector<64x64xf32>, vector<64x64xf32>, vector<64x64xf32>, vector<64x64xf32>, vector<64x64xf32> -> vector<64x576xf32>
    %151 = arith.truncf %150 : vector<64x576xf32> to vector<64x576xbf16>
    %c0_35 = arith.constant 0 : index
    %c0_36 = arith.constant 0 : index
    %152 = vector.load %arg6[%c0_35, %c0_36] : memref<576x64xbf16, #tpu.memory_space<vmem>>, vector<576x64xbf16>
    %cst_37 = arith.constant dense<0.000000e+00> : vector<64x64xf32>
    %153 = tpu.matmul %151, %152, %cst_37 {dimension_numbers = #tpu.dot_dimension_numbers<[1], [0], [0], [1], [0, 0, 1, 1], [], []>} : vector<64x576xbf16>, vector<576x64xbf16>, vector<64x64xf32> -> vector<64x64xf32>
    %c0_38 = arith.constant 0 : index
    %c0_39 = arith.constant 0 : index
    %154 = vector.load %arg7[%c0_38, %c0_39] : memref<1x64xf32, #tpu.memory_space<vmem>>, vector<1x64xf32>
    %155 = vector.broadcast %154 : vector<1x64xf32> to vector<64x64xf32>
    %156 = arith.addf %153, %155 : vector<64x64xf32>
    %157 = arith.addf %156, %126 : vector<64x64xf32>
    %cst_40 = arith.constant 0.000000e+00 : f32
    %158 = vector.broadcast %cst_40 : f32 to vector<64x64xf32>
    %159 = arith.maximumf %157, %158 : vector<64x64xf32>
    %cst_41 = arith.constant 0.000000e+00 : f32
    %160 = vector.broadcast %cst_41 : f32 to vector<9x64xf32>
    %161 = tpu.concatenate %159, %160 in 0 : vector<64x64xf32>, vector<9x64xf32> -> vector<73x64xf32>
    %162 = vector.extract_strided_slice %161 {offsets = [1, 0], sizes = [64, 64], strides = [1, 1]} : vector<73x64xf32> to vector<64x64xf32>
    %163 = arith.maximumf %159, %162 : vector<64x64xf32>
    %164 = vector.extract_strided_slice %161 {offsets = [8, 0], sizes = [64, 64], strides = [1, 1]} : vector<73x64xf32> to vector<64x64xf32>
    %165 = vector.extract_strided_slice %161 {offsets = [9, 0], sizes = [64, 64], strides = [1, 1]} : vector<73x64xf32> to vector<64x64xf32>
    %166 = arith.maximumf %164, %165 : vector<64x64xf32>
    %167 = arith.maximumf %163, %166 : vector<64x64xf32>
    %c0_42 = arith.constant 0 : index
    %c0_43 = arith.constant 0 : index
    %168 = vector.load %arg12[%c0_42, %c0_43] : memref<16x64xf32, #tpu.memory_space<vmem>>, vector<16x64xf32>
    %cst_44 = arith.constant dense<0.000000e+00> : vector<16x64xf32>
    %169 = tpu.matmul %168, %167, %cst_44 {dimension_numbers = #tpu.dot_dimension_numbers<[1], [0], [0], [1], [0, 0, 1, 1], [], []>} : vector<16x64xf32>, vector<64x64xf32>, vector<16x64xf32> -> vector<16x64xf32>
    %170 = arith.truncf %169 : vector<16x64xf32> to vector<16x64xbf16>
    %c0_45 = arith.constant 0 : index
    %c0_46 = arith.constant 0 : index
    %171 = vector.load %arg10[%c0_45, %c0_46] : memref<64x128xbf16, #tpu.memory_space<vmem>>, vector<64x128xbf16>
    %cst_47 = arith.constant dense<0.000000e+00> : vector<16x128xf32>
    %172 = tpu.matmul %170, %171, %cst_47 {dimension_numbers = #tpu.dot_dimension_numbers<[1], [0], [0], [1], [0, 0, 1, 1], [], []>} : vector<16x64xbf16>, vector<64x128xbf16>, vector<16x128xf32> -> vector<16x128xf32>
    %cst_48 = arith.constant 0.000000e+00 : f32
    %173 = vector.broadcast %cst_48 : f32 to vector<5x64xf32>
    %174 = tpu.concatenate %173, %169, %173 in 0 : vector<5x64xf32>, vector<16x64xf32>, vector<5x64xf32> -> vector<26x64xf32>
    %175 = vector.extract_strided_slice %174 {offsets = [0, 0], sizes = [16, 64], strides = [1, 1]} : vector<26x64xf32> to vector<16x64xf32>
    %176 = vector.broadcast %70 : vector<16x1xf32> to vector<16x64xf32>
    %177 = arith.mulf %175, %176 : vector<16x64xf32>
    %178 = vector.extract_strided_slice %174 {offsets = [1, 0], sizes = [16, 64], strides = [1, 1]} : vector<26x64xf32> to vector<16x64xf32>
    %179 = vector.extract_strided_slice %174 {offsets = [2, 0], sizes = [16, 64], strides = [1, 1]} : vector<26x64xf32> to vector<16x64xf32>
    %180 = vector.broadcast %74 : vector<16x1xf32> to vector<16x64xf32>
    %181 = arith.mulf %179, %180 : vector<16x64xf32>
    %182 = vector.extract_strided_slice %174 {offsets = [4, 0], sizes = [16, 64], strides = [1, 1]} : vector<26x64xf32> to vector<16x64xf32>
    %183 = vector.broadcast %70 : vector<16x1xf32> to vector<16x64xf32>
    %184 = arith.mulf %182, %183 : vector<16x64xf32>
    %185 = vector.extract_strided_slice %174 {offsets = [5, 0], sizes = [16, 64], strides = [1, 1]} : vector<26x64xf32> to vector<16x64xf32>
    %186 = vector.extract_strided_slice %174 {offsets = [6, 0], sizes = [16, 64], strides = [1, 1]} : vector<26x64xf32> to vector<16x64xf32>
    %187 = vector.broadcast %74 : vector<16x1xf32> to vector<16x64xf32>
    %188 = arith.mulf %186, %187 : vector<16x64xf32>
    %189 = vector.extract_strided_slice %174 {offsets = [8, 0], sizes = [16, 64], strides = [1, 1]} : vector<26x64xf32> to vector<16x64xf32>
    %190 = vector.broadcast %70 : vector<16x1xf32> to vector<16x64xf32>
    %191 = arith.mulf %189, %190 : vector<16x64xf32>
    %192 = vector.extract_strided_slice %174 {offsets = [9, 0], sizes = [16, 64], strides = [1, 1]} : vector<26x64xf32> to vector<16x64xf32>
    %193 = vector.extract_strided_slice %174 {offsets = [10, 0], sizes = [16, 64], strides = [1, 1]} : vector<26x64xf32> to vector<16x64xf32>
    %194 = vector.broadcast %74 : vector<16x1xf32> to vector<16x64xf32>
    %195 = arith.mulf %193, %194 : vector<16x64xf32>
    %196 = tpu.concatenate %177, %178, %181, %184, %185, %188, %191, %192, %195 in 1 : vector<16x64xf32>, vector<16x64xf32>, vector<16x64xf32>, vector<16x64xf32>, vector<16x64xf32>, vector<16x64xf32>, vector<16x64xf32>, vector<16x64xf32>, vector<16x64xf32> -> vector<16x576xf32>
    %197 = arith.truncf %196 : vector<16x576xf32> to vector<16x576xbf16>
    %c0_49 = arith.constant 0 : index
    %c0_50 = arith.constant 0 : index
    %198 = vector.load %arg8[%c0_49, %c0_50] : memref<576x128xbf16, #tpu.memory_space<vmem>>, vector<576x128xbf16>
    %cst_51 = arith.constant dense<0.000000e+00> : vector<16x128xf32>
    %199 = tpu.matmul %197, %198, %cst_51 {dimension_numbers = #tpu.dot_dimension_numbers<[1], [0], [0], [1], [0, 0, 1, 1], [], []>} : vector<16x576xbf16>, vector<576x128xbf16>, vector<16x128xf32> -> vector<16x128xf32>
    %c0_52 = arith.constant 0 : index
    %c0_53 = arith.constant 0 : index
    %200 = vector.load %arg9[%c0_52, %c0_53] : memref<1x128xf32, #tpu.memory_space<vmem>>, vector<1x128xf32>
    %201 = vector.broadcast %200 : vector<1x128xf32> to vector<16x128xf32>
    %202 = arith.addf %199, %201 : vector<16x128xf32>
    %203 = arith.addf %202, %172 : vector<16x128xf32>
    %cst_54 = arith.constant 0.000000e+00 : f32
    %204 = vector.broadcast %cst_54 : f32 to vector<16x128xf32>
    %205 = arith.maximumf %203, %204 : vector<16x128xf32>
    %206 = arith.truncf %205 : vector<16x128xf32> to vector<16x128xbf16>
    %c0_55 = arith.constant 0 : index
    %c0_56 = arith.constant 0 : index
    %207 = vector.load %arg13[%c0_55, %c0_56] : memref<128x2xbf16, #tpu.memory_space<vmem>>, vector<128x2xbf16>
    %cst_57 = arith.constant dense<0.000000e+00> : vector<16x2xf32>
    %208 = tpu.matmul %206, %207, %cst_57 {dimension_numbers = #tpu.dot_dimension_numbers<[1], [0], [0], [1], [0, 0, 1, 1], [], []>} : vector<16x128xbf16>, vector<128x2xbf16>, vector<16x2xf32> -> vector<16x2xf32>
    %cst_58 = arith.constant dense<0.000000e+00> : vector<2xf32>
    %209 = vector.multi_reduction <add>, %208, %cst_58 [0] : vector<16x2xf32> to vector<2xf32>
    %210 = vector.shape_cast %209 : vector<2xf32> to vector<1x2xf32>
    %cst_59 = arith.constant 6.250000e-02 : f32
    %211 = vector.broadcast %cst_59 : f32 to vector<1x2xf32>
    %212 = arith.mulf %210, %211 : vector<1x2xf32>
    %c0_60 = arith.constant 0 : index
    %c0_61 = arith.constant 0 : index
    %213 = vector.load %arg14[%c0_60, %c0_61] : memref<1x2xf32, #tpu.memory_space<vmem>>, vector<1x2xf32>
    %214 = arith.addf %212, %213 : vector<1x2xf32>
    %c0_62 = arith.constant 0 : index
    %c0_63 = arith.constant 0 : index
    %c0_64 = arith.constant 0 : index
    %215 = vector.load %arg15[%c0_62, %c0_63, %c0_64] : memref<1x1x2xf32, #tpu.memory_space<vmem>>, vector<1x1x2xf32>
    %216 = vector.shape_cast %215 : vector<1x1x2xf32> to vector<1x2xf32>
    %217 = vector.shape_cast %214 : vector<1x2xf32> to vector<1x1x2xf32>
    tpu.vector_store %arg15[%c0_62, %c0_63, %c0_64], %217 {strides = array<i32>} : memref<1x1x2xf32, #tpu.memory_space<vmem>>, vector<1x1x2xf32>,
    return
  }
  func.func @transform_0(%arg0: i32) -> (i32, i32, i32) {
    %c0_i32 = arith.constant 0 : i32
    %c0_i32_0 = arith.constant 0 : i32
    %c0_i32_1 = arith.constant 0 : i32
    return %arg0, %c0_i32, %c0_i32_0 : i32, i32, i32
  }
  func.func @transform_1(%arg0: i32) -> (i32, i32) {
    %c0_i32 = arith.constant 0 : i32
    %c0_i32_0 = arith.constant 0 : i32
    %c0_i32_1 = arith.constant 0 : i32
    return %c0_i32, %c0_i32_0 : i32, i32
  }
  func.func @transform_2(%arg0: i32) -> (i32, i32) {
    %c0_i32 = arith.constant 0 : i32
    %c0_i32_0 = arith.constant 0 : i32
    %c0_i32_1 = arith.constant 0 : i32
    return %c0_i32, %c0_i32_0 : i32, i32
  }
  func.func @transform_3(%arg0: i32) -> (i32, i32) {
    %c0_i32 = arith.constant 0 : i32
    %c0_i32_0 = arith.constant 0 : i32
    %c0_i32_1 = arith.constant 0 : i32
    return %c0_i32, %c0_i32_0 : i32, i32
  }
  func.func @transform_4(%arg0: i32) -> (i32, i32) {
    %c0_i32 = arith.constant 0 : i32
    %c0_i32_0 = arith.constant 0 : i32
    %c0_i32_1 = arith.constant 0 : i32
    return %c0_i32, %c0_i32_0 : i32, i32
  }
  func.func @transform_5(%arg0: i32) -> (i32, i32) {
    %c0_i32 = arith.constant 0 : i32
    %c0_i32_0 = arith.constant 0 : i32
    %c0_i32_1 = arith.constant 0 : i32
    return %c0_i32, %c0_i32_0 : i32, i32
  }
  func.func @transform_6(%arg0: i32) -> (i32, i32) {
    %c0_i32 = arith.constant 0 : i32
    %c0_i32_0 = arith.constant 0 : i32
    %c0_i32_1 = arith.constant 0 : i32
    return %c0_i32, %c0_i32_0 : i32, i32
  }
  func.func @transform_7(%arg0: i32) -> (i32, i32) {
    %c0_i32 = arith.constant 0 : i32
    %c0_i32_0 = arith.constant 0 : i32
    %c0_i32_1 = arith.constant 0 : i32
    return %c0_i32, %c0_i32_0 : i32, i32
  }
  func.func @transform_8(%arg0: i32) -> (i32, i32) {
    %c0_i32 = arith.constant 0 : i32
    %c0_i32_0 = arith.constant 0 : i32
    %c0_i32_1 = arith.constant 0 : i32
    return %c0_i32, %c0_i32_0 : i32, i32
  }
  func.func @transform_9(%arg0: i32) -> (i32, i32) {
    %c0_i32 = arith.constant 0 : i32
    %c0_i32_0 = arith.constant 0 : i32
    %c0_i32_1 = arith.constant 0 : i32
    return %c0_i32, %c0_i32_0 : i32, i32
  }
  func.func @transform_10(%arg0: i32) -> (i32, i32) {
    %c0_i32 = arith.constant 0 : i32
    %c0_i32_0 = arith.constant 0 : i32
    %c0_i32_1 = arith.constant 0 : i32
    return %c0_i32, %c0_i32_0 : i32, i32
  }
  func.func @transform_11(%arg0: i32) -> (i32, i32) {
    %c0_i32 = arith.constant 0 : i32
    %c0_i32_0 = arith.constant 0 : i32
    %c0_i32_1 = arith.constant 0 : i32
    return %c0_i32, %c0_i32_0 : i32, i32
  }
  func.func @transform_12(%arg0: i32) -> (i32, i32) {
    %c0_i32 = arith.constant 0 : i32
    %c0_i32_0 = arith.constant 0 : i32
    %c0_i32_1 = arith.constant 0 : i32
    return %c0_i32, %c0_i32_0 : i32, i32
  }
  func.func @transform_13(%arg0: i32) -> (i32, i32) {
    %c0_i32 = arith.constant 0 : i32
    %c0_i32_0 = arith.constant 0 : i32
    %c0_i32_1 = arith.constant 0 : i32
    return %c0_i32, %c0_i32_0 : i32, i32
  }
  func.func @transform_14(%arg0: i32) -> (i32, i32, i32) {
    %c0_i32 = arith.constant 0 : i32
    %c0_i32_0 = arith.constant 0 : i32
    %c0_i32_1 = arith.constant 0 : i32
    return %arg0, %c0_i32, %c0_i32_0 : i32, i32, i32
  }
}

</mosaic_0001>

<bundles_post_ra>
// kernel: network_forward.1
= control target key start
LH: loop header
LB: loop body
LE: loop exit
PB: predicated region body
PF: predicated region fallthrough
CT: control target
= control target key end

     0   :  { %s10975_s0 = inlined_call_operand.vmem [shape: bf16[2,256,32], index: 0, kind: input, shape index: {}]   ;;  %s10976_s1 = inlined_call_operand.vmem [shape: bf16[32,64], index: 1, kind: input, shape index: {}]   ;;  %s10977_s2 = inlined_call_operand.vmem [shape: f32[1,64], index: 2, kind: input, shape index: {}]   ;;  %s10978_s3 = inlined_call_operand.vmem [shape: bf16[576,64], index: 3, kind: input, shape index: {}]   ;;  %s10979_s4 = inlined_call_operand.vmem [shape: f32[1,64], index: 4, kind: input, shape index: {}]   ;;  %s10980_s5 = inlined_call_operand.vmem [shape: bf16[576,64], index: 5, kind: input, shape index: {}]   ;;  %s10981_s6 = inlined_call_operand.vmem [shape: f32[1,64], index: 6, kind: input, shape index: {}]   ;;  %s10982_s7 = inlined_call_operand.vmem [shape: bf16[576,128], index: 7, kind: input, shape index: {}]   ;;  %s10983_s8 = inlined_call_operand.vmem [shape: f32[1,128], index: 8, kind: input, shape index: {}]   ;;  %s10984_s9 = inlined_call_operand.vmem [shape: bf16[64,128], index: 9, kind: input, shape index: {}]   ;;  %s10985_s10 = inlined_call_operand.vmem [shape: f32[64,256], index: 10, kind: input, shape index: {}]   ;;  %s10986_s11 = inlined_call_operand.vmem [shape: f32[16,64], index: 11, kind: input, shape index: {}]   ;;  %s10987_s12 = inlined_call_operand.vmem [shape: bf16[128,2], index: 12, kind: input, shape index: {}]   ;;  %s10988_s13 = inlined_call_operand.vmem [shape: f32[1,2], index: 13, kind: input, shape index: {}]   ;;  %s10989_s14 = inlined_call_operand.hbm [shape: f32[2,1,2], index: 14, kind: output, shape index: {}]  }
   0x1   :  { %11220 = sst [smem:[#allocation145_spill]] %s10975_s0 }
   0x2   :  { %11221 = sst [smem:[#allocation146_spill]] %s10976_s1 }
   0x3   :  { %19 = vsyncpa [#allocation3], 0 }
   0x4   :  { %21 = vsyncpa [#allocation3 + $0x1], 0  ;;  %s7740_s29 = smov 0   ;;  %s7742_s30 = smov 0  }
   0x5   :  { %s7744_s15 = smov 0   ;;  %s7746_s16 = smov 0  }
   0x6 LB: > { %11222 = sst [smem:[#allocation5_spill]] %s7653_s15  ;;  %s7761_s17 = sadd.s32 4294967295, %s7657_s16   ;;  %s7657_s16 = sphi %s7746_s16, %s11691_s16   ;;  %s7653_s15 = sphi %s7744_s15, %s11688_s15   ;;  %s7649_s30 = sphi %s7742_s30, %s11690_s30   ;;  %s7645_s29 = sphi %s7740_s29, %s11689_s29  }
   0x7   : > { %s6148_s18 = sadd.s32 4294967294, %s7657_s16   ;;  %s7765_s19 = sadd.s32 1, %s7657_s16  }
   0x8   : > { %s333_s20 = sadd.s32 1, %s7653_s15  ;;  %s330_s21 = ssub.s32 %s7657_s16, %s7765_s19 }
   0x9   : > { %p343_p0 = scmp.ne.s32.totalorder %s7653_s15, %s7649_s30  ;;  %p331_p1 = scmp.eq.s32.totalorder %s330_s21, 0 }
   0xa   : > { %p344_p2 = scmp.eq.s32.totalorder %s7761_s17, 1  ;;  %p349_p3 = scmp.ne.s32.totalorder %s7649_s30, %s7645_s29 }
   0xb   : > { %p350_p4 = scmp.eq.s32.totalorder %s6148_s18, 1  ;;  %p6151_p7 = scmp.ge.s32.totalorder %s7657_s16, 1 }
   0xc   : > { %s7776_s22 = scalar_select %p331_p1, %s7653_s15, %s333_s20  }
   0xd   : > { %p7778_p5 = por %p344_p2, %p343_p0  ;;  %p7782_p6 = por %p350_p4, %p349_p3 }
   0xe   : > { %11223 = sst [smem:[#allocation6_spill]] %s7776_s22  ;;  %p415_p8 = scmp.lt.s32.totalorder %s7657_s16, 3 }
  0x10   : > { %p416_p9 = pnand %p6151_p7, %p415_p8 }
  0x12   : > { %419 = sbr.rel (%p416_p9) target bundleno = 2281 (0x8e9), region = 76 }
  0x19   : > { %s11226_s1 = sld [smem:[#allocation146_spill]]  ;;  %p460_p10 = scmp.lt.s32.totalorder %s7761_s17, 1  ;;  %vm1390_vm0 = vcmask 261120   ;;  %v466_v18 = vlaneseq  ;;  %v10993_v34 = vmov 0.0   ;;  %v7660_v44 = vmov 1.0   ;;  %v7475_v56 = vld [vmem:[%s10978_s3 + $0x40] sm:$0xff]  }
  0x1a   : > { %s11227_s0 = sld [smem:[#allocation145_spill]]  ;;  %v7875_v45 = vrot.slane %v7660_v44, 6  ;;  %v7878_v47 = vrot.slane %v10993_v34, 1  ;;  %vm1827_vm7 = vcmask 1041408   ;;  %6418 = vmatprep.subr.bf16.mxu1 %v7475_v56  ;;  %v7481_v44 = vld [vmem:[%s10978_s3 + $0x58] sm:$0xff]   ;;  %s11204_s25 = smov 64  }
  0x1b   : > { %s461_s18 = scalar_select %p460_p10, %s7761_s17, 1  ;;  %v7833_v19 = vshrl.u32 %v466_v18, 7 }
  0x1c   : > { %11238 = vst [vmem:[#allocation17_spill] sm:$0xff] %v7875_v45  ;;  %11239 = vst [vmem:[#allocation18_spill] sm:$0xff] %v7878_v47  ;;  %s11653_s28 = smov 64  }
  0x1d   : > { %s6399_s20 = sshll.u32 %s461_s18, 7  ;;  %11228 = vst [vmem:[#allocation7_spill] sm:$0xff] %v7833_v19  ;;  %v7836_v20 = vadd.s32 8, %v7833_v19  ;;  %v7839_v21 = vadd.s32 16, %v7833_v19  ;;  %v503_v23 = vand.u32 15, %v7833_v19  ;;  %v7844_v24 = vadd.s32 24, %v7833_v19 }
  0x1e   : > { %v7848_v26 = vadd.s32 32, %v7833_v19  ;;  %v7851_v27 = vadd.s32 48, %v7833_v19  ;;  %v7854_v28 = vadd.s32 40, %v7833_v19  ;;  %v475_v29 = vadd.s32 64, %v7833_v19 }
  0x1f   : > { %v7457_v0 = vld [vmem:[%s11226_s1] sm:$0xff]   ;;  %v7458_v1 = vld [vmem:[%s11226_s1 + $0x8] sm:$0xff]   ;;  %11229 = vst [vmem:[#allocation8_spill] sm:$0xff] %v7836_v20  ;;  %11230 = vst [vmem:[#allocation9_spill] sm:$0xff] %v7839_v21  ;;  %v510_v22 = vand.u32 15, %v7836_v20  ;;  %v517_v25 = vand.u32 15, %v7839_v21 }
  0x20   : > { %6879 = vmatprep.subr.bf16.mxu0 %v7457_v0  ;;  %s7799_s15 = scalar_lea.vmem %s11227_s0, %s6399_s20  ;;  %11231 = vst [vmem:[#allocation10_spill] sm:$0xff] %v7844_v24  ;;  %11232 = vst [vmem:[#allocation11_spill] sm:$0xff] %v7848_v26  ;;  %vm883_vm2 = vcmp.gt.s32.totalorder %v503_v23, 0  ;;  %v524_v30 = vand.u32 15, %v7844_v24  ;;  %v531_v31 = vand.u32 15, %v7848_v26  ;;  %v545_v32 = vand.u32 15, %v7851_v27 }
  0x21   : > { %6880 = vmatpush3.bf16.msra.mxu0 %v7457_v0  ;;  %v7459_v2 = vld [vmem:[%s7799_s15] sm:$0xff]   ;;  %v7460_v3 = vld [vmem:[%s7799_s15 + $0x8] sm:$0xff]   ;;  %v7461_v4 = vld [vmem:[%s7799_s15 + $0x10] sm:$0xff]   ;;  %11233 = vst [vmem:[#allocation12_spill] sm:$0xff] %v7851_v27  ;;  %vm980_vm1 = vcmp.lt.s32.totalorder %v510_v22, 15  ;;  %vm885_vm3 = vcmp.gt.s32.totalorder %v517_v25, 0 }
  0x22   : > { %6881 = vmatprep.subr.bf16.mxu0 %v7458_v1  ;;  %6883 = vmatprep.mubr.msk.bf16.mxu0 %vm1390_vm0, %v7459_v2  ;;  %v7462_v5 = vld [vmem:[%s7799_s15 + $0x18] sm:$0xff]   ;;  %v7463_v6 = vld [vmem:[%s7799_s15 + $0x20] sm:$0xff]   ;;  %v7464_v7 = vld [vmem:[%s7799_s15 + $0x28] sm:$0xff]   ;;  %11234 = vst [vmem:[#allocation13_spill] sm:$0xff] %v7854_v28  ;;  %v477_v33 = vadd.s32 80, %v7833_v19  ;;  %v6170_v35 = vsel %vm980_vm1, 1.0, %v10993_v34 }
  0x23   : > { %v7465_v8 = vld [vmem:[%s7799_s15 + $0x30] sm:$0xff]   ;;  %v7466_v9 = vld [vmem:[%s7799_s15 + $0x38] sm:$0xff]   ;;  %v7467_v10 = vld [vmem:[%s7799_s15 + $0x40] sm:$0xff]   ;;  %v7863_v36 = vsel %vm883_vm2, 1.0, %v10993_v34  ;;  %v479_v37 = vadd.s32 96, %v7833_v19  ;;  %v481_v38 = vadd.s32 112, %v7833_v19 }
  0x24   : > { %v7468_v11 = vld [vmem:[%s7799_s15 + $0x48] sm:$0xff]   ;;  %v7469_v12 = vld [vmem:[%s7799_s15 + $0x50] sm:$0xff]   ;;  %v7470_v13 = vld [vmem:[%s7799_s15 + $0x58] sm:$0xff]   ;;  %11235 = vst [vmem:[#allocation14_spill] sm:$0xff] %v7863_v36  ;;  %v538_v39 = vand.u32 15, %v7854_v28  ;;  %v7869_v40 = vsel %vm885_vm3, 1.0, %v10993_v34 }
  0x25   : > { %6882 = vmatpush3.bf16.msra.mxu0 %v7458_v1  ;;  %v7471_v14 = vld [vmem:[%s7799_s15 + $0x60] sm:$0xff]   ;;  %v7472_v15 = vld [vmem:[%s7799_s15 + $0x68] sm:$0xff]   ;;  %v7473_v16 = vld [vmem:[%s7799_s15 + $0x70] sm:$0xff]   ;;  %11236 = vst [vmem:[#allocation15_spill] sm:$0xff] %v7869_v40  ;;  %v559_v41 = vand.u32 15, %v475_v29  ;;  %vm982_vm4 = vcmp.lt.s32.totalorder %v524_v30, 15 }
  0x26   : > { %v7474_v17 = vld [vmem:[%s7799_s15 + $0x78] sm:$0xff]   ;;  %v7872_v42 = vadd.s32 56, %v7833_v19  ;;  %vm887_vm5 = vcmp.gt.s32.totalorder %v531_v31, 0  ;;  %v483_v43 = vadd.s32 128, %v7833_v19  ;;  %v1829_v46 = vrot.slane %v6170_v35, 6  ;;  %v7478_v23 = vld [vmem:[%s10978_s3 + $0x8] sm:$0xff]  }
  0x27   : > { %vm7880_vm6 = vcmp.gt.s32.totalorder %v545_v32, 0  ;;  %v573_v49 = vand.u32 15, %v477_v33  ;;  %v587_v50 = vand.u32 15, %v479_v37  ;;  %v601_v51 = vand.u32 15, %v481_v38  ;;  %v7479_v31 = vld [vmem:[%s10978_s3 + $0x50] sm:$0xff]   ;;  %v7490_v28 = vld [vmem:[%s10978_s3 + $0x38] sm:$0xff]  }
  0x28   : > { %6884 = vmatmul.mubr.msk.bf16.vlgmr.msra.gmra.mrb[0].mxu0 %vm1390_vm0, %v7460_v3  ;;  %11237 = vst [vmem:[#allocation16_spill] sm:$0xff] %v7872_v42  ;;  %v6171_v52 = vsel %vm982_vm4, 1.0, %v10993_v34  ;;  %vm984_vm8 = vcmp.lt.s32.totalorder %v538_v39, 15  ;;  %v7886_v53 = vsel %vm887_vm5, 1.0, %v10993_v34  ;;  %vm891_vm9 = vcmp.gt.s32.totalorder %v559_v41, 0  ;;  %v7476_v3 = vld [vmem:[%s10978_s3] sm:$0xff]  }
  0x29   : > { %6887 = vmatprep.mubr.msk.bf16.mxu0 %vm1390_vm0, %v7461_v4  ;;  %11242 = vst [vmem:[#allocation19_spill] sm:$0xff] %v7886_v53  ;;  %v552_v54 = vand.u32 15, %v7872_v42  ;;  %v476_v55 = vadd.s32 72, %v7833_v19  ;;  %v615_v57 = vand.u32 15, %v483_v43  ;;  %v7895_v58 = vsel %vm1827_vm7, %v7875_v45, %v1829_v46  ;;  %6419 = vmatpush3.bf16.msra.mxu1 %v7476_v3  ;;  %v7480_v38 = vld [vmem:[%s10978_s3 + $0x10] sm:$0xff]   ;;  %s458_s15 = sand.u32 1, %s7649_s30  }
  0x2a   : > { %11243 = vst [vmem:[#allocation20_spill] sm:$0xff] %v7895_v58  ;;  %v7899_v59 = vsel %vm1827_vm7, %v1829_v46, %v7875_v45  ;;  %v485_v60 = vadd.s32 144, %v7833_v19  ;;  %v7905_v61 = vsel %vm7880_vm6, 1.0, %v10993_v34  ;;  %v1833_v62 = vrot.slane %v6171_v52, 6  ;;  %s459_s1 = scalar_lea.vmem [#allocation2], %s458_s15  ;;  %s6081_s20 = scalar_lea.sflag [#allocation3], %s458_s15 }
  0x2b   : > { %11244 = vst [vmem:[#allocation21_spill] sm:$0xff] %v7899_v59  ;;  %11245 = vst [vmem:[#allocation22_spill] sm:$0xff] %v7905_v61  ;;  %v6172_v63 = vsel %vm984_vm8, 1.0, %v10993_v34  ;;  %v478_v0 = vadd.s32 88, %v7833_v19  ;;  %v7910_v1 = vsel %vm891_vm9, 1.0, %v10993_v34  ;;  %vm893_vm10 = vcmp.gt.s32.totalorder %v573_v49, 0 }
  0x2c   : > { %11246 = vst [vmem:[#allocation23_spill] sm:$0xff] %v7910_v1  ;;  %vm895_vm11 = vcmp.gt.s32.totalorder %v587_v50, 0  ;;  %vm7912_vm12 = vcmp.gt.s32.totalorder %v601_v51, 0  ;;  %v487_v4 = vadd.s32 160, %v7833_v19  ;;  %vm7920_vm13 = vcmp.lt.s32.totalorder %v552_v54, 15  ;;  %s6093_s26 = sshll.u32 %s459_s1, 4  ;;  %s10935_s26 = int_to_ptr.vmem [resolvable:$true] %s6093_s26 }
  0x2d   : > { %vm899_vm14 = vcmp.gt.s32.totalorder %v615_v57, 0  ;;  %v6173_v18 = vsel %vm7920_vm13, 1.0, %v10993_v34  ;;  %v482_v22 = vadd.s32 120, %v7833_v19  ;;  %v489_v35 = vadd.s32 176, %v7833_v19  ;;  %s7595_s21 = scalar_lea.vmem %s10935_s26, 16 }
  0x2e   : > { %v7956_v25 = vsel %vm899_vm14, 1.0, %v10993_v34  ;;  %v643_v29 = vand.u32 15, %v487_v4  ;;  %v1841_v39 = vrot.slane %v6173_v18, 6  ;;  %v491_v41 = vadd.s32 192, %v7833_v19  ;;  %v7483_v4 = vld [vmem:[%s10978_s3 + $0x60] sm:$0xff]   ;;  %p7596_p11 = scmp.ne.s32.totalorder %s10935_s26, %s7595_s21 }
  0x2f   : > { %11254 = vst [vmem:[#allocation27_spill] sm:$0xff] %v7956_v25  ;;  %v484_v43 = vadd.s32 136, %v7833_v19  ;;  %v608_v49 = vand.u32 15, %v482_v22  ;;  %v486_v50 = vadd.s32 152, %v7833_v19  ;;  %v493_v54 = vadd.s32 208, %v7833_v19 }
  0x30   : > { %6888 = vmatmul.mubr.msk.bf16.gmra.mrb[4].mxu0 %vm1390_vm0, %v7462_v5  ;;  %vm7989_vm2 = vcmp.gt.s32.totalorder %v643_v29, 0  ;;  %v8028_v18 = vsel %vm1827_vm7, %v1841_v39, %v7875_v45  ;;  %v497_v22 = vadd.s32 240, %v7833_v19  ;;  %v7484_v29 = vld [vmem:[%s10978_s3 + $0x20] sm:$0xff]   ;;  %p7597_p12 = pnand %p7596_p11, %p7778_p5 }
  0x31   : > { %6891 = vmatprep.mubr.msk.bf16.mxu0 %vm1390_vm0, %v7463_v6  ;;  %v496_v6 = vadd.s32 232, %v7833_v19  ;;  %v622_v3 = vand.u32 15, %v484_v43  ;;  %vm994_vm5 = vcmp.lt.s32.totalorder %v608_v49, 15  ;;  %11268 = vst [vmem:[#allocation33_spill] sm:$0xff] %v8028_v18  ;;  %v8054_v43 = vld [vmem:[%s10977_s2] ss:$0 sm:$0xff] }
  0x32   : > { %v6177_v32 = vsel %vm994_vm5, 1.0, %v10993_v34  ;;  %p7598_p13 = pneg %p7597_p12 }
  0x33   : > { %v706_v30 = vand.u32 15, %v496_v6  ;;  %v495_v6 = vadd.s32 224, %v7833_v19  ;;  %vm996_vm8 = vcmp.lt.s32.totalorder %v622_v3, 15  ;;  %v1857_v52 = vrot.slane %v6177_v32, 6 }
  0x35   : > { %vm1008_vm3 = vcmp.lt.s32.totalorder %v706_v30, 15 }
  0x36   : > { %v8011_v5 = vsel %vm1008_vm3, 1.0, %v10993_v34  ;;  %vm2283_vm3 = vcmask 1045504  }
  0x37   : > { %v10991_v30 = vrot.slane %v8011_v5, 6 }
  0x38   : > { %6892 = vmatmul.mubr.msk.bf16.gmra.mrb[8].mxu0 %vm1390_vm0, %v7464_v7  ;;  %v566_v7 = vand.u32 15, %v476_v55  ;;  %v657_v55 = vand.u32 15, %v489_v35  ;;  %v7485_v35 = vld [vmem:[%s10978_s3 + $0x68] sm:$0xff]  }
  0x39   : > { %6895 = vmatprep.mubr.msk.bf16.mxu0 %vm1390_vm0, %v7465_v8  ;;  %v7477_v8 = vld [vmem:[%s10978_s3 + $0x48] sm:$0xff]  }
  0x3a   : > { %6420 = vmatprep.subr.bf16.mxu1 %v7477_v8  ;;  %vm988_vm15 = vcmp.lt.s32.totalorder %v566_v7, 15  ;;  %v636_v7 = vand.u32 15, %v486_v50  ;;  %v8017_v8 = vsel %vm7989_vm2, 1.0, %v10993_v34  ;;  %vm8022_vm6 = vcmp.gt.s32.totalorder %v657_v55, 0 }
  0x3b   : > { %6421 = vmatpush3.bf16.msra.mxu1 %v7478_v23  ;;  %v6174_v48 = vsel %vm988_vm15, 1.0, %v10993_v34  ;;  %11265 = vst [vmem:[#allocation32_spill] sm:$0xff] %v8017_v8  ;;  %v713_v50 = vand.u32 15, %v497_v22  ;;  %vm2089_vm15 = vcmask 1046528   ;;  %v492_v55 = vadd.s32 200, %v7833_v19 }
  0x3c   : > { %6422 = vmatprep.subr.bf16.mxu1 %v7479_v31  ;;  %v1845_v2 = vrot.slane %v6174_v48, 6 }
  0x3e   : > { %v8037_v31 = vsel %vm1827_vm7, %v7875_v45, %v1845_v2  ;;  %v8063_v48 = vsel %vm1827_vm7, %v1845_v2, %v7875_v45 }
  0x3f   : > { %6423 = vmatpush3.bf16.msra.mxu1 %v7480_v38  ;;  %11269 = vst [vmem:[#allocation34_spill] sm:$0xff] %v8037_v31  ;;  %v699_v38 = vand.u32 15, %v495_v6  ;;  %11275 = vst [vmem:[#allocation36_spill] sm:$0xff] %v8063_v48 }
  0x40   : > { %6896 = vmatmul.mubr.msk.bf16.gmra.mrb[12].mxu0 %vm1390_vm0, %v7466_v9  ;;  %v629_v9 = vand.u32 15, %v485_v60  ;;  %v488_v60 = vadd.s32 168, %v7833_v19  ;;  %6424 = vmatprep.subr.bf16.mxu1 %v7481_v44  ;;  %v8059_v44 = vsel %vm8022_vm6, 1.0, %v10993_v34  ;;  %vm2880_vm6 = vcmask 523264  }
  0x41   : > { %6899 = vmatprep.mubr.msk.bf16.mxu0 %vm1390_vm0, %v7467_v10  ;;  %v1837_v10 = vrot.slane %v6172_v63, 6  ;;  %v8005_v63 = vsel %vm1827_vm7, %v7875_v45, %v1841_v39  ;;  %11274 = vst [vmem:[#allocation35_spill] sm:$0xff] %v8059_v44  ;;  %vm8098_vm14 = vcmp.gt.s32.totalorder %v699_v38, 0 }
  0x42   : > { %11264 = vst [vmem:[#allocation31_spill] sm:$0xff] %v8005_v63  ;;  %v650_v23 = vand.u32 15, %v488_v60  ;;  %v8086_v60 = vsel %vm1827_vm7, %v10991_v30, %v7875_v45 }
  0x43   : > { %v7967_v33 = vsel %vm1827_vm7, %v7875_v45, %v1837_v10  ;;  %v7980_v46 = vsel %vm1827_vm7, %v1837_v10, %v7875_v45 }
  0x44   : > { %11257 = vst [vmem:[#allocation28_spill] sm:$0xff] %v7967_v33  ;;  %11258 = vst [vmem:[#allocation29_spill] sm:$0xff] %v7980_v46  ;;  %vm8070_vm13 = vcmp.lt.s32.totalorder %v650_v23, 15  ;;  %v490_v23 = vadd.s32 184, %v7833_v19 }
  0x45   : > { %v6180_v22 = vsel %vm8070_vm13, 1.0, %v10993_v34 }
  0x46   : > { %v664_v30 = vand.u32 15, %v490_v23 }
  0x48   : > { %6900 = vmatmul.mubr.msk.bf16.gmra.mrb[16].mxu0 %vm1390_vm0, %v7468_v11  ;;  %v480_v11 = vadd.s32 104, %v7833_v19 }
  0x49   : > { %6903 = vmatprep.mubr.msk.bf16.mxu0 %vm1390_vm0, %v7469_v12  ;;  %v7930_v12 = vsel %vm893_vm10, 1.0, %v10993_v34  ;;  %vm8047_vm10 = vcmp.lt.s32.totalorder %v636_v7, 15 }
  0x4a   : > { %11251 = vst [vmem:[#allocation24_spill] sm:$0xff] %v7930_v12  ;;  %v594_v37 = vand.u32 15, %v480_v11 }
  0x4c   : > { %vm7995_vm4 = vcmp.lt.s32.totalorder %v594_v37, 15  ;;  %v8129_v37 = vsel %vm1827_vm7, %v7875_v45, %v1857_v52 }
  0x4d   : > { %v6176_v11 = vsel %vm7995_vm4, 1.0, %v10993_v34  ;;  %11290 = vst [vmem:[#allocation45_spill] sm:$0xff] %v8129_v37 }
  0x4e   : > { %v1853_v39 = vrot.slane %v6176_v11, 6 }
  0x50   : > { %6904 = vmatmul.mubr.msk.bf16.gmra.mrb[20].mxu0 %vm1390_vm0, %v7470_v13  ;;  %v7933_v13 = vsel %vm895_vm11, 1.0, %v10993_v34  ;;  %vm1664_vm11 = vcmask 1040384   ;;  %v8104_v6 = vsel %vm1827_vm7, %v7875_v45, %v1853_v39  ;;  %v8108_v7 = vsel %vm1827_vm7, %v1853_v39, %v7875_v45 }
  0x51   : > { %6907 = vmatprep.mubr.msk.bf16.mxu0 %vm1390_vm0, %v7471_v14  ;;  %11252 = vst [vmem:[#allocation25_spill] sm:$0xff] %v7933_v13  ;;  %v7937_v14 = vsel %vm1827_vm7, %v7875_v45, %v1833_v62  ;;  %11284 = vst [vmem:[#allocation41_spill] sm:$0xff] %v8104_v6 }
  0x52   : > { %11285 = vst [vmem:[#allocation42_spill] sm:$0xff] %v8108_v7 }
  0x58   : > { %6908 = vmatmul.mubr.msk.bf16.gmra.mrb[24].mxu0 %vm1390_vm0, %v7472_v15  ;;  %v580_v15 = vand.u32 15, %v478_v0  ;;  %v671_v0 = vand.u32 15, %v491_v41 }
  0x59   : > { %6911 = vmatprep.mubr.msk.bf16.mxu0 %vm1390_vm0, %v7473_v16  ;;  %v7942_v16 = vsel %vm7912_vm12, 1.0, %v10993_v34 }
  0x5a   : > { %11253 = vst [vmem:[#allocation26_spill] sm:$0xff] %v7942_v16  ;;  %vm990_vm1 = vcmp.lt.s32.totalorder %v580_v15, 15  ;;  %vm8043_vm9 = vcmp.gt.s32.totalorder %v671_v0, 0  ;;  %v6179_v0 = vsel %vm8047_vm10, 1.0, %v10993_v34 }
  0x5b   : > { %v6175_v56 = vsel %vm990_vm1, 1.0, %v10993_v34  ;;  %v8080_v57 = vsel %vm8043_vm9, 1.0, %v10993_v34  ;;  %v1865_v38 = vrot.slane %v6179_v0, 6  ;;  %vm8208_vm1 = vcmp.lt.s32.totalorder %v664_v30, 15 }
  0x5c   : > { %v1849_v10 = vrot.slane %v6175_v56, 6  ;;  %v7486_v56 = vld [vmem:[%s10978_s3 + $0x28] sm:$0xff]   ;;  %11279 = vst [vmem:[#allocation38_spill] sm:$0xff] %v8080_v57  ;;  %vm7662_vm9 = vmmov 1  }
  0x5d   : > { %v8177_v23 = vsel %vm1827_vm7, %v1865_v38, %v7875_v45 }
  0x5e   : > { %v8067_v49 = vsel %vm1827_vm7, %v7875_v45, %v1849_v10  ;;  %11299 = vst [vmem:[#allocation54_spill] sm:$0xff] %v8177_v23 }
  0x5f   : > { %11276 = vst [vmem:[#allocation37_spill] sm:$0xff] %v8067_v49 }
  0x60   : > { %6912 = vmatmul.mubr.msk.bf16.gmra.mrb[28].mxu0 %vm1390_vm0, %v7474_v17  ;;  %v7946_v17 = vsel %vm1827_vm7, %v1833_v62, %v7875_v45  ;;  %vm7961_vm0 = vcmp.gt.s32.totalorder %v629_v9, 0  ;;  %v7482_v62 = vld [vmem:[%s10978_s3 + $0x18] sm:$0xff]   ;;  %v685_v9 = vand.u32 15, %v493_v54  ;;  %v6178_v54 = vsel %vm996_vm8, 1.0, %v10993_v34  ;;  %vm6278_vm8 = vmneg %vm2880_vm6 }
  0x61   : > { %v7987_v51 = vsel %vm7961_vm0, 1.0, %v10993_v34  ;;  %6425 = vmatpush3.bf16.msra.mxu1 %v7482_v62  ;;  %v8090_v62 = vsel %vm1827_vm7, %v1849_v10, %v7875_v45  ;;  %v1861_v15 = vrot.slane %v6178_v54, 6  ;;  %vm8123_vm0 = vcmp.gt.s32.totalorder %v713_v50, 0  ;;  %vm9051_vm10 = vmpackc.low %vm6278_vm8, %vm7662_vm9 }
  0x62   : > { %11259 = vst [vmem:[#allocation30_spill] sm:$0xff] %v7987_v51  ;;  %6426 = vmatprep.subr.bf16.mxu1 %v7483_v4  ;;  %vm909_vm12 = vcmp.gt.s32.totalorder %v685_v9, 0  ;;  %11280 = vst [vmem:[#allocation39_spill] sm:$0xff] %v8090_v62  ;;  %v7487_v9 = vld [vmem:[%s10978_s3 + $0x70] sm:$0xff]   ;;  %v8137_v54 = vsel %vm8098_vm14, 1.0, %v10993_v34  ;;  %v8141_v50 = vsel %vm1827_vm7, %v1857_v52, %v7875_v45  ;;  %v1869_v4 = vrot.slane %v6180_v22, 6 }
  0x63   : > { %v8096_v3 = vsel %vm909_vm12, 1.0, %v10993_v34  ;;  %11292 = vst [vmem:[#allocation47_spill] sm:$0xff] %v8137_v54  ;;  %11293 = vst [vmem:[#allocation48_spill] sm:$0xff] %v8141_v50  ;;  %v8156_v52 = vsel %vm8123_vm0, 1.0, %v10993_v34  ;;  %v8167_v22 = vsel %vm1827_vm7, %v1861_v15, %v7875_v45  ;;  %v678_v34 = vand.u32 15, %v492_v55 }
  0x64   : > { %11281 = vst [vmem:[#allocation40_spill] sm:$0xff] %v8096_v3  ;;  %11295 = vst [vmem:[#allocation50_spill] sm:$0xff] %v8156_v52  ;;  %v8197_v24 = vsel %vm1827_vm7, %v7875_v45, %v1869_v4 }
  0x65   : > { %6427 = vmatpush3.bf16.msra.mxu1 %v7484_v29  ;;  %11297 = vst [vmem:[#allocation52_spill] sm:$0xff] %v8167_v22  ;;  %11303 = vst [vmem:[#allocation56_spill] sm:$0xff] %v8197_v24  ;;  %vm8249_vm2 = vcmp.lt.s32.totalorder %v678_v34, 15 }
  0x66   : > { %6428 = vmatprep.subr.bf16.mxu1 %v7485_v35 }
  0x69   : > { %6429 = vmatpush3.bf16.msra.mxu1 %v7486_v56  ;;  %v7488_v56 = vld [vmem:[%s10978_s3 + $0x30] sm:$0xff]  }
  0x6a   : > { %6430 = vmatprep.subr.bf16.mxu1 %v7487_v9  ;;  %v8160_v9 = vsel %vm1827_vm7, %v7875_v45, %v1861_v15  ;;  %v7489_v15 = vld [vmem:[%s10978_s3 + $0x78] sm:$0xff]  }
  0x6b   : > { %11296 = vst [vmem:[#allocation51_spill] sm:$0xff] %v8160_v9 }
  0x6d   : > { %6431 = vmatpush3.bf16.msra.mxu1 %v7488_v56 }
  0x6e   : > { %6432 = vmatprep.subr.bf16.mxu1 %v7489_v15 }
  0x71   : > { %6433 = vmatpush3.bf16.msra.mxu1 %v7490_v28 }
  0xfb   : > { %v6885_v2 = vpop.f32.mrb[0].mxu0 }
  0xfc   : > { %v8114_v10 = vadd.f32 %v6885_v2, %v8054_v43  ;;  %v1473_v11 = vpop.f32.mrb[1].mxu0 }
  0xfd   : > { %v8121_v29 = vadd.f32 %v8054_v43, %v1473_v11  ;;  %v6886_v32 = vpop.f32.mrb[2].mxu0 }
  0xfe   : > { %11286 = vst [vmem:[#allocation43_spill] sm:$0xff] %v8114_v10  ;;  %v8132_v39 = vadd.f32 %v6886_v32, %v8054_v43  ;;  %v1476_v41 = vpop.f32.mrb[3].mxu0  ;;  %v11300_v56 = vmax.f32 %v8114_v10, 0.0 }
  0xff   : > { %11287 = vst [vmem:[#allocation44_spill] sm:$0xff] %v8121_v29  ;;  %v10995_v2 = vmax.f32 %v8121_v29, 0.0  ;;  %v8150_v11 = vadd.f32 %v8054_v43, %v1476_v41  ;;  %v8171_v41 = vsel %vm1827_vm7, %v7875_v45, %v1865_v38 }
 0x100   : > { %11291 = vst [vmem:[#allocation46_spill] sm:$0xff] %v8132_v39  ;;  %v10997_v32 = vmax.f32 %v8132_v39, 0.0  ;;  %11298 = vst [vmem:[#allocation53_spill] sm:$0xff] %v8171_v41  ;;  %v1668_v26 = vrot.slane %v11300_v56, 7  ;;  %v8206_v56 = vsel %vm1827_vm7, %v1869_v4, %v7875_v45  ;;  %v7495_v39 = vld [vmem:[%s10978_s3 + $0xd0] sm:$0xff]  }
 0x101   : > { %11294 = vst [vmem:[#allocation49_spill] sm:$0xff] %v8150_v11  ;;  %v1665_v0 = vrot.slane %v10995_v2, 7  ;;  %v8180_v2 = vadd.s32 216, %v7833_v19  ;;  %v11302_v38 = vmax.f32 %v8150_v11, 0.0  ;;  %11305 = vst [vmem:[#allocation58_spill] sm:$0xff] %v8206_v56 }
 0x102   : > { %v1670_v35 = vrot.slane %v10997_v32, 7 }
 0x103   : > { %v8191_v32 = vsel %vm1664_vm11, 0.0, %v1665_v0  ;;  %v1666_v55 = vrot.slane %v11302_v38, 7  ;;  %v6889_v27 = vpop.f32.mrb[4].mxu0  ;;  %v7491_v38 = vld [vmem:[%s10978_s3 + $0xc0] sm:$0xff]  }
 0x104   : > { %11301 = vst [vmem:[#allocation55_spill] sm:$0xff] %v8191_v32  ;;  %v8200_v21 = vadd.f32 %v6889_v27, %v8054_v43  ;;  %v1489_v42 = vpop.f32.mrb[5].mxu0  ;;  %v1957_v20 = vmul.f32 %v7863_v36, %v8191_v32  ;;  %v2092_v30 = vrot.slane %v8191_v32, 1  ;;  %v8226_v10 = vsel %vm1664_vm11, %v1668_v26, %v1670_v35  ;;  %6530 = vmatprep.subr.bf16.mxu0 %v7491_v38 }
 0x105   : > { %v8216_v27 = vsel %vm1664_vm11, %v1665_v0, %v1666_v55  ;;  %v8219_v11 = vsel %vm1664_vm11, %v1666_v55, %v1668_v26  ;;  %v8222_v29 = vadd.f32 %v8054_v43, %v1489_v42  ;;  %v6890_v4 = vpop.f32.mrb[6].mxu0  ;;  %11311 = vst [vmem:[#allocation62_spill] sm:$0xff] %v8226_v10  ;;  %v7492_v42 = vld [vmem:[%s10978_s3 + $0x80] sm:$0xff]   ;;  %v2098_v22 = vrot.slane %v8226_v10, 1 }
 0x106   : > { %11304 = vst [vmem:[#allocation57_spill] sm:$0xff] %v8200_v21  ;;  %11308 = vst [vmem:[#allocation59_spill] sm:$0xff] %v8216_v27  ;;  %v11015_v15 = vmax.f32 %v8200_v21, 0.0  ;;  %v8230_v36 = vadd.f32 %v6890_v4, %v8054_v43  ;;  %v1492_v0 = vpop.f32.mrb[7].mxu0  ;;  %v7132_v56 = vpack.i.bf16 %v8216_v27, %v1957_v20  ;;  %v1959_v26 = vmul.f32 %v7869_v40, %v8219_v11 }
 0x107   : > { %11309 = vst [vmem:[#allocation60_spill] sm:$0xff] %v8219_v11  ;;  %11310 = vst [vmem:[#allocation61_spill] sm:$0xff] %v8222_v29  ;;  %v8238_v28 = vadd.f32 %v8054_v43, %v1492_v0  ;;  %v2093_v4 = vsel %vm2089_vm15, %v7878_v47, %v2092_v30  ;;  %v2094_v38 = vrot.slane %v8216_v27, 1  ;;  %6531 = vmatpush3.bf16.msra.mxu0 %v7492_v42  ;;  %v7493_v0 = vld [vmem:[%s10978_s3 + $0xc8] sm:$0xff]   ;;  %v11316_v40 = vmax.f32 %v8222_v29, 0.0 }
 0x108   : > { %11312 = vst [vmem:[#allocation63_spill] sm:$0xff] %v8230_v36  ;;  %v1676_v24 = vrot.slane %v11015_v15, 7  ;;  %7133 = vrot.lane.b32.xlu0 %v7132_v56, %s11204_s25  ;;  %v7142_v20 = vpack.i.bf16 %v8226_v10, %v1959_v26  ;;  %v2096_v56 = vrot.slane %v8219_v11, 1  ;;  %v11317_v23 = vmax.f32 %v8230_v36, 0.0  ;;  %6532 = vmatprep.subr.bf16.mxu0 %v7493_v0 }
 0x109   : > { %11313 = vst [vmem:[#allocation64_spill] sm:$0xff] %v8238_v28  ;;  %v1672_v21 = vrot.slane %v11316_v40, 7  ;;  %v7137_v41 = vpack.i.bf16 %v2093_v4, %v7878_v47  ;;  %v8265_v42 = vsel %vm2089_vm15, %v2092_v30, %v2094_v38  ;;  %v7494_v40 = vld [vmem:[%s10978_s3 + $0x88] sm:$0xff]   ;;  %v11320_v26 = vmax.f32 %v8238_v28, 0.0 }
 0x10a   : > { %v1678_v34 = vrot.slane %v11317_v23, 7  ;;  %11318 = vst [vmem:[#allocation65_spill] sm:$0xff] %v8265_v42  ;;  %7143 = vrot.lane.b32.xlu1 %v7142_v20, %s11204_s25  ;;  %v8278_v4 = vsel %vm2089_vm15, %v2094_v38, %v2096_v56  ;;  %v11322_v30 = vmov 0.0  }
 0x10b   : > { %v8272_v15 = vsel %vm1664_vm11, %v1670_v35, %v1672_v21  ;;  %v1674_v29 = vrot.slane %v11320_v26, 7  ;;  %v6893_v23 = vpop.f32.mrb[8].mxu0  ;;  %11321 = vst [vmem:[#allocation67_spill] sm:$0xff] %v8278_v4  ;;  %v8283_v0 = vsel %vm8208_vm1, 1.0, %v11322_v30  ;;  %v7147_v20 = vpack.i.bf16 %v8278_v4, %v8265_v42  ;;  %6533 = vmatpush3.bf16.msra.mxu0 %v7494_v40 }
 0x10c   : > { %11319 = vst [vmem:[#allocation66_spill] sm:$0xff] %v8272_v15  ;;  %v8286_v36 = vsel %vm1664_vm11, %v1676_v24, %v1678_v34  ;;  %v8289_v35 = vadd.f32 %v6893_v23, %v8054_v43  ;;  %v1505_v47 = vpop.f32.mrb[9].mxu0  ;;  %7138 = vrot.lane.b32.xlu0 %v7137_v41, %s11204_s25  ;;  %v8297_v38 = vsel %vm8249_vm2, 1.0, %v11322_v30  ;;  %v1961_v42 = vmul.f32 %v7886_v53, %v8272_v15 }
 0x10d   : > { %11323 = vst [vmem:[#allocation68_spill] sm:$0xff] %v8286_v36  ;;  %v8303_v26 = vsel %vm1664_vm11, %v1672_v21, %v1674_v29  ;;  %v8306_v23 = vsel %vm1664_vm11, %v1674_v29, %v1676_v24  ;;  %v8309_v41 = vadd.f32 %v8054_v43, %v1505_v47  ;;  %v6894_v28 = vpop.f32.mrb[10].mxu0  ;;  %v8318_v21 = vsel %vm2089_vm15, %v2096_v56, %v2098_v22  ;;  %v7496_v56 = vld [vmem:[%s10978_s3 + $0x90] sm:$0xff]  }
 0x10e   : > { %11324 = vst [vmem:[#allocation69_spill] sm:$0xff] %v8289_v35  ;;  %v11032_v55 = vmax.f32 %v8289_v35, 0.0  ;;  %v8315_v4 = vadd.f32 %v6894_v28, %v8054_v43  ;;  %v1508_v9 = vpop.f32.mrb[11].mxu0  ;;  %11327 = vst [vmem:[#allocation72_spill] sm:$0xff] %v8318_v21  ;;  %v2100_v24 = vrot.slane %v8272_v15, 1  ;;  %6534 = vmatprep.subr.bf16.mxu0 %v7495_v39  ;;  %7148 = vrot.lane.b32.xlu1 %v7147_v20, %s11204_s25  ;;  %v2104_v52 = vrot.slane %v8306_v23, 1 }
 0x10f   : > { %11325 = vst [vmem:[#allocation70_spill] sm:$0xff] %v8309_v41  ;;  %v8323_v29 = vadd.f32 %v8054_v43, %v1508_v9  ;;  %v7152_v40 = vpack.i.bf16 %v8303_v26, %v1961_v42  ;;  %v1963_v28 = vmul.f32 %v7905_v61, %v8306_v23  ;;  %v2102_v9 = vrot.slane %v8303_v26, 1  ;;  %v7497_v42 = vld [vmem:[%s10978_s3 + $0xd8] sm:$0xff]   ;;  %6535 = vmatpush3.bf16.msra.mxu0 %v7496_v56 }
 0x110   : > { %11326 = vst [vmem:[#allocation71_spill] sm:$0xff] %v8315_v4  ;;  %v1684_v53 = vrot.slane %v11032_v55, 7  ;;  %v8336_v47 = vsel %vm2089_vm15, %v2098_v22, %v2100_v24  ;;  %v11330_v20 = vmax.f32 %v8309_v41, 0.0  ;;  %v11331_v22 = vmax.f32 %v8315_v4, 0.0  ;;  %6536 = vmatprep.subr.bf16.mxu0 %v7497_v42  ;;  %v7498_v42 = vld [vmem:[%s10978_s3 + $0x98] sm:$0xff]   ;;  %v7499_v4 = vld [vmem:[%s10978_s3 + $0xe0] sm:$0xff]  }
 0x111   : > { %11328 = vst [vmem:[#allocation73_spill] sm:$0xff] %v8323_v29  ;;  %11329 = vst [vmem:[#allocation74_spill] sm:$0xff] %v8336_v47  ;;  %7153 = vrot.lane.b32.xlu0 %v7152_v40, %s11204_s25  ;;  %v7157_v55 = vpack.i.bf16 %v8336_v47, %v8318_v21  ;;  %v7162_v39 = vpack.i.bf16 %v8286_v36, %v1963_v28  ;;  %v8352_v37 = vsel %vm2089_vm15, %v2100_v24, %v2102_v9 }
 0x112   : > { %v1680_v61 = vrot.slane %v11330_v20, 7  ;;  %v1686_v35 = vrot.slane %v11331_v22, 7  ;;  %11332 = vst [vmem:[#allocation75_spill] sm:$0xff] %v8352_v37  ;;  %v2106_v20 = vrot.slane %v8286_v36, 1  ;;  %v11334_v40 = vmax.f32 %v8323_v29, 0.0 }
 0x113   : > { %7158 = vrot.lane.b32.xlu1 %v7157_v55, %s11204_s25  ;;  %v6897_v28 = vpop.f32.mrb[12].mxu0  ;;  %v8364_v56 = vmul.f32 %v7875_v45, %v8191_v32  ;;  %v8368_v24 = vmul.f32 %v7895_v58, %v8216_v27  ;;  %6537 = vmatpush3.bf16.msra.mxu0 %v7498_v42 }
 0x114   : > { %v8357_v50 = vsel %vm1664_vm11, %v1678_v34, %v1680_v61  ;;  %v1682_v41 = vrot.slane %v11334_v40, 7  ;;  %v8374_v34 = vsel %vm1664_vm11, %v1684_v53, %v1686_v35  ;;  %v8377_v22 = vadd.f32 %v6897_v28, %v8054_v43  ;;  %v1521_v55 = vpop.f32.mrb[13].mxu0  ;;  %6538 = vmatprep.subr.bf16.mxu0 %v7499_v4 }
 0x115   : > { %11333 = vst [vmem:[#allocation76_spill] sm:$0xff] %v8357_v50  ;;  %11335 = vst [vmem:[#allocation77_spill] sm:$0xff] %v8374_v34  ;;  %v8380_v40 = vsel %vm2089_vm15, %v2102_v9, %v2104_v52  ;;  %v1965_v29 = vmul.f32 %v7910_v1, %v8357_v50  ;;  %v8394_v28 = vadd.f32 %v8054_v43, %v1521_v55  ;;  %7163 = vrot.lane.b32.xlu0 %v7162_v39, %s11204_s25  ;;  %v6898_v9 = vpop.f32.mrb[14].mxu0 }
 0x116   : > { %11336 = vst [vmem:[#allocation78_spill] sm:$0xff] %v8377_v22  ;;  %11337 = vst [vmem:[#allocation79_spill] sm:$0xff] %v8380_v40  ;;  %v8388_v47 = vsel %vm1664_vm11, %v1680_v61, %v1682_v41  ;;  %v8391_v21 = vsel %vm1664_vm11, %v1682_v41, %v1684_v53  ;;  %v7167_v32 = vpack.i.bf16 %v8380_v40, %v8352_v37  ;;  %v11052_v1 = vmax.f32 %v8377_v22, 0.0  ;;  %v1524_v27 = vpop.f32.mrb[15].mxu0 }
 0x117   : > { %11338 = vst [vmem:[#allocation80_spill] sm:$0xff] %v8388_v47  ;;  %11339 = vst [vmem:[#allocation81_spill] sm:$0xff] %v8391_v21  ;;  %v8401_v58 = vadd.f32 %v6898_v9, %v8054_v43  ;;  %v7172_v61 = vpack.i.bf16 %v8388_v47, %v1965_v29  ;;  %v8405_v53 = vsel %vm2089_vm15, %v2104_v52, %v2106_v20  ;;  %v2108_v55 = vrot.slane %v8357_v50, 1  ;;  %v7500_v29 = vld [vmem:[%s10978_s3 + $0xa0] sm:$0xff]  }
 0x118   : > { %11340 = vst [vmem:[#allocation82_spill] sm:$0xff] %v8394_v28  ;;  %11342 = vst [vmem:[#allocation84_spill] sm:$0xff] %v8405_v53  ;;  %v8409_v39 = vadd.f32 %v8054_v43, %v1524_v27  ;;  %7168 = vrot.lane.b32.xlu1 %v7167_v32, %s11204_s25  ;;  %v1967_v9 = vmul.f32 %v7930_v12, %v8391_v21  ;;  %v1692_v52 = vrot.slane %v11052_v1, 7  ;;  %v2110_v27 = vrot.slane %v8388_v47, 1  ;;  %v7501_v32 = vld [vmem:[%s10978_s3 + $0xe8] sm:$0xff]  }
 0x119   : > { %11341 = vst [vmem:[#allocation83_spill] sm:$0xff] %v8401_v58  ;;  %v11057_v42 = vmax.f32 %v8401_v58, 0.0  ;;  %v2112_v41 = vrot.slane %v8391_v21, 1  ;;  %v11344_v40 = vmax.f32 %v8394_v28, 0.0  ;;  %7173 = vrot.lane.b32.xlu0 %v7172_v61, %s11204_s25  ;;  %v8431_v22 = vsel %vm2089_vm15, %v2106_v20, %v2108_v55  ;;  %6539 = vmatpush3.bf16.msra.mxu0 %v7500_v29 }
 0x11a   : > { %11343 = vst [vmem:[#allocation85_spill] sm:$0xff] %v8409_v39  ;;  %v11059_v37 = vmax.f32 %v8409_v39, 0.0  ;;  %11345 = vst [vmem:[#allocation86_spill] sm:$0xff] %v8431_v22  ;;  %v7182_v1 = vpack.i.bf16 %v8374_v34, %v1967_v9  ;;  %v7177_v7 = vpack.i.bf16 %v8431_v22, %v8405_v53  ;;  %v8439_v6 = vsel %vm2089_vm15, %v2108_v55, %v2110_v27  ;;  %v7502_v55 = vld [vmem:[%s10978_s3 + $0xa8] sm:$0xff]  }
 0x11b   : > { %v1688_v4 = vrot.slane %v11344_v40, 7  ;;  %v1694_v12 = vrot.slane %v11057_v42, 7  ;;  %11346 = vst [vmem:[#allocation87_spill] sm:$0xff] %v8439_v6  ;;  %v8442_v40 = vsel %vm2089_vm15, %v2110_v27, %v2112_v41  ;;  %v6901_v9 = vpop.f32.mrb[16].mxu0  ;;  %v2114_v58 = vrot.slane %v8374_v34, 1  ;;  %6540 = vmatprep.subr.bf16.mxu0 %v7501_v32  ;;  %v7503_v32 = vld [vmem:[%s10978_s3 + $0xf0] sm:$0xff]  }
 0x11c   : > { %11347 = vst [vmem:[#allocation88_spill] sm:$0xff] %v8442_v40  ;;  %v1690_v20 = vrot.slane %v11059_v37, 7  ;;  %v7187_v42 = vpack.i.bf16 %v8442_v40, %v8439_v6  ;;  %7178 = vrot.lane.b32.xlu1 %v7177_v7, %s11204_s25  ;;  %v1537_v29 = vpop.f32.mrb[17].mxu0 }
 0x11d   : > { %v8445_v61 = vsel %vm1664_vm11, %v1686_v35, %v1688_v4  ;;  %v8456_v27 = vsel %vm1664_vm11, %v1692_v52, %v1694_v12  ;;  %v8460_v35 = vadd.f32 %v6901_v9, %v8054_v43  ;;  %v8475_v7 = vadd.f32 %v8054_v43, %v1537_v29  ;;  %7183 = vrot.lane.b32.xlu0 %v7182_v1, %s11204_s25  ;;  %v6902_v9 = vpop.f32.mrb[18].mxu0 }
 0x11e   : > { %11348 = vst [vmem:[#allocation89_spill] sm:$0xff] %v8445_v61  ;;  %11349 = vst [vmem:[#allocation90_spill] sm:$0xff] %v8456_v27  ;;  %v1969_v37 = vmul.f32 %v7933_v13, %v8445_v61  ;;  %v2116_v39 = vrot.slane %v8445_v61, 1  ;;  %v8469_v28 = vsel %vm1664_vm11, %v1688_v4, %v1690_v20  ;;  %v8472_v40 = vsel %vm1664_vm11, %v1690_v20, %v1692_v52  ;;  %v1540_v13 = vpop.f32.mrb[19].mxu0 }
 0x11f   : > { %11350 = vst [vmem:[#allocation91_spill] sm:$0xff] %v8460_v35  ;;  %11351 = vst [vmem:[#allocation92_spill] sm:$0xff] %v8469_v28  ;;  %v8479_v6 = vsel %vm2089_vm15, %v2112_v41, %v2114_v58  ;;  %v11071_v22 = vmax.f32 %v8460_v35, 0.0  ;;  %v8483_v53 = vadd.f32 %v6902_v9, %v8054_v43  ;;  %6541 = vmatpush3.bf16.msra.mxu0 %v7502_v55  ;;  %v11072_v20 = vmax.f32 %v8475_v7, 0.0 }
 0x120   : > { %11352 = vst [vmem:[#allocation93_spill] sm:$0xff] %v8472_v40  ;;  %11353 = vst [vmem:[#allocation94_spill] sm:$0xff] %v8475_v7  ;;  %v7192_v4 = vpack.i.bf16 %v8469_v28, %v1969_v37  ;;  %v8487_v52 = vsel %vm2089_vm15, %v2114_v58, %v2116_v39  ;;  %v8491_v1 = vadd.f32 %v8054_v43, %v1540_v13  ;;  %6542 = vmatprep.subr.bf16.mxu0 %v7503_v32  ;;  %v7504_v37 = vld [vmem:[%s10978_s3 + $0xb0] sm:$0xff]  }
 0x121   : > { %11354 = vst [vmem:[#allocation95_spill] sm:$0xff] %v8479_v6  ;;  %11355 = vst [vmem:[#allocation96_spill] sm:$0xff] %v8483_v53  ;;  %v7197_v41 = vpack.i.bf16 %v8487_v52, %v8479_v6  ;;  %v1971_v29 = vmul.f32 %v7942_v16, %v8472_v40  ;;  %v1700_v58 = vrot.slane %v11071_v22, 7  ;;  %7188 = vrot.lane.b32.xlu1 %v7187_v42, %s11204_s25  ;;  %v2118_v13 = vrot.slane %v8469_v28, 1 }
 0x122   : > { %11356 = vst [vmem:[#allocation97_spill] sm:$0xff] %v8487_v52  ;;  %11357 = vst [vmem:[#allocation98_spill] sm:$0xff] %v8491_v1  ;;  %v2120_v9 = vrot.slane %v8472_v40, 1  ;;  %v1696_v52 = vrot.slane %v11072_v20, 7  ;;  %7193 = vrot.lane.b32.xlu0 %v7192_v4, %s11204_s25  ;;  %v2122_v35 = vrot.slane %v8456_v27, 1  ;;  %v8520_v55 = vmul.f32 %v7899_v59, %v8219_v11  ;;  %v7505_v59 = vld [vmem:[%s10978_s3 + $0xf8] sm:$0xff]  }
 0x123   : > { %v7202_v6 = vpack.i.bf16 %v8456_v27, %v1971_v29  ;;  %v8513_v22 = vsel %vm2089_vm15, %v2116_v39, %v2118_v13  ;;  %v2579_v20 = vrot.slane %v8364_v56, 2  ;;  %6543 = vmatpush3.bf16.msra.mxu0 %v7504_v37  ;;  %v11361_v4 = vmax.f32 %v8483_v53, 0.0  ;;  %v6905_v16 = vpop.f32.mrb[20].mxu0  ;;  %v7506_v56 = vld [vmem:[%s10978_s3 + $0xb8] sm:$0xff]  }
 0x124   : > { %11358 = vst [vmem:[#allocation99_spill] sm:$0xff] %v8513_v22  ;;  %v8516_v42 = vsel %vm2089_vm15, %v2118_v13, %v2120_v9  ;;  %v8524_v32 = vsel %vm1664_vm11, %v1694_v12, %v1696_v52  ;;  %v11362_v7 = vmax.f32 %v8491_v1, 0.0  ;;  %v2580_v13 = vrot.slane %v8368_v24, 2  ;;  %6544 = vmatprep.subr.bf16.mxu0 %v7505_v59 }
 0x125   : > { %11359 = vst [vmem:[#allocation100_spill] sm:$0xff] %v8516_v42  ;;  %11360 = vst [vmem:[#allocation101_spill] sm:$0xff] %v8524_v32  ;;  %v1702_v29 = vrot.slane %v11361_v4, 7  ;;  %7198 = vrot.lane.b32.xlu1 %v7197_v41, %s11204_s25  ;;  %v7207_v12 = vpack.i.bf16 %v8516_v42, %v8513_v22  ;;  %v8541_v37 = vadd.f32 %v6905_v16, %v8054_v43  ;;  %v2124_v4 = vrot.slane %v8524_v32, 1 }
 0x126   : > { %v1698_v39 = vrot.slane %v11362_v7, 7  ;;  %v1553_v7 = vpop.f32.mrb[21].mxu0  ;;  %v1973_v24 = vmul.f32 %v7956_v25, %v8524_v32  ;;  %7203 = vrot.lane.b32.xlu0 %v7202_v6, %s11204_s25  ;;  %v8557_v16 = vsel %vm2089_vm15, %v2120_v9, %v2122_v35  ;;  %v2582_v22 = vrot.slane %v8520_v55, 2 }
 0x127   : > { %11363 = vst [vmem:[#allocation102_spill] sm:$0xff] %v8541_v37  ;;  %v8554_v41 = vadd.f32 %v8054_v43, %v1553_v7  ;;  %v6906_v42 = vpop.f32.mrb[22].mxu0  ;;  %11367 = vst [vmem:[#allocation106_spill] sm:$0xff] %v8557_v16  ;;  %v8568_v6 = vsel %vm1664_vm11, %v1700_v58, %v1702_v29  ;;  %6545 = vmatpush3.bf16.msra.mxu0 %v7506_v56 }
 0x128   : > { %v8547_v1 = vsel %vm1664_vm11, %v1696_v52, %v1698_v39  ;;  %v8550_v53 = vsel %vm1664_vm11, %v1698_v39, %v1700_v58  ;;  %v8562_v11 = vadd.f32 %v6906_v42, %v8054_v43  ;;  %v1556_v52 = vpop.f32.mrb[23].mxu0  ;;  %v8565_v39 = vsel %vm2089_vm15, %v2122_v35, %v2124_v4  ;;  %11370 = vst [vmem:[#allocation109_spill] sm:$0xff] %v8568_v6 }
 0x129   : > { %11364 = vst [vmem:[#allocation103_spill] sm:$0xff] %v8547_v1  ;;  %11365 = vst [vmem:[#allocation104_spill] sm:$0xff] %v8550_v53  ;;  %v7212_v25 = vpack.i.bf16 %v8547_v1, %v1973_v24  ;;  %v11090_v7 = vmax.f32 %v8554_v41, 0.0  ;;  %v8572_v9 = vadd.f32 %v8054_v43, %v1556_v52  ;;  %7208 = vrot.lane.b32.xlu1 %v7207_v12, %s11204_s25  ;;  %v2126_v58 = vrot.slane %v8547_v1, 1 }
 0x12a   : > { %11366 = vst [vmem:[#allocation105_spill] sm:$0xff] %v8554_v41  ;;  %11368 = vst [vmem:[#allocation107_spill] sm:$0xff] %v8562_v11  ;;  %v7222_v42 = vpack.i.bf16 %v8565_v39, %v8557_v16  ;;  %v2581_v35 = vsel %vm2283_vm3, %v2579_v20, %v2580_v13  ;;  %v1975_v59 = vmul.f32 %v7987_v51, %v8550_v53  ;;  %v2128_v12 = vrot.slane %v8550_v53, 1 }
 0x12b   : > { %11369 = vst [vmem:[#allocation108_spill] sm:$0xff] %v8565_v39  ;;  %11371 = vst [vmem:[#allocation110_spill] sm:$0xff] %v8572_v9  ;;  %v1704_v24 = vrot.slane %v11090_v7, 7  ;;  %7213 = vrot.lane.b32.xlu0 %v7212_v25, %s11204_s25  ;;  %v11094_v55 = vmax.f32 %v8572_v9, 0.0  ;;  %v2583_v56 = vsel %vm2283_vm3, %v2580_v13, %v2582_v22  ;;  %v11372_v52 = vmax.f32 %v8541_v37, 0.0  ;;  %v6909_v53 = vpop.f32.mrb[24].mxu0 }
 0x12c   : > { %v8592_v16 = vsel %vm2089_vm15, %v2124_v4, %v2126_v58  ;;  %v692_v51 = vand.u32 15, %v8180_v2  ;;  %v7217_v25 = vpack.i.bf16 %v2583_v56, %v2581_v35  ;;  %v8598_v41 = vsel %vm2089_vm15, %v2126_v58, %v2128_v12  ;;  %v1569_v20 = vpop.f32.mrb[25].mxu0 }
 0x12d   : > { %v1708_v39 = vrot.slane %v11372_v52, 7  ;;  %11373 = vst [vmem:[#allocation111_spill] sm:$0xff] %v8592_v16  ;;  %v1706_v7 = vrot.slane %v11094_v55, 7  ;;  %11374 = vst [vmem:[#allocation112_spill] sm:$0xff] %v8598_v41  ;;  %v1992_v13 = vmul.f32 %v7937_v14, %v8226_v10  ;;  %v8603_v52 = vsel %vm1664_vm11, %v1702_v29, %v1704_v24  ;;  %7223 = vrot.lane.b32.xlu1 %v7222_v42, %s11204_s25  ;;  %v6910_v55 = vpop.f32.mrb[26].mxu0 }
 0x12e   : > { %11375 = vst [vmem:[#allocation113_spill] sm:$0xff] %v8603_v52  ;;  %v7227_v4 = vpack.i.bf16 %v8568_v6, %v1975_v59  ;;  %v1993_v2 = vmul.f32 %v7946_v17, %v8272_v15  ;;  %v7237_v58 = vpack.i.bf16 %v8598_v41, %v8592_v16  ;;  %v11376_v9 = vrot.slane %v8011_v5, 6 }
 0x12f   : > { %7218 = vrot.lane.b32.xlu0 %v7217_v25, %s11204_s25  ;;  %v2584_v56 = vrot.slane %v1992_v13, 2  ;;  %v8621_v59 = vsel %vm1664_vm11, %v1704_v24, %v1706_v7  ;;  %v8624_v35 = vadd.f32 %v6909_v53, %v8054_v43  ;;  %v8627_v25 = vadd.f32 %v8054_v43, %v1569_v20  ;;  %v1572_v13 = vpop.f32.mrb[27].mxu0 }
 0x130   : > { %v8618_v42 = vsel %vm1827_vm7, %v7875_v45, %v11376_v9  ;;  %v2586_v37 = vrot.slane %v1993_v2, 2  ;;  %v11379_v41 = vmax.f32 %v8562_v11, 0.0  ;;  %v8632_v5 = vsel %vm1664_vm11, %v1706_v7, %v1708_v39 }
 0x131   : > { %11377 = vst [vmem:[#allocation114_spill] sm:$0xff] %v8624_v35  ;;  %11378 = vst [vmem:[#allocation115_spill] sm:$0xff] %v8627_v25  ;;  %v1977_v9 = vmul.f32 %v8017_v8, %v8603_v52  ;;  %v8637_v24 = vadd.f32 %v6910_v55, %v8054_v43  ;;  %7228 = vrot.lane.b32.xlu1 %v7227_v4, %s11204_s25  ;;  %v11104_v2 = vmax.f32 %v8627_v25, 0.0  ;;  %v2130_v16 = vrot.slane %v8568_v6, 1 }
 0x132   : > { %v1710_v29 = vrot.slane %v11379_v41, 7  ;;  %v2587_v53 = vsel %vm2283_vm3, %v2584_v56, %v2586_v37  ;;  %v8644_v11 = vadd.f32 %v8054_v43, %v1572_v13  ;;  %v2585_v41 = vsel %vm2283_vm3, %v2582_v22, %v2584_v56 }
 0x133   : > { %11380 = vst [vmem:[#allocation116_spill] sm:$0xff] %v8637_v24  ;;  %7238 = vrot.lane.b32.xlu0 %v7237_v58, %s11204_s25  ;;  %v7242_v7 = vpack.i.bf16 %v8621_v59, %v1977_v9  ;;  %v7232_v4 = vpack.i.bf16 %v2587_v53, %v2585_v41  ;;  %v1712_v8 = vrot.slane %v11104_v2, 7  ;;  %v2132_v10 = vrot.slane %v8603_v52, 1  ;;  %v6913_v9 = vpop.f32.mrb[28].mxu0 }
 0x134   : > { %11381 = vst [vmem:[#allocation117_spill] sm:$0xff] %v8644_v11  ;;  %v8656_v13 = vsel %vm1664_vm11, %v1708_v39, %v1710_v29  ;;  %v8659_v58 = vsel %vm2089_vm15, %v2128_v12, %v2130_v16  ;;  %v1994_v22 = vmul.f32 %v7967_v33, %v8303_v26  ;;  %v1995_v56 = vmul.f32 %v7980_v46, %v8306_v23  ;;  %v1585_v12 = vpop.f32.mrb[29].mxu0 }
 0x135   : > { %11382 = vst [vmem:[#allocation118_spill] sm:$0xff] %v8659_v58  ;;  %7233 = vrot.lane.b32.xlu1 %v7232_v4, %s11204_s25  ;;  %v11383_v53 = vmax.f32 %v8624_v35, 0.0  ;;  %v8671_v2 = vsel %vm2089_vm15, %v2130_v16, %v2132_v10  ;;  %v1979_v39 = vmul.f32 %v8059_v44, %v8632_v5  ;;  %vm8675_vm4 = vcmp.lt.s32.totalorder %v692_v51, 15  ;;  %v6914_v46 = vpop.f32.mrb[30].mxu0 }
 0x136   : > { %11384 = vst [vmem:[#allocation119_spill] sm:$0xff] %v8671_v2  ;;  %v8680_v55 = vadd.s32 248, %v7833_v19  ;;  %v11387_v4 = vmax.f32 %v8637_v24, 0.0  ;;  %v7252_v16 = vpack.i.bf16 %v8671_v2, %v8659_v58  ;;  %v2588_v25 = vrot.slane %v1994_v22, 2 }
 0x137   : > { %v8668_v41 = vrot.slane %v11383_v53, 7  ;;  %7243 = vrot.lane.b32.xlu0 %v7242_v7, %s11204_s25  ;;  %v2590_v35 = vrot.slane %v1995_v56, 2  ;;  %v8688_v44 = vsel %vm1664_vm11, %v1710_v29, %v1712_v8  ;;  %v11388_v51 = vmax.f32 %v8644_v11, 0.0  ;;  %v1588_v7 = vpop.f32.mrb[31].mxu0 }
 0x138   : > { %v1718_v53 = vrot.slane %v11387_v4, 7  ;;  %v7257_v19 = vpack.i.bf16 %v8656_v13, %v1979_v39  ;;  %v2134_v15 = vrot.slane %v8621_v59, 1  ;;  %v2589_v24 = vsel %vm2283_vm3, %v2586_v37, %v2588_v25 }
 0x139   : > { %v1714_v33 = vrot.slane %v11388_v51, 7  ;;  %v2591_v4 = vsel %vm2283_vm3, %v2588_v25, %v2590_v35  ;;  %v2136_v2 = vrot.slane %v8632_v5, 1  ;;  %v1996_v22 = vmul.f32 %v8005_v63, %v8286_v36  ;;  %7253 = vrot.lane.b32.xlu1 %v7252_v16, %s11204_s25 }
 0x13a   : > { %v7247_v29 = vpack.i.bf16 %v2591_v4, %v2589_v24  ;;  %v8701_v56 = vsel %vm2089_vm15, %v2132_v10, %v2134_v15  ;;  %v1997_v39 = vmul.f32 %v8028_v18, %v8357_v50  ;;  %v8706_v51 = vadd.f32 %v6913_v9, %v8054_v43 }
 0x13b   : > { %11389 = vst [vmem:[#allocation120_spill] sm:$0xff] %v8701_v56  ;;  %v8709_v37 = vsel %vm2089_vm15, %v2134_v15, %v2136_v2  ;;  %v2592_v25 = vrot.slane %v1996_v22, 2  ;;  %v8712_v11 = vadd.f32 %v8054_v43, %v1585_v12  ;;  %v1981_v16 = vmul.f32 %v8080_v57, %v8688_v44 }
 0x13c   : > { %11390 = vst [vmem:[#allocation121_spill] sm:$0xff] %v8706_v51  ;;  %11391 = vst [vmem:[#allocation122_spill] sm:$0xff] %v8709_v37  ;;  %v8717_v24 = vsel %vm1664_vm11, %v1712_v8, %v1714_v33  ;;  %7248 = vrot.lane.b32.xlu0 %v7247_v29, %s11204_s25  ;;  %v7267_v10 = vpack.i.bf16 %v8709_v37, %v8701_v56  ;;  %v2594_v9 = vrot.slane %v1997_v39, 2  ;;  %v11130_v39 = vmax.f32 %v8706_v51, 0.0 }
 0x13d   : > { %11392 = vst [vmem:[#allocation123_spill] sm:$0xff] %v8712_v11  ;;  %v8723_v4 = vadd.f32 %v6914_v46, %v8054_v43  ;;  %v8727_v15 = vsel %vm1664_vm11, %v1714_v33, %v8668_v41  ;;  %v2593_v12 = vsel %vm2283_vm3, %v2590_v35, %v2592_v25  ;;  %v11124_v22 = vmax.f32 %v8712_v11, 0.0  ;;  %7258 = vrot.lane.b32.xlu1 %v7257_v19, %s11204_s25 }
 0x13e   : > { %v8732_v8 = vadd.f32 %v8054_v43, %v1588_v7  ;;  %v2595_v29 = vsel %vm2283_vm3, %v2592_v25, %v2594_v9  ;;  %v2138_v37 = vrot.slane %v8656_v13, 1  ;;  %v7272_v35 = vpack.i.bf16 %v8717_v24, %v1981_v16 }
 0x13f   : > { %11393 = vst [vmem:[#allocation124_spill] sm:$0xff] %v8723_v4  ;;  %v11123_v46 = vmax.f32 %v8723_v4, 0.0  ;;  %v7262_v56 = vpack.i.bf16 %v2595_v29, %v2593_v12  ;;  %v1720_v33 = vrot.slane %v11124_v22, 7  ;;  %v2140_v58 = vrot.slane %v8688_v44, 1 }
 0x140   : > { %11394 = vst [vmem:[#allocation125_spill] sm:$0xff] %v8732_v8  ;;  %7268 = vrot.lane.b32.xlu0 %v7267_v10, %s11204_s25  ;;  %v8747_v43 = vsel %vm2089_vm15, %v2136_v2, %v2138_v37  ;;  %v1998_v7 = vmul.f32 %v8037_v31, %v8388_v47  ;;  %v1999_v25 = vmul.f32 %v8063_v48, %v8391_v21  ;;  %v11397_v29 = vrot.slane %v8283_v0, 6 }
 0x141   : > { %v1726_v19 = vrot.slane %v11123_v46, 7  ;;  %11395 = vst [vmem:[#allocation126_spill] sm:$0xff] %v8747_v43  ;;  %v8755_v16 = vsel %vm2089_vm15, %v2138_v37, %v2140_v58  ;;  %v8766_v2 = vsel %vm8675_vm4, 1.0, %v11322_v30  ;;  %7263 = vrot.lane.b32.xlu1 %v7262_v56, %s11204_s25  ;;  %v1983_v12 = vmul.f32 %v8096_v3, %v8727_v15 }
 0x142   : > { %11396 = vst [vmem:[#allocation127_spill] sm:$0xff] %v8755_v16  ;;  %v8761_v10 = vsel %vm1827_vm7, %v7875_v45, %v11397_v29  ;;  %v7282_v37 = vpack.i.bf16 %v8755_v16, %v8747_v43  ;;  %v2596_v22 = vrot.slane %v1998_v7, 2  ;;  %v8778_v29 = vsel %vm1664_vm11, %v8668_v41, %v1718_v53 }
 0x143   : > { %v8770_v46 = vsel %vm1664_vm11, %v1726_v19, 0.0  ;;  %11398 = vst [vmem:[#allocation128_spill] sm:$0xff] %v8778_v29  ;;  %v1724_v20 = vrot.slane %v11130_v39, 7  ;;  %v720_v4 = vand.u32 15, %v8680_v55  ;;  %v8788_v11 = vsel %vm1664_vm11, %v1718_v53, %v1720_v33 }
 0x144   : > { %v8784_v56 = vmul.f32 %v8086_v60, %v8770_v46  ;;  %11400 = vst [vmem:[#allocation130_spill] sm:$0xff] %v8788_v11  ;;  %7273 = vrot.lane.b32.xlu0 %v7272_v35, %s11204_s25  ;;  %v2597_v7 = vsel %vm2283_vm3, %v2594_v9, %v2596_v22  ;;  %v2598_v16 = vrot.slane %v1999_v25, 2  ;;  %v2142_v41 = vrot.slane %v8717_v24, 1 }
 0x145   : > { %v11401_v43 = vmax.f32 %v8732_v8, 0.0  ;;  %v2144_v39 = vrot.slane %v8727_v15, 1  ;;  %v2001_v55 = vmul.f32 %v8090_v62, %v8445_v61  ;;  %7283 = vrot.lane.b32.xlu1 %v7282_v37, %s11204_s25  ;;  %v7287_v9 = vpack.i.bf16 %v8778_v29, %v1983_v12 }
 0x146   : > { %11399 = vst [vmem:[#allocation129_spill] sm:$0xff] %v8784_v56  ;;  %v2000_v56 = vmul.f32 %v8067_v49, %v8374_v34  ;;  %v2599_v53 = vsel %vm2283_vm3, %v2596_v22, %v2598_v16  ;;  %v8804_v35 = vsel %vm2089_vm15, %v2140_v58, %v2142_v41  ;;  %v2146_v25 = vrot.slane %v8778_v29, 1 }
 0x147   : > { %v1722_v51 = vrot.slane %v11401_v43, 7  ;;  %11402 = vst [vmem:[#allocation131_spill] sm:$0xff] %v8804_v35  ;;  %v7277_v43 = vpack.i.bf16 %v2599_v53, %v2597_v7  ;;  %v8808_v8 = vsel %vm2089_vm15, %v2142_v41, %v2144_v39  ;;  %v2602_v57 = vrot.slane %v2001_v55, 2  ;;  %v11404_v41 = vld [vmem:[#allocation41_spill] sm:$0xff]  ;;  %v11405_v55 = vld [vmem:[#allocation42_spill] sm:$0xff] }
 0x148   : > { %11403 = vst [vmem:[#allocation132_spill] sm:$0xff] %v8808_v8  ;;  %v2600_v3 = vrot.slane %v2000_v56, 2  ;;  %v7297_v61 = vpack.i.bf16 %v8808_v8, %v8804_v35  ;;  %v1985_v37 = vmul.f32 %v8137_v54, %v8788_v11  ;;  %v2148_v22 = vrot.slane %v8788_v11, 1 }
 0x149   : > { %v1881_v12 = vrot.slane %v8766_v2, 6  ;;  %7278 = vrot.lane.b32.xlu0 %v7277_v43, %s11204_s25  ;;  %v2002_v56 = vmul.f32 %v11404_v41, %v8469_v28  ;;  %v2003_v53 = vmul.f32 %v11405_v55, %v8472_v40  ;;  %v8824_v8 = vsel %vm1664_vm11, %v1720_v33, %v1722_v51  ;;  %7288 = vrot.lane.b32.xlu1 %v7287_v9, %s11204_s25  ;;  %v11408_v2 = vld [vmem:[#allocation50_spill] sm:$0xff]  ;;  %v11415_v28 = vld [vmem:[#allocation45_spill] sm:$0xff] }
 0x14a   : > { %v2601_v58 = vsel %vm2283_vm3, %v2598_v16, %v2600_v3  ;;  %v2603_v7 = vsel %vm2283_vm3, %v2600_v3, %v2602_v57  ;;  %11406 = vst [vmem:[#allocation133_spill] sm:$0xff] %v8824_v8  ;;  %v8827_v35 = vsel %vm1664_vm11, %v1722_v51, %v1724_v20  ;;  %v8832_v43 = vmul.f32 %v11408_v2, %v8770_v46 }
 0x14b   : > { %11407 = vst [vmem:[#allocation134_spill] sm:$0xff] %v8827_v35  ;;  %vm8834_vm5 = vcmp.lt.s32.totalorder %v720_v4, 15  ;;  %v8839_v16 = vsel %vm1664_vm11, %v1724_v20, %v1726_v19  ;;  %v7292_v54 = vpack.i.bf16 %v2603_v7, %v2601_v58  ;;  %v8842_v33 = vsel %vm2089_vm15, %v2144_v39, %v2146_v25  ;;  %v11416_v4 = vld [vmem:[#allocation48_spill] sm:$0xff] }
 0x14c   : > { %11409 = vst [vmem:[#allocation135_spill] sm:$0xff] %v8832_v43  ;;  %11412 = vst [vmem:[#allocation136_spill] sm:$0xff] %v8839_v16  ;;  %v8845_v51 = vsel %vm2089_vm15, %v2146_v25, %v2148_v22  ;;  %v2604_v40 = vrot.slane %v2002_v56, 2  ;;  %v2606_v9 = vrot.slane %v2003_v53, 2  ;;  %v2004_v55 = vmul.f32 %v11415_v28, %v8456_v27  ;;  %v11417_v53 = vld [vmem:[#allocation51_spill] sm:$0xff]  ;;  %v11419_v27 = vld [vmem:[#allocation52_spill] sm:$0xff] }
 0x14d   : > { %11413 = vst [vmem:[#allocation137_spill] sm:$0xff] %v8842_v33  ;;  %11414 = vst [vmem:[#allocation138_spill] sm:$0xff] %v8845_v51  ;;  %v2005_v43 = vmul.f32 %v11416_v4, %v8524_v32  ;;  %7298 = vrot.lane.b32.xlu0 %v7297_v61, %s11204_s25  ;;  %v7302_v19 = vpack.i.bf16 %v8824_v8, %v1985_v37  ;;  %v1987_v20 = vmul.f32 %v11408_v2, %v8827_v35  ;;  %v11418_v61 = vld [vmem:[#allocation104_spill] sm:$0xff]  ;;  %v11420_v4 = vld [vmem:[#allocation53_spill] sm:$0xff] }
 0x14e   : > { %v2150_v39 = vrot.slane %v8824_v8, 1  ;;  %7293 = vrot.lane.b32.xlu1 %v7292_v54, %s11204_s25  ;;  %v7312_v58 = vpack.i.bf16 %v8845_v51, %v8842_v33  ;;  %v2608_v7 = vrot.slane %v2004_v55, 2  ;;  %v2006_v32 = vmul.f32 %v11417_v53, %v8547_v1  ;;  %v11423_v33 = vld [vmem:[#allocation54_spill] sm:$0xff] }
 0x14f   : > { %v2610_v56 = vrot.slane %v2005_v43, 2  ;;  %v2007_v37 = vmul.f32 %v11419_v27, %v11418_v61  ;;  %v2008_v2 = vmul.f32 %v11420_v4, %v8568_v6  ;;  %v11421_v28 = vrot.slane %v8283_v0, 6 }
 0x150   : > { %v11422_v54 = vrot.slane %v8297_v38, 6  ;;  %v2605_v43 = vsel %vm2283_vm3, %v2602_v57, %v2604_v40  ;;  %v2607_v51 = vsel %vm2283_vm3, %v2604_v40, %v2606_v9  ;;  %v2009_v61 = vmul.f32 %v11423_v33, %v8603_v52 }
 0x151   : > { %v8870_v25 = vsel %vm1827_vm7, %v11421_v28, %v7875_v45  ;;  %v8884_v6 = vsel %vm1827_vm7, %v1881_v12, %v7875_v45  ;;  %7303 = vrot.lane.b32.xlu0 %v7302_v19, %s11204_s25  ;;  %v7317_v0 = vpack.i.bf16 %v8839_v16, %v1987_v20  ;;  %v8889_v28 = vsel %vm2089_vm15, %v2148_v22, %v2150_v39  ;;  %v11427_v20 = vld [vmem:[#allocation56_spill] sm:$0xff] }
 0x152   : > { %v8876_v55 = vsel %vm1827_vm7, %v7875_v45, %v11422_v54  ;;  %11424 = vst [vmem:[#allocation139_spill] sm:$0xff] %v8889_v28  ;;  %v11425_v54 = vrot.slane %v8827_v35, 1  ;;  %v6185_v40 = vsel %vm8834_vm5, 1.0, %v11322_v30  ;;  %7313 = vrot.lane.b32.xlu1 %v7312_v58, %s11204_s25  ;;  %v2609_v52 = vsel %vm2283_vm3, %v2606_v9, %v2608_v7 }
 0x153   : > { %v2611_v19 = vsel %vm2283_vm3, %v2608_v7, %v2610_v56  ;;  %v2612_v33 = vrot.slane %v2006_v32, 2  ;;  %v2010_v22 = vmul.f32 %v11427_v20, %v8621_v59  ;;  %v7307_v4 = vpack.i.bf16 %v2607_v51, %v2605_v43 }
 0x154   : > { %v8894_v57 = vsel %vm2089_vm15, %v2150_v39, %v11425_v54  ;;  %v2614_v1 = vrot.slane %v2007_v37, 2  ;;  %v2616_v27 = vrot.slane %v2008_v2, 2  ;;  %v11428_v39 = vld [vmem:[#allocation58_spill] sm:$0xff]  ;;  %v2618_v53 = vrot.slane %v2009_v61, 2 }
 0x155   : > { %11426 = vst [vmem:[#allocation140_spill] sm:$0xff] %v8894_v57  ;;  %v2011_v54 = vmul.f32 %v11428_v39, %v8632_v5  ;;  %v2012_v3 = vmul.f32 %v8761_v10, %v8656_v13  ;;  %v2013_v58 = vmul.f32 %v8870_v25, %v8688_v44  ;;  %v11429_v9 = vrot.slane %v8297_v38, 6  ;;  %7308 = vrot.lane.b32.xlu0 %v7307_v4, %s11204_s25 }
 0x156   : > { %v7322_v2 = vpack.i.bf16 %v8894_v57, %v8889_v28  ;;  %v7327_v51 = vpack.i.bf16 %v2611_v19, %v2609_v52  ;;  %v8921_v7 = vsel %vm1827_vm7, %v7875_v45, %v1881_v12  ;;  %v8923_v61 = vrot.slane %v6185_v40, 6  ;;  %7318 = vrot.lane.b32.xlu1 %v7317_v0, %s11204_s25 }
 0x157   : > { %v8914_v32 = vsel %vm1827_vm7, %v11429_v9, %v7875_v45  ;;  %v2613_v37 = vsel %vm2283_vm3, %v2610_v56, %v2612_v33  ;;  %v2620_v38 = vrot.slane %v2010_v22, 2  ;;  %v2016_v43 = vmul.f32 %v8921_v7, %v8778_v29 }
 0x158   : > { %11430 = vst [vmem:[#allocation141_spill] sm:$0xff] %v8923_v61  ;;  %v2017_v4 = vmul.f32 %v8884_v6, %v8788_v11  ;;  %v2615_v9 = vsel %vm2283_vm3, %v2612_v33, %v2614_v1  ;;  %v2617_v52 = vsel %vm2283_vm3, %v2614_v1, %v2616_v27  ;;  %v2622_v19 = vrot.slane %v2011_v54, 2 }
 0x159   : > { %v2014_v12 = vmul.f32 %v8876_v55, %v8717_v24  ;;  %v2619_v40 = vsel %vm2283_vm3, %v2616_v27, %v2618_v53  ;;  %v2624_v0 = vrot.slane %v2012_v3, 2  ;;  %v2626_v30 = vrot.slane %v2013_v58, 2  ;;  %7323 = vrot.lane.b32.xlu0 %v7322_v2, %s11204_s25 }
 0x15a   : > { %v2015_v56 = vmul.f32 %v8914_v32, %v8727_v15  ;;  %v8942_v22 = vsel %vm1827_vm7, %v7875_v45, %v8923_v61  ;;  %7328 = vrot.lane.b32.xlu1 %v7327_v51, %s11204_s25  ;;  %v7332_v1 = vpack.i.bf16 %v2615_v9, %v2613_v37  ;;  %v2621_v33 = vsel %vm2283_vm3, %v2618_v53, %v2620_v38  ;;  %v11431_v9 = vld [vmem:[#allocation59_spill] sm:$0xff] }
 0x15b   : > { %v2632_v54 = vrot.slane %v2016_v43, 2  ;;  %v2634_v57 = vrot.slane %v2017_v4, 2  ;;  %v7337_v27 = vpack.i.bf16 %v2619_v40, %v2617_v52  ;;  %v2623_v3 = vsel %vm2283_vm3, %v2620_v38, %v2622_v19 }
 0x15c   : > { %v2018_v58 = vmul.f32 %v8618_v42, %v8824_v8  ;;  %v2019_v2 = vmul.f32 %v8086_v60, %v8827_v35  ;;  %v2625_v28 = vsel %vm2283_vm3, %v2622_v19, %v2624_v0  ;;  %v2627_v11 = vsel %vm2283_vm3, %v2624_v0, %v2626_v30 }
 0x15d   : > { %v2628_v29 = vrot.slane %v2014_v12, 2  ;;  %v2630_v51 = vrot.slane %v2015_v56, 2  ;;  %v2512_v37 = vrot.slane %v8770_v46, 1  ;;  %7333 = vrot.lane.b32.xlu0 %v7332_v1, %s11204_s25  ;;  %v2510_v53 = vrot.slane %v8839_v16, 1 }
 0x15e   : > { %7338 = vrot.lane.b32.xlu1 %v7337_v27, %s11204_s25  ;;  %v2635_v43 = vsel %vm2283_vm3, %v2632_v54, %v2634_v57  ;;  %v2020_v4 = vmul.f32 %v8942_v22, %v8839_v16  ;;  %v8963_v52 = vmul.f32 %v7937_v14, %v11431_v9  ;;  %v7342_v19 = vpack.i.bf16 %v2623_v3, %v2621_v33  ;;  %v11432_v27 = vld [vmem:[#allocation60_spill] sm:$0xff] }
 0x15f   : > { %v2633_v38 = vsel %vm2283_vm3, %v2630_v51, %v2632_v54  ;;  %v7347_v12 = vpack.i.bf16 %v2627_v11, %v2625_v28  ;;  %v2636_v40 = vrot.slane %v2018_v58, 2  ;;  %v2638_v0 = vrot.slane %v2019_v2, 2 }
 0x160   : > { %v2629_v56 = vsel %vm2283_vm3, %v2626_v30, %v2628_v29  ;;  %v2631_v1 = vsel %vm2283_vm3, %v2628_v29, %v2630_v51  ;;  %v8969_v8 = vmul.f32 %v7946_v17, %v11432_v27  ;;  %v2289_v54 = vrot.slane %v8963_v52, 2 }
 0x161   : > { %7343 = vrot.lane.b32.xlu0 %v7342_v19, %s11204_s25  ;;  %v7357_v16 = vpack.i.bf16 %v2635_v43, %v2633_v38  ;;  %v11433_v33 = vrot.slane %v8827_v35, 1  ;;  %v8980_v30 = vsel %vm2089_vm15, %v2510_v53, %v2512_v37  ;;  %v2640_v29 = vrot.slane %v2020_v4, 2 }
 0x162   : > { %7348 = vrot.lane.b32.xlu1 %v7347_v12, %s11204_s25  ;;  %11435 = vst [vmem:[#allocation142_spill] sm:$0xff] %v8980_v30  ;;  %v11170_v28 = vrot.slane %v8969_v8, 2  ;;  %v7352_v3 = vpack.i.bf16 %v2631_v1, %v2629_v56  ;;  %v2637_v58 = vsel %vm2283_vm3, %v2634_v57, %v2636_v40  ;;  %v2639_v2 = vsel %vm2283_vm3, %v2636_v40, %v2638_v0  ;;  %v11436_v57 = vld [vmem:[#allocation18_spill] sm:$0xff]  ;;  %v11438_v56 = vld [vmem:[#allocation20_spill] sm:$0xff] }
 0x163   : > { %v8977_v11 = vsel %vm2089_vm15, %v11433_v33, %v2510_v53  ;;  %v2021_v51 = vmul.f32 %v8923_v61, %v8770_v46  ;;  %v7367_v43 = vpack.i.bf16 %v2639_v2, %v2637_v58  ;;  %v2641_v4 = vsel %vm2283_vm3, %v2638_v0, %v2640_v29  ;;  %v9000_v46 = vld [vmem:[%s10978_s3 + $0x100] sm:$0xff]  }
 0x164   : > { %11434 = vst [vmem:[#allocation59_spill] sm:$0xff] %v8977_v11  ;;  %v2292_v38 = vsel %vm2283_vm3, %v2289_v54, %v11170_v28  ;;  %v7362_v53 = vpack.i.bf16 %v8980_v30, %v8977_v11  ;;  %v2740_v52 = vsel %vm2089_vm15, %v2512_v37, %v11436_v57  ;;  %6915 = vmatprep.subr.bf16.mxu1 %v9000_v46  ;;  %v1924_v37 = vmul.f32 0.0, %v7875_v45  ;;  %v11439_v33 = vld [vmem:[#allocation55_spill] sm:$0xff]  ;;  %v11442_v28 = vld [vmem:[#allocation66_spill] sm:$0xff] }
 0x165   : > { %7353 = vrot.lane.b32.xlu0 %v7352_v3, %s11204_s25  ;;  %v2642_v19 = vrot.slane %v2021_v51, 2  ;;  %v7372_v12 = vpack.i.bf16 %v2641_v4, %v2740_v52  ;;  %v2057_v40 = vmul.f32 %v7937_v14, %v8303_v26  ;;  %v9013_v0 = vmul.f32 %v7946_v17, %v8306_v23  ;;  %v11440_v3 = vld [vmem:[#allocation21_spill] sm:$0xff] }
 0x166   : > { %7358 = vrot.lane.b32.xlu1 %v7357_v16, %s11204_s25  ;;  %v1925_v1 = vmul.f32 0.0, %v11438_v56  ;;  %v1926_v58 = vmul.f32 %v11440_v3, %v11439_v33  ;;  %v2284_v2 = vrot.slane %v1924_v37, 2  ;;  %v9024_v57 = vmul.f32 %v11440_v3, %v11442_v28  ;;  %v11448_v3 = vld [vmem:[#allocation29_spill] sm:$0xff] }
 0x167   : > { %v2643_v16 = vsel %vm2283_vm3, %v2640_v29, %v2642_v19  ;;  %11437 = vst [vmem:[#allocation143_spill] sm:$0xff] %v9013_v0  ;;  %v2788_v29 = vrot.slane %v2057_v40, 2  ;;  %v11175_v51 = vrot.slane %v9013_v0, 2  ;;  %v9040_v0 = vmul.f32 %v11448_v3, %v11442_v28 }
 0x168   : > { %11443 = vst [vmem:[#allocation55_spill] sm:$0xff] %v9024_v57  ;;  %v11449_v3 = vmov 0 }
 0x169   : > { %7363 = vrot.lane.b32.xlu0 %v7362_v53, %s11204_s25  ;;  %v2285_v53 = vrot.slane %v1925_v1, 2  ;;  %v9029_v37 = vsel %vm2283_vm3, %v2788_v29, %v11175_v51  ;;  %v11450_v3 = vsel %vm9051_vm10, 4294967295, %v11449_v3 }
 0x16a   : > { %7368 = vrot.lane.b32.xlu1 %v7367_v43, %s11204_s25  ;;  %v2287_v43 = vrot.slane %v1926_v58, 2  ;;  %11444 = vst [vmem:[#allocation21_spill] sm:$0xff] %v9029_v37  ;;  %11451 = vst [vmem:[#allocation66_spill] sm:$0xff] %v11450_v3 }
 0x16b   : > { %v2286_v52 = vsel %vm2283_vm3, %v2284_v2, %v2285_v53  ;;  %v11445_v2 = vld [vmem:[#allocation62_spill] sm:$0xff] }
 0x16d   : > { %7373 = vrot.lane.b32.xlu0 %v7372_v12, %s11204_s25  ;;  %v11441_v12 = vld [vmem:[#allocation14_spill] sm:$0xff] }
 0x16e   : > { %2706 = vrot.lane.b32.xlu1 %v2643_v16, %s11204_s25  ;;  %v1763_v17 = vmul.f32 0.0, %v11441_v12  ;;  %v2288_v16 = vsel %vm2283_vm3, %v2285_v53, %v2287_v43  ;;  %s6396_s25 = sshll.u32 %s7761_s17, 4  ;;  %s7664_s17 = smov [#allocation2]  }
 0x16f   : > { %s7599_s22 = sshll.u32 %s7664_s17, 4  ;;  %s7600_s22 = int_to_ptr.vmem [resolvable:$false] %s7599_s22 }
 0x170   : > { %s7601_s0 = scalar_lea.vmem %s7600_s22, 32  ;;  %p7602_p0 = scmp.lt.s32.totalorder %s10935_s26, %s7600_s22 }
 0x171   : > { %p7603_p1 = scmp.lt.s32.totalorder %s7601_s0, %s7595_s21 }
 0x173   : > { %p7604_p2 = por %p7603_p1, %p7602_p0 }
 0x175   : > { %p7605_p3 = pnand %p7604_p2, %p7598_p13 }
 0x17a   : > { %v7134_v4 = vpop.permute.xlu0 %7133 }
 0x17b   : > { %v7136_v14 = vunpack.i.h.bf16 %v7134_v4  ;;  %v7135_v19 = vunpack.i.l.bf16 %v7134_v4  ;;  %v11446_v4 = vld [vmem:[#allocation28_spill] sm:$0xff] }
 0x17c   : > { %v7144_v40 = vpop.permute.xlu1 %7143  ;;  %v1929_v30 = vmul.f32 %v11446_v4, %v11445_v2 }
 0x17d   : > { %v2913_v1 = vsel %vm2880_vm6, %v2286_v52, %v7135_v19  ;;  %v2914_v58 = vsel %vm2880_vm6, %v2288_v16, %v7136_v14  ;;  %v7146_v11 = vunpack.i.h.bf16 %v7144_v40  ;;  %v7145_v56 = vunpack.i.l.bf16 %v7144_v40 }
 0x17e   : > { %v9035_v53 = vpop.permute.xlu0 %7138  ;;  %v3010_v45 = vpack.c.bf16 %v2914_v58, %v2913_v1  ;;  %v2290_v14 = vsel %vm2283_vm3, %v2287_v43, %v2289_v54  ;;  %v11177_v19 = vrot.slane %v9024_v57, 2  ;;  %v11461_v57 = vld [vmem:[#allocation65_spill] sm:$0xff] }
 0x17f   : > { %11447 = vst [vmem:[#allocation14_spill] sm:$0xff] %v9035_v53  ;;  %v7141_v51 = vunpack.i.h.bf16 %v9035_v53  ;;  %v11176_v52 = vunpack.i.l.bf16 %v9035_v53  ;;  %v2915_v16 = vsel %vm2880_vm6, %v2290_v14, %v7145_v56  ;;  %v2916_v40 = vsel %vm2880_vm6, %v2292_v38, %v7146_v11  ;;  %v7508_v11 = vld [vmem:[%s10978_s3 + $0x108] sm:$0xff]  }
 0x180   : > { %3464 = vmatprep.mubr.bf16.mxu1 %v3010_v45  ;;  %v7149_v58 = vpop.permute.xlu1 %7148  ;;  %v3015_v4 = vpack.c.bf16 %v2916_v40, %v2915_v16  ;;  %v9058_v54 = vsel %vm2283_vm3, %v11177_v19, %v2788_v29  ;;  %v2293_v56 = vrot.slane %v1929_v30, 2  ;;  %v2295_v14 = vrot.slane %v9040_v0, 2  ;;  %v11453_v29 = vld [vmem:[#allocation15_spill] sm:$0xff] }
 0x181   : > { %v2881_v1 = vsel %vm2880_vm6, %v1763_v17, %v11176_v52  ;;  %11452 = vst [vmem:[#allocation144_spill] sm:$0xff] %v9058_v54  ;;  %v7151_v38 = vunpack.i.h.bf16 %v7149_v58  ;;  %v7150_v43 = vunpack.i.l.bf16 %v7149_v58  ;;  %v2022_v30 = vmul.f32 %v11441_v12, %v11432_v27  ;;  %v7509_v12 = vld [vmem:[%s10978_s3 + $0x110] sm:$0xff]  }
 0x182   : > { %v6280_v45 = vpack.c.bf16 %v7141_v51, %v2881_v1  ;;  %v1765_v51 = vmul.f32 %v11453_v29, %v11439_v33  ;;  %v1931_v52 = vmul.f32 %v8005_v63, %v8303_v26  ;;  %v2296_v19 = vsel %vm2283_vm3, %v2293_v56, %v2295_v14  ;;  %v11460_v63 = vld [vmem:[#allocation67_spill] sm:$0xff] }
 0x183   : > { %v7154_v17 = vpop.permute.xlu0 %7153 }
 0x184   : > { %v7156_v16 = vunpack.i.h.bf16 %v7154_v17  ;;  %v7155_v40 = vunpack.i.l.bf16 %v7154_v17  ;;  %6281 = vmatmul.mubr.msk.bf16.vlgmr.msra.gmra.mrb[0].mxu1 %vm9051_vm10, %v6280_v45  ;;  %v1932_v17 = vmul.f32 %v8028_v18, %v8306_v23  ;;  %v2883_v33 = vsel %vm2880_vm6, %v1765_v51, %v7150_v43 }
 0x185   : > { %v7159_v1 = vpop.permute.xlu1 %7158  ;;  %3472 = vmatprep.mubr.bf16.mxu1 %v3015_v4  ;;  %6916 = vmatpush3.bf16.msra.mxu1 %v9000_v46  ;;  %v2884_v4 = vsel %vm2880_vm6, %v11431_v9, %v7151_v38  ;;  %v11454_v46 = vrot.slane %v8969_v8, 2  ;;  %v7510_v8 = vld [vmem:[%s10978_s3 + $0x118] sm:$0xff]   ;;  %v2297_v51 = vrot.slane %v1931_v52, 2 }
 0x186   : > { %v7161_v58 = vunpack.i.h.bf16 %v7159_v1  ;;  %v7160_v0 = vunpack.i.l.bf16 %v7159_v1  ;;  %6917 = vmatprep.subr.bf16.mxu1 %v7508_v11  ;;  %v2918_v37 = vsel %vm2880_vm6, %v2296_v19, %v7156_v16  ;;  %v3014_v9 = vpack.c.bf16 %v2884_v4, %v2883_v33  ;;  %v11455_v19 = vld [vmem:[#allocation19_spill] sm:$0xff] }
 0x187   : > { %v7164_v45 = vpop.permute.xlu0 %7163  ;;  %v2294_v1 = vsel %vm2283_vm3, %v11454_v46, %v2293_v56  ;;  %v1767_v16 = vmul.f32 %v11455_v19, %v11432_v27 }
 0x188   : > { %v2886_v3 = vsel %vm2880_vm6, %v11445_v2, %v7161_v58  ;;  %v2977_v53 = vsel %vm2880_vm6, %v2022_v30, %v7160_v0  ;;  %v2917_v54 = vsel %vm2880_vm6, %v2294_v1, %v7155_v40  ;;  %v2299_v58 = vrot.slane %v1932_v17, 2 }
 0x189   : > { %v3012_v43 = vpack.c.bf16 %v2886_v3, %v2977_v53  ;;  %6918 = vmatpush3.bf16.msra.mxu1 %v7508_v11  ;;  %v3020_v38 = vpack.c.bf16 %v2918_v37, %v2917_v54  ;;  %v7166_v30 = vunpack.i.h.bf16 %v7164_v45  ;;  %v7165_v46 = vunpack.i.l.bf16 %v7164_v45 }
 0x18a   : > { %v9092_v18 = vpop.permute.xlu1 %7168  ;;  %6919 = vmatprep.subr.bf16.mxu1 %v7509_v12  ;;  %v1933_v11 = vmul.f32 %v8037_v31, %v8286_v36  ;;  %v2885_v33 = vsel %vm2880_vm6, %v1767_v16, %v7160_v0  ;;  %v2298_v37 = vsel %vm2283_vm3, %v2295_v14, %v2297_v51  ;;  %v2300_v52 = vsel %vm2283_vm3, %v2297_v51, %v2299_v58 }
 0x18b   : > { %v7174_v56 = vpop.permute.xlu0 %7173  ;;  %3625 = vmatprep.mubr.bf16.mxu0 %v3012_v43  ;;  %v1934_v54 = vmul.f32 %v8063_v48, %v8357_v50  ;;  %v2919_v17 = vsel %vm2880_vm6, %v2298_v37, %v7165_v46  ;;  %v3019_v4 = vpack.c.bf16 %v2886_v3, %v2885_v33  ;;  %v7171_v43 = vunpack.i.h.bf16 %v9092_v18  ;;  %v11456_v46 = vld [vmem:[#allocation22_spill] sm:$0xff] }
 0x18c   : > { %3473 = vmatmul.mubr.bf16.gmra.mrb[4].mxu1 %v3014_v9  ;;  %v2301_v1 = vrot.slane %v1933_v11, 2  ;;  %v7170_v0 = vunpack.i.l.bf16 %v9092_v18  ;;  %v7176_v51 = vunpack.i.h.bf16 %v7174_v56  ;;  %v7175_v16 = vunpack.i.l.bf16 %v7174_v56 }
 0x18d   : > { %3480 = vmatprep.mubr.bf16.mxu1 %v3020_v38  ;;  %6920 = vmatpush3.bf16.msra.mxu1 %v7509_v12  ;;  %v2920_v12 = vsel %vm2880_vm6, %v2300_v52, %v7166_v30  ;;  %v2303_v38 = vrot.slane %v1934_v54, 2  ;;  %v1769_v30 = vmul.f32 %v11456_v46, %v11442_v28  ;;  %v1935_v3 = vmul.f32 %v8067_v49, %v8388_v47 }
 0x18e   : > { %v9099_v53 = vpop.permute.xlu1 %7178  ;;  %6921 = vmatprep.subr.bf16.mxu1 %v7510_v8  ;;  %v3025_v14 = vpack.c.bf16 %v2920_v12, %v2919_v17  ;;  %v1936_v11 = vmul.f32 %v8090_v62, %v8391_v21  ;;  %v2888_v56 = vsel %vm2880_vm6, %v8303_v26, %v7171_v43  ;;  %v2302_v37 = vsel %vm2283_vm3, %v2299_v58, %v2301_v1 }
 0x18f   : > { %v7184_v40 = vpop.permute.xlu0 %7183  ;;  %v2887_v33 = vsel %vm2880_vm6, %v1769_v30, %v7170_v0  ;;  %v2304_v52 = vsel %vm2283_vm3, %v2301_v1, %v2303_v38  ;;  %v2921_v54 = vsel %vm2880_vm6, %v2302_v37, %v7175_v16  ;;  %v7181_v62 = vunpack.i.h.bf16 %v9099_v53  ;;  %v11457_v1 = vld [vmem:[#allocation23_spill] sm:$0xff]  ;;  %v11459_v37 = vld [vmem:[#allocation42_spill] sm:$0xff] }
 0x190   : > { %v2922_v17 = vsel %vm2880_vm6, %v2304_v52, %v7176_v51  ;;  %v7180_v49 = vunpack.i.l.bf16 %v9099_v53  ;;  %v2307_v26 = vrot.slane %v1936_v11, 2  ;;  %v7186_v43 = vunpack.i.h.bf16 %v7184_v40  ;;  %v11458_v53 = vld [vmem:[#allocation89_spill] sm:$0xff] }
 0x191   : > { %6922 = vmatpush3.bf16.msra.mxu1 %v7510_v8  ;;  %v3030_v48 = vpack.c.bf16 %v2922_v17, %v2921_v54  ;;  %v7185_v58 = vunpack.i.l.bf16 %v7184_v40  ;;  %v1771_v16 = vmul.f32 %v11457_v1, %v8306_v23  ;;  %v1937_v51 = vmul.f32 %v11404_v41, %v8374_v34 }
 0x192   : > { %v9149_v52 = vmul.f32 %v11459_v37, %v11458_v53 }
 0x193   : > { %v9110_v45 = vpop.permute.xlu1 %7188  ;;  %v2889_v40 = vsel %vm2880_vm6, %v1771_v16, %v7180_v49  ;;  %v2309_v31 = vrot.slane %v1937_v51, 2 }
 0x194   : > { %v9114_v9 = vpop.permute.xlu0 %7193  ;;  %3481 = vmatmul.mubr.bf16.gmra.mrb[8].mxu1 %v3019_v4  ;;  %v3024_v4 = vpack.c.bf16 %v2888_v56, %v2887_v33 }
 0x195   : > { %3488 = vmatprep.mubr.bf16.mxu1 %v3025_v14  ;;  %v2305_v14 = vrot.slane %v1935_v3, 2  ;;  %v2024_v3 = vmul.f32 %v11453_v29, %v11442_v28  ;;  %v7196_v51 = vunpack.i.h.bf16 %v9114_v9 }
 0x197   : > { %v9118_v8 = vpop.permute.xlu1 %7198  ;;  %v2306_v54 = vsel %vm2283_vm3, %v2303_v38, %v2305_v14  ;;  %v2308_v17 = vsel %vm2283_vm3, %v2305_v14, %v2307_v26  ;;  %v2979_v37 = vsel %vm2880_vm6, %v2024_v3, %v7170_v0  ;;  %v2311_v14 = vrot.slane %v9149_v52, 2 }
 0x198   : > { %v9124_v18 = vpop.permute.xlu0 %7203  ;;  %v2923_v28 = vsel %vm2880_vm6, %v2306_v54, %v7185_v58  ;;  %v2924_v29 = vsel %vm2880_vm6, %v2308_v17, %v7186_v43  ;;  %v7190_v58 = vunpack.i.l.bf16 %v9110_v45  ;;  %v2026_v52 = vmul.f32 %v11455_v19, %v8306_v23 }
 0x199   : > { %v3035_v0 = vpack.c.bf16 %v2924_v29, %v2923_v28  ;;  %v2312_v17 = vsel %vm2283_vm3, %v2309_v31, %v2311_v14  ;;  %v11464_v28 = vld [vmem:[#allocation45_spill] sm:$0xff] }
 0x19b   : > { %v9133_v12 = vpop.permute.xlu1 %7208 }
 0x19c   : > { %3489 = vmatmul.mubr.bf16.gmra.mrb[12].mxu1 %v3024_v4 }
 0x19d   : > { %v9137_v30 = vpop.permute.xlu0 %7213  ;;  %3496 = vmatprep.mubr.bf16.mxu1 %v3030_v48  ;;  %v9154_v48 = vsel %vm2880_vm6, %v8286_v36, %v7181_v62 }
 0x19e   : > { %v3029_v38 = vpack.c.bf16 %v9154_v48, %v2889_v40 }
 0x19f   : > { %v9145_v33 = vpop.permute.xlu1 %7223 }
 0x1a1   : > { %v7219_v11 = vpop.permute.xlu0 %7218 }
 0x1a2   : > { %v7221_v4 = vunpack.i.h.bf16 %v7219_v11  ;;  %v7220_v41 = vunpack.i.l.bf16 %v7219_v11  ;;  %v7191_v11 = vunpack.i.h.bf16 %v9110_v45  ;;  %v2310_v45 = vsel %vm2283_vm3, %v2307_v26, %v2309_v31  ;;  %v11467_v26 = vld [vmem:[#allocation72_spill] sm:$0xff] }
 0x1a3   : > { %v9165_v36 = vpop.permute.xlu1 %7228  ;;  %v2926_v31 = vsel %vm2880_vm6, %v2312_v17, %v7196_v51  ;;  %v7206_v17 = vunpack.i.h.bf16 %v9124_v18 }
 0x1a4   : > { %v2946_v16 = vsel %vm2880_vm6, %v11460_v63, %v7221_v4  ;;  %v2945_v62 = vsel %vm2880_vm6, %v11461_v57, %v7220_v41  ;;  %v7195_v63 = vunpack.i.l.bf16 %v9114_v9  ;;  %3497 = vmatmul.mubr.bf16.gmra.mrb[16].mxu1 %v3029_v38  ;;  %v3017_v41 = vpack.c.bf16 %v2888_v56, %v2979_v37  ;;  %v11462_v57 = vld [vmem:[#allocation24_spill] sm:$0xff]  ;;  %v11465_v9 = vld [vmem:[#allocation93_spill] sm:$0xff] }
 0x1a5   : > { %v3011_v43 = vpack.c.bf16 %v2946_v16, %v2945_v62  ;;  %v9171_v54 = vpop.permute.xlu0 %7238  ;;  %3504 = vmatprep.mubr.bf16.mxu1 %v3035_v0  ;;  %v1773_v3 = vmul.f32 %v11462_v57, %v8357_v50  ;;  %v11463_v4 = vld [vmem:[#allocation92_spill] sm:$0xff]  ;;  %v2892_v23 = vsel %vm2880_vm6, %v8388_v47, %v7191_v11  ;;  %v7201_v11 = vunpack.i.h.bf16 %v9118_v8 }
 0x1a6   : > { %v1939_v29 = vmul.f32 %v11464_v28, %v11463_v4  ;;  %v11466_v16 = vld [vmem:[#allocation48_spill] sm:$0xff]  ;;  %v2925_v19 = vsel %vm2880_vm6, %v2310_v45, %v7195_v63  ;;  %v2981_v28 = vsel %vm2880_vm6, %v2026_v52, %v7180_v49  ;;  %v7200_v63 = vunpack.i.l.bf16 %v9118_v8 }
 0x1a7   : > { %3626 = vmatmul.mubr.bf16.vlgmr.msra.gmra.mrb[32].mxu0 %v3011_v43  ;;  %v7234_v40 = vpop.permute.xlu1 %7233  ;;  %v9185_v56 = vmul.f32 %v11466_v16, %v11465_v9  ;;  %v2891_v43 = vsel %vm2880_vm6, %v1773_v3, %v7190_v58  ;;  %v3040_v51 = vpack.c.bf16 %v2926_v31, %v2925_v19  ;;  %v3022_v49 = vpack.c.bf16 %v9154_v48, %v2981_v28  ;;  %v11471_v19 = vld [vmem:[#allocation51_spill] sm:$0xff]  ;;  %v11472_v31 = vld [vmem:[#allocation101_spill] sm:$0xff]  ;;  %v11473_v48 = vld [vmem:[#allocation52_spill] sm:$0xff] }
 0x1a8   : > { %3633 = vmatprep.mubr.bf16.mxu0 %v3017_v41  ;;  %v7236_v37 = vunpack.i.h.bf16 %v7234_v40  ;;  %v7235_v62 = vunpack.i.l.bf16 %v7234_v40  ;;  %v11468_v41 = vld [vmem:[#allocation74_spill] sm:$0xff]  ;;  %v3034_v2 = vpack.c.bf16 %v2892_v23, %v2891_v43  ;;  %v2313_v27 = vrot.slane %v1939_v29, 2  ;;  %v11469_v29 = vld [vmem:[#allocation25_spill] sm:$0xff] }
 0x1a9   : > { %v9187_v38 = vpop.permute.xlu0 %7243  ;;  %v2315_v3 = vrot.slane %v9185_v56, 2  ;;  %v1775_v56 = vmul.f32 %v11469_v29, %v8391_v21  ;;  %v2028_v8 = vmul.f32 %v11456_v46, %v8357_v50  ;;  %v9218_v28 = vmul.f32 %v11473_v48, %v11472_v31 }
 0x1aa   : > { %v2947_v0 = vsel %vm2880_vm6, %v11467_v26, %v7235_v62  ;;  %v2948_v16 = vsel %vm2880_vm6, %v11468_v41, %v7236_v37  ;;  %v7205_v62 = vunpack.i.l.bf16 %v9124_v18  ;;  %v2314_v43 = vsel %vm2283_vm3, %v2311_v14, %v2313_v27  ;;  %v11470_v18 = vld [vmem:[#allocation90_spill] sm:$0xff] }
 0x1ab   : > { %v9199_v40 = vpop.permute.xlu1 %7253  ;;  %v3016_v45 = vpack.c.bf16 %v2948_v16, %v2947_v0  ;;  %v2893_v0 = vsel %vm2880_vm6, %v1775_v56, %v7200_v63  ;;  %v2894_v41 = vsel %vm2880_vm6, %v8374_v34, %v7201_v11  ;;  %v2983_v46 = vsel %vm2880_vm6, %v2028_v8, %v7190_v58 }
 0x1ac   : > { %3505 = vmatmul.mubr.bf16.gmra.mrb[20].mxu1 %v3034_v2  ;;  %v1941_v2 = vmul.f32 %v11471_v19, %v11470_v18  ;;  %v2927_v48 = vsel %vm2880_vm6, %v2314_v43, %v7205_v62  ;;  %v3039_v50 = vpack.c.bf16 %v2894_v41, %v2893_v0  ;;  %v3027_v61 = vpack.c.bf16 %v2892_v23, %v2983_v46  ;;  %v11476_v23 = vld [vmem:[#allocation26_spill] sm:$0xff]  ;;  %v11481_v46 = vld [vmem:[#allocation84_spill] sm:$0xff] }
 0x1ad   : > { %3512 = vmatprep.mubr.bf16.mxu1 %v3040_v51  ;;  %v7211_v58 = vunpack.i.h.bf16 %v9133_v12  ;;  %v7210_v8 = vunpack.i.l.bf16 %v9133_v12  ;;  %v11480_v0 = vld [vmem:[#allocation54_spill] sm:$0xff] }
 0x1ae   : > { %v7249_v26 = vpop.permute.xlu0 %7248  ;;  %v2317_v11 = vrot.slane %v1941_v2, 2  ;;  %v2030_v2 = vmul.f32 %v11457_v1, %v8391_v21 }
 0x1af   : > { %v7251_v52 = vunpack.i.h.bf16 %v7249_v26  ;;  %v7250_v37 = vunpack.i.l.bf16 %v7249_v26  ;;  %3634 = vmatmul.mubr.bf16.gmra.mrb[36].mxu0 %v3016_v45  ;;  %v9211_v16 = vpop.permute.xlu1 %7258  ;;  %v2316_v45 = vsel %vm2283_vm3, %v2313_v27, %v2315_v3  ;;  %v11474_v26 = vld [vmem:[#allocation75_spill] sm:$0xff]  ;;  %v2319_v27 = vrot.slane %v9218_v28, 2  ;;  %v11479_v28 = vld [vmem:[#allocation104_spill] sm:$0xff] }
 0x1b0   : > { %3641 = vmatprep.mubr.bf16.mxu0 %v3022_v49  ;;  %v11475_v49 = vld [vmem:[#allocation79_spill] sm:$0xff]  ;;  %v2928_v47 = vsel %vm2880_vm6, %v2316_v45, %v7206_v17  ;;  %v1777_v17 = vmul.f32 %v11476_v23, %v11458_v53  ;;  %v9251_v45 = vmul.f32 %v11480_v0, %v11479_v28  ;;  %v2985_v1 = vsel %vm2880_vm6, %v2030_v2, %v7200_v63 }
 0x1b1   : > { %v2949_v14 = vsel %vm2880_vm6, %v11474_v26, %v7250_v37  ;;  %v2950_v19 = vsel %vm2880_vm6, %v11475_v49, %v7251_v52  ;;  %v3045_v35 = vpack.c.bf16 %v2928_v47, %v2927_v48  ;;  %v7216_v37 = vunpack.i.h.bf16 %v9137_v30 }
 0x1b2   : > { %v9225_v51 = vpop.permute.xlu0 %7268  ;;  %v3021_v34 = vpack.c.bf16 %v2950_v19, %v2949_v14  ;;  %v7215_v52 = vunpack.i.l.bf16 %v9137_v30  ;;  %v2318_v47 = vsel %vm2283_vm3, %v2315_v3, %v2317_v11  ;;  %v11477_v19 = vld [vmem:[#allocation103_spill] sm:$0xff]  ;;  %v11478_v30 = vld [vmem:[#allocation53_spill] sm:$0xff]  ;;  %v11482_v3 = vld [vmem:[#allocation86_spill] sm:$0xff]  ;;  %v3032_v21 = vpack.c.bf16 %v2894_v41, %v2985_v1 }
 0x1b3   : > { %v7264_v56 = vpop.permute.xlu1 %7263  ;;  %v1943_v48 = vmul.f32 %v11478_v30, %v11477_v19  ;;  %v7226_v63 = vunpack.i.h.bf16 %v9145_v33  ;;  %v7225_v2 = vunpack.i.l.bf16 %v9145_v33  ;;  %v11483_v41 = vld [vmem:[#allocation27_spill] sm:$0xff] }
 0x1b4   : > { %v7266_v26 = vunpack.i.h.bf16 %v7264_v56  ;;  %v7265_v62 = vunpack.i.l.bf16 %v7264_v56  ;;  %3513 = vmatmul.mubr.bf16.gmra.mrb[24].mxu1 %v3039_v50  ;;  %v2895_v50 = vsel %vm2880_vm6, %v1777_v17, %v7210_v8  ;;  %v2929_v49 = vsel %vm2880_vm6, %v2318_v47, %v7215_v52 }
 0x1b5   : > { %3520 = vmatprep.mubr.bf16.mxu1 %v3045_v35  ;;  %v2320_v35 = vsel %vm2283_vm3, %v2317_v11, %v2319_v27  ;;  %v2323_v11 = vrot.slane %v9251_v45, 2  ;;  %v7230_v52 = vunpack.i.l.bf16 %v9165_v36  ;;  %v2032_v45 = vmul.f32 %v11462_v57, %v11458_v53 }
 0x1b6   : > { %v9238_v43 = vpop.permute.xlu0 %7273  ;;  %v2952_v14 = vsel %vm2880_vm6, %v11482_v3, %v7266_v26  ;;  %v2930_v56 = vsel %vm2880_vm6, %v2320_v35, %v7216_v37  ;;  %v7231_v26 = vunpack.i.h.bf16 %v9165_v36  ;;  %v11485_v36 = vld [vmem:[#allocation113_spill] sm:$0xff] }
 0x1b7   : > { %3642 = vmatmul.mubr.bf16.gmra.mrb[40].mxu0 %v3021_v34  ;;  %v9244_v12 = vpop.permute.xlu1 %7283  ;;  %v2896_v34 = vsel %vm2880_vm6, %v11463_v4, %v7211_v58  ;;  %v2321_v58 = vrot.slane %v1943_v48, 2  ;;  %v1779_v48 = vmul.f32 %v11483_v41, %v11465_v9  ;;  %v2987_v57 = vsel %vm2880_vm6, %v2032_v45, %v7210_v8 }
 0x1b8   : > { %3649 = vmatprep.mubr.bf16.mxu0 %v3027_v61  ;;  %v2951_v61 = vsel %vm2880_vm6, %v11481_v46, %v7265_v62  ;;  %v3044_v17 = vpack.c.bf16 %v2896_v34, %v2895_v50  ;;  %v3050_v46 = vpack.c.bf16 %v2930_v56, %v2929_v49  ;;  %v11484_v50 = vld [vmem:[#allocation109_spill] sm:$0xff]  ;;  %v11487_v56 = vld [vmem:[#allocation88_spill] sm:$0xff] }
 0x1b9   : > { %v3026_v62 = vpack.c.bf16 %v2952_v14, %v2951_v61  ;;  %v2322_v33 = vsel %vm2283_vm3, %v2319_v27, %v2321_v58  ;;  %v1945_v1 = vmul.f32 %v11427_v20, %v11484_v50  ;;  %v2897_v3 = vsel %vm2880_vm6, %v1779_v48, %v7225_v2 }
 0x1ba   : > { %v2898_v14 = vsel %vm2880_vm6, %v11470_v18, %v7226_v63  ;;  %v2324_v49 = vsel %vm2283_vm3, %v2321_v58, %v2323_v11  ;;  %v3037_v20 = vpack.c.bf16 %v2896_v34, %v2987_v57  ;;  %v7241_v63 = vunpack.i.h.bf16 %v9171_v54  ;;  %v11488_v34 = vld [vmem:[#allocation30_spill] sm:$0xff] }
 0x1bb   : > { %v7279_v0 = vpop.permute.xlu0 %7278  ;;  %v9264_v30 = vpop.permute.xlu1 %7288  ;;  %v2325_v48 = vrot.slane %v1945_v1, 2  ;;  %v7240_v58 = vunpack.i.l.bf16 %v9171_v54  ;;  %v1781_v1 = vmul.f32 %v11488_v34, %v11472_v31  ;;  %v2034_v54 = vmul.f32 %v11469_v29, %v11465_v9  ;;  %v11490_v29 = vld [vmem:[#allocation97_spill] sm:$0xff] }
 0x1bc   : > { %v7281_v47 = vunpack.i.h.bf16 %v7279_v0  ;;  %v7280_v37 = vunpack.i.l.bf16 %v7279_v0  ;;  %3521 = vmatmul.mubr.bf16.gmra.mrb[28].mxu1 %v3044_v17  ;;  %v9282_v0 = vmul.f32 %v11428_v39, %v11485_v36  ;;  %v3049_v39 = vpack.c.bf16 %v2898_v14, %v2897_v3 }
 0x1bd   : > { %3528 = vmatprep.mubr.bf16.mxu1 %v3050_v46  ;;  %v2932_v46 = vsel %vm2880_vm6, %v2324_v49, %v7231_v26  ;;  %v1947_v3 = vmul.f32 %v8761_v10, %v8621_v59  ;;  %v2989_v57 = vsel %vm2880_vm6, %v2034_v54, %v7225_v2 }
 0x1be   : > { %v2954_v17 = vsel %vm2880_vm6, %v11487_v56, %v7281_v47  ;;  %v2327_v4 = vrot.slane %v9282_v0, 2  ;;  %v7245_v47 = vunpack.i.l.bf16 %v9187_v38  ;;  %v2326_v0 = vsel %vm2283_vm3, %v2323_v11, %v2325_v48 }
 0x1bf   : > { %v9271_v35 = vpop.permute.xlu0 %7298  ;;  %3650 = vmatmul.mubr.bf16.gmra.mrb[44].mxu0 %v3026_v62  ;;  %v2931_v62 = vsel %vm2880_vm6, %v2322_v33, %v7230_v52 }
 0x1c0   : > { %3657 = vmatprep.mubr.bf16.mxu0 %v3032_v21  ;;  %v7294_v61 = vpop.permute.xlu1 %7293  ;;  %v11486_v21 = vld [vmem:[#allocation87_spill] sm:$0xff]  ;;  %v2328_v49 = vsel %vm2283_vm3, %v2325_v48, %v2327_v4  ;;  %v2933_v56 = vsel %vm2880_vm6, %v2326_v0, %v7245_v47  ;;  %v7255_v48 = vunpack.i.l.bf16 %v9199_v40 }
 0x1c1   : > { %v2953_v27 = vsel %vm2880_vm6, %v11486_v21, %v7280_v37  ;;  %v3055_v37 = vpack.c.bf16 %v2932_v46, %v2931_v62  ;;  %v7246_v21 = vunpack.i.h.bf16 %v9187_v38  ;;  %v7296_v52 = vunpack.i.h.bf16 %v7294_v61 }
 0x1c2   : > { %v3031_v45 = vpack.c.bf16 %v2954_v17, %v2953_v27  ;;  %v7295_v33 = vunpack.i.l.bf16 %v7294_v61  ;;  %v1948_v38 = vmul.f32 %v8870_v25, %v8632_v5  ;;  %v2900_v61 = vsel %vm2880_vm6, %v11477_v19, %v7241_v63  ;;  %v11489_v27 = vld [vmem:[#allocation95_spill] sm:$0xff] }
 0x1c3   : > { %v9298_v8 = vpop.permute.xlu0 %7303  ;;  %v2956_v11 = vsel %vm2880_vm6, %v11490_v29, %v7296_v52  ;;  %v2934_v17 = vsel %vm2880_vm6, %v2328_v49, %v7246_v21  ;;  %v7256_v63 = vunpack.i.h.bf16 %v9199_v40  ;;  %v7260_v52 = vunpack.i.l.bf16 %v9211_v16  ;;  %v11492_v29 = vld [vmem:[#allocation99_spill] sm:$0xff] }
 0x1c4   : > { %3529 = vmatmul.mubr.bf16.gmra.mrb[32].mxu1 %v3049_v39  ;;  %v9302_v26 = vpop.permute.xlu1 %7313  ;;  %v2899_v39 = vsel %vm2880_vm6, %v1781_v1, %v7240_v58  ;;  %v2331_v1 = vrot.slane %v1948_v38, 2  ;;  %v1949_v38 = vmul.f32 %v8876_v55, %v8656_v13 }
 0x1c5   : > { %3536 = vmatprep.mubr.bf16.mxu1 %v3055_v37  ;;  %v3054_v46 = vpack.c.bf16 %v2900_v61, %v2899_v39  ;;  %v2329_v37 = vrot.slane %v1947_v3, 2  ;;  %v2036_v3 = vmul.f32 %v11476_v23, %v11472_v31  ;;  %v2902_v49 = vsel %vm2880_vm6, %v11484_v50, %v7256_v63 }
 0x1c6   : > { %v7271_v63 = vunpack.i.h.bf16 %v9225_v51 }
 0x1c7   : > { %3658 = vmatmul.mubr.bf16.gmra.mrb[48].mxu0 %v3031_v45  ;;  %v7309_v62 = vpop.permute.xlu0 %7308  ;;  %v3042_v45 = vpack.c.bf16 %v2898_v14, %v2989_v57  ;;  %v11491_v14 = vld [vmem:[#allocation32_spill] sm:$0xff]  ;;  %v2330_v40 = vsel %vm2283_vm3, %v2327_v4, %v2329_v37  ;;  %v2332_v57 = vsel %vm2283_vm3, %v2329_v37, %v2331_v1  ;;  %v7270_v37 = vunpack.i.l.bf16 %v9225_v51 }
 0x1c8   : > { %3665 = vmatprep.mubr.bf16.mxu0 %v3037_v20  ;;  %v2955_v20 = vsel %vm2880_vm6, %v11489_v27, %v7295_v33  ;;  %v9326_v2 = vpop.permute.xlu1 %7318  ;;  %v3060_v33 = vpack.c.bf16 %v2934_v17, %v2933_v56  ;;  %v7261_v27 = vunpack.i.h.bf16 %v9211_v16  ;;  %v7311_v47 = vunpack.i.h.bf16 %v7309_v62 }
 0x1c9   : > { %v3036_v54 = vpack.c.bf16 %v2956_v11, %v2955_v20  ;;  %v7310_v0 = vunpack.i.l.bf16 %v7309_v62  ;;  %v1783_v21 = vmul.f32 %v11491_v14, %v11479_v28  ;;  %v1950_v16 = vmul.f32 %v8914_v32, %v8688_v44  ;;  %v11493_v11 = vld [vmem:[#allocation100_spill] sm:$0xff] }
 0x1ca   : > { %v2991_v20 = vsel %vm2880_vm6, %v2036_v3, %v7240_v58  ;;  %v2958_v4 = vsel %vm2880_vm6, %v11493_v11, %v7311_v47  ;;  %v2935_v56 = vsel %vm2880_vm6, %v2330_v40, %v7260_v52  ;;  %v2936_v17 = vsel %vm2880_vm6, %v2332_v57, %v7261_v27  ;;  %v11496_v11 = vld [vmem:[#allocation108_spill] sm:$0xff] }
 0x1cb   : > { %v2901_v39 = vsel %vm2880_vm6, %v1783_v21, %v7255_v48  ;;  %v2957_v23 = vsel %vm2880_vm6, %v11492_v29, %v7310_v0  ;;  %v9352_v58 = vpop.permute.xlu0 %7323  ;;  %v3065_v0 = vpack.c.bf16 %v2936_v17, %v2935_v56  ;;  %v7276_v3 = vunpack.i.h.bf16 %v9238_v43 }
 0x1cc   : > { %3537 = vmatmul.mubr.bf16.gmra.mrb[36].mxu1 %v3054_v46  ;;  %v7329_v62 = vpop.permute.xlu1 %7328  ;;  %v3059_v46 = vpack.c.bf16 %v2902_v49, %v2901_v39  ;;  %v3041_v21 = vpack.c.bf16 %v2958_v4, %v2957_v23  ;;  %v7275_v47 = vunpack.i.l.bf16 %v9238_v43  ;;  %v1952_v43 = vmul.f32 %v8884_v6, %v8727_v15  ;;  %v11495_v23 = vld [vmem:[#allocation106_spill] sm:$0xff] }
 0x1cd   : > { %3544 = vmatprep.mubr.bf16.mxu1 %v3060_v33  ;;  %v2335_v33 = vrot.slane %v1950_v16, 2  ;;  %v7331_v52 = vunpack.i.h.bf16 %v7329_v62  ;;  %v7330_v40 = vunpack.i.l.bf16 %v7329_v62  ;;  %v1951_v16 = vmul.f32 %v8921_v7, %v8717_v24 }
 0x1ce   : > { %v2904_v57 = vsel %vm2880_vm6, %v8621_v59, %v7271_v63  ;;  %v7286_v63 = vunpack.i.h.bf16 %v9244_v12 }
 0x1cf   : > { %3666 = vmatmul.mubr.bf16.gmra.mrb[52].mxu0 %v3036_v54  ;;  %v2333_v54 = vrot.slane %v1949_v38, 2  ;;  %v2038_v38 = vmul.f32 %v11483_v41, %v11479_v28  ;;  %v2959_v41 = vsel %vm2880_vm6, %v11495_v23, %v7330_v40  ;;  %v7334_v17 = vpop.permute.xlu0 %7333  ;;  %v7291_v40 = vunpack.i.h.bf16 %v9264_v30 }
 0x1d0   : > { %3673 = vmatprep.mubr.bf16.mxu0 %v3042_v45  ;;  %v3047_v45 = vpack.c.bf16 %v2900_v61, %v2991_v20  ;;  %v11494_v61 = vld [vmem:[#allocation35_spill] sm:$0xff] }
 0x1d1   : > { %v1785_v27 = vmul.f32 %v11494_v61, %v11485_v36  ;;  %v2334_v51 = vsel %vm2283_vm3, %v2331_v1, %v2333_v54  ;;  %v2336_v20 = vsel %vm2283_vm3, %v2333_v54, %v2335_v33  ;;  %v2993_v29 = vsel %vm2880_vm6, %v2038_v38, %v7255_v48 }
 0x1d2   : > { %v2960_v1 = vsel %vm2880_vm6, %v11496_v11, %v7331_v52  ;;  %v2937_v4 = vsel %vm2880_vm6, %v2334_v51, %v7275_v47  ;;  %v2938_v56 = vsel %vm2880_vm6, %v2336_v20, %v7276_v3  ;;  %v7285_v54 = vunpack.i.l.bf16 %v9244_v12  ;;  %v11497_v3 = vld [vmem:[#allocation38_spill] sm:$0xff]  ;;  %v11498_v51 = vld [vmem:[#allocation128_spill] sm:$0xff] }
 0x1d3   : > { %v2903_v39 = vsel %vm2880_vm6, %v1785_v27, %v7270_v37  ;;  %v3046_v48 = vpack.c.bf16 %v2960_v1, %v2959_v41  ;;  %v7290_v27 = vunpack.i.l.bf16 %v9264_v30  ;;  %v7336_v52 = vunpack.i.h.bf16 %v7334_v17  ;;  %v11500_v41 = vld [vmem:[#allocation111_spill] sm:$0xff]  ;;  %v11501_v11 = vld [vmem:[#allocation112_spill] sm:$0xff] }
 0x1d4   : > { %3545 = vmatmul.mubr.bf16.gmra.mrb[40].mxu1 %v3059_v46  ;;  %v3064_v62 = vpack.c.bf16 %v2904_v57, %v2903_v39  ;;  %v3052_v46 = vpack.c.bf16 %v2902_v49, %v2993_v29  ;;  %v7335_v38 = vunpack.i.l.bf16 %v7334_v17  ;;  %v1787_v49 = vmul.f32 %v11497_v3, %v8632_v5 }
 0x1d5   : > { %3552 = vmatprep.mubr.bf16.mxu1 %v3065_v0  ;;  %v3070_v0 = vpack.c.bf16 %v2938_v56, %v2937_v4  ;;  %v2040_v47 = vmul.f32 %v11488_v34, %v11485_v36  ;;  %v2906_v20 = vsel %vm2880_vm6, %v8656_v13, %v7286_v63  ;;  %v7301_v63 = vunpack.i.h.bf16 %v9271_v35 }
 0x1d6   : > { %v2905_v39 = vsel %vm2880_vm6, %v1787_v49, %v7285_v54  ;;  %v2961_v34 = vsel %vm2880_vm6, %v11500_v41, %v7335_v38  ;;  %v7305_v38 = vunpack.i.l.bf16 %v9298_v8 }
 0x1d7   : > { %3674 = vmatmul.mubr.bf16.gmra.mrb[56].mxu0 %v3041_v21  ;;  %v2339_v21 = vrot.slane %v1952_v43, 2  ;;  %v11499_v43 = vld [vmem:[#allocation130_spill] sm:$0xff]  ;;  %v2995_v23 = vsel %vm2880_vm6, %v2040_v47, %v7270_v37  ;;  %v3069_v56 = vpack.c.bf16 %v2906_v20, %v2905_v39  ;;  %v11503_v47 = vld [vmem:[#allocation133_spill] sm:$0xff] }
 0x1d8   : > { %3681 = vmatprep.mubr.bf16.mxu0 %v3047_v45  ;;  %v2337_v45 = vrot.slane %v1951_v16, 2  ;;  %v1953_v16 = vmul.f32 %v8618_v42, %v11498_v51  ;;  %v1954_v30 = vmul.f32 %v8086_v60, %v11499_v43  ;;  %v7339_v60 = vpop.permute.xlu1 %7338  ;;  %v3057_v17 = vpack.c.bf16 %v2904_v57, %v2995_v23 }
 0x1d9   : > { %v7340_v49 = vunpack.i.l.bf16 %v7339_v60 }
 0x1da   : > { %v2338_v12 = vsel %vm2283_vm3, %v2335_v33, %v2337_v45  ;;  %v2340_v29 = vsel %vm2283_vm3, %v2337_v45, %v2339_v21  ;;  %v2962_v33 = vsel %vm2880_vm6, %v11501_v11, %v7336_v52  ;;  %v7300_v45 = vunpack.i.l.bf16 %v9271_v35  ;;  %v11507_v11 = vld [vmem:[#allocation119_spill] sm:$0xff] }
 0x1db   : > { %v2939_v1 = vsel %vm2880_vm6, %v2338_v12, %v7290_v27  ;;  %v2940_v4 = vsel %vm2880_vm6, %v2340_v29, %v7291_v40  ;;  %v3051_v37 = vpack.c.bf16 %v2962_v33, %v2961_v34  ;;  %v7341_v52 = vunpack.i.h.bf16 %v7339_v60  ;;  %v11502_v40 = vld [vmem:[#allocation40_spill] sm:$0xff]  ;;  %v11506_v34 = vld [vmem:[#allocation118_spill] sm:$0xff] }
 0x1dc   : > { %3553 = vmatmul.mubr.bf16.gmra.mrb[44].mxu1 %v3064_v62  ;;  %v2341_v62 = vrot.slane %v1953_v16, 2  ;;  %v1789_v57 = vmul.f32 %v11502_v40, %v8688_v44  ;;  %v2042_v27 = vmul.f32 %v11491_v14, %v8632_v5  ;;  %v1955_v12 = vmul.f32 %v8942_v22, %v11503_v47  ;;  %v11504_v16 = vld [vmem:[#allocation134_spill] sm:$0xff] }
 0x1dd   : > { %3560 = vmatprep.mubr.bf16.mxu1 %v3070_v0  ;;  %v7306_v0 = vunpack.i.h.bf16 %v9298_v8  ;;  %v2908_v29 = vsel %vm2880_vm6, %v8717_v24, %v7301_v63  ;;  %v2963_v14 = vsel %vm2880_vm6, %v11506_v34, %v7340_v49  ;;  %v7316_v63 = vunpack.i.h.bf16 %v9302_v26 }
 0x1de   : > { %v2342_v35 = vsel %vm2283_vm3, %v2339_v21, %v2341_v62  ;;  %v2907_v39 = vsel %vm2880_vm6, %v1789_v57, %v7300_v45  ;;  %v2997_v41 = vsel %vm2880_vm6, %v2042_v27, %v7285_v54  ;;  %v2964_v21 = vsel %vm2880_vm6, %v11507_v11, %v7341_v52 }
 0x1df   : > { %3682 = vmatmul.mubr.bf16.gmra.mrb[60].mxu0 %v3046_v48  ;;  %v3075_v48 = vpack.c.bf16 %v2940_v4, %v2939_v1  ;;  %v2941_v33 = vsel %vm2880_vm6, %v2342_v35, %v7305_v38  ;;  %v7344_v4 = vpop.permute.xlu0 %7343  ;;  %v3074_v60 = vpack.c.bf16 %v2908_v29, %v2907_v39  ;;  %v3056_v54 = vpack.c.bf16 %v2964_v21, %v2963_v14 }
 0x1e0   : > { %3689 = vmatprep.mubr.bf16.mxu0 %v3052_v46  ;;  %v2343_v46 = vrot.slane %v1954_v30, 2  ;;  %v11505_v30 = vld [vmem:[#allocation141_spill] sm:$0xff]  ;;  %v7321_v49 = vunpack.i.h.bf16 %v9326_v2  ;;  %v7320_v57 = vunpack.i.l.bf16 %v9326_v2  ;;  %v7346_v52 = vunpack.i.h.bf16 %v7344_v4 }
 0x1e1   : > { %v1956_v8 = vmul.f32 %v11505_v30, %v11504_v16  ;;  %v7345_v27 = vunpack.i.l.bf16 %v7344_v4  ;;  %v2044_v38 = vmul.f32 %v11494_v61, %v8688_v44  ;;  %v2910_v35 = vsel %vm2880_vm6, %v11498_v51, %v7316_v63  ;;  %v7349_v61 = vpop.permute.xlu1 %7348 }
 0x1e2   : > { %v2344_v23 = vsel %vm2283_vm3, %v2341_v62, %v2343_v46  ;;  %v7315_v62 = vunpack.i.l.bf16 %v9302_v26 }
 0x1e3   : > { %v2942_v1 = vsel %vm2880_vm6, %v2344_v23, %v7306_v0  ;;  %v11508_v0 = vld [vmem:[#allocation47_spill] sm:$0xff]  ;;  %v11510_v23 = vld [vmem:[#allocation122_spill] sm:$0xff]  ;;  %v2999_v11 = vsel %vm2880_vm6, %v2044_v38, %v7300_v45 }
 0x1e4   : > { %3561 = vmatmul.mubr.bf16.gmra.mrb[48].mxu1 %v3069_v56  ;;  %v3062_v56 = vpack.c.bf16 %v2906_v20, %v2997_v41  ;;  %v1791_v20 = vmul.f32 %v11508_v0, %v8727_v15  ;;  %v2966_v41 = vsel %vm2880_vm6, %v11510_v23, %v7346_v52  ;;  %v11515_v45 = vld [vmem:[#allocation50_spill] sm:$0xff]  ;;  %v11519_v23 = vld [vmem:[#allocation127_spill] sm:$0xff] }
 0x1e5   : > { %3568 = vmatprep.mubr.bf16.mxu1 %v3075_v48  ;;  %v3080_v48 = vpack.c.bf16 %v2942_v1, %v2941_v33  ;;  %v11511_v33 = vld [vmem:[#allocation60_spill] sm:$0xff]  ;;  %v11512_v1 = vld [vmem:[#allocation17_spill] sm:$0xff]  ;;  %v1793_v52 = vmul.f32 %v11515_v45, %v11499_v43  ;;  %v11525_v45 = vld [vmem:[#allocation31_spill] sm:$0xff] }
 0x1e6   : > { %v2909_v26 = vsel %vm2880_vm6, %v1791_v20, %v7315_v62  ;;  %v2054_v4 = vmul.f32 %v11512_v1, %v11511_v33  ;;  %v7354_v1 = vpop.permute.xlu0 %7353 }
 0x1e7   : > { %3690 = vmatmul.mubr.bf16.gmra.mrb[64].mxu0 %v3051_v37  ;;  %v2347_v37 = vrot.slane %v1956_v8, 2  ;;  %v11509_v8 = vld [vmem:[#allocation120_spill] sm:$0xff]  ;;  %v3079_v21 = vpack.c.bf16 %v2910_v35, %v2909_v26 }
 0x1e8   : > { %3697 = vmatprep.mubr.bf16.mxu0 %v3057_v17  ;;  %v2345_v17 = vrot.slane %v1955_v12, 2  ;;  %v2965_v39 = vsel %vm2880_vm6, %v11509_v8, %v7345_v27  ;;  %v2783_v27 = vrot.slane %v2054_v4, 2 }
 0x1e9   : > { %v3061_v63 = vpack.c.bf16 %v2966_v41, %v2965_v39 }
 0x1ea   : > { %v2346_v12 = vsel %vm2283_vm3, %v2343_v46, %v2345_v17  ;;  %v2348_v2 = vsel %vm2283_vm3, %v2345_v17, %v2347_v37  ;;  %v11513_v46 = vld [vmem:[#allocation62_spill] sm:$0xff]  ;;  %v7326_v17 = vunpack.i.h.bf16 %v9352_v58  ;;  %v7325_v37 = vunpack.i.l.bf16 %v9352_v58 }
 0x1eb   : > { %v2943_v34 = vsel %vm2880_vm6, %v2346_v12, %v7320_v57  ;;  %v2944_v14 = vsel %vm2880_vm6, %v2348_v2, %v7321_v49  ;;  %v7350_v57 = vunpack.i.l.bf16 %v7349_v61  ;;  %v3067_v49 = vpack.c.bf16 %v2908_v29, %v2999_v11  ;;  %v11516_v12 = vld [vmem:[#allocation68_spill] sm:$0xff]  ;;  %v11518_v29 = vld [vmem:[#allocation126_spill] sm:$0xff] }
 0x1ec   : > { %3569 = vmatmul.mubr.bf16.gmra.mrb[52].mxu1 %v3074_v60  ;;  %v11514_v60 = vld [vmem:[#allocation20_spill] sm:$0xff]  ;;  %v2911_v38 = vsel %vm2880_vm6, %v1793_v52, %v7325_v37  ;;  %v2912_v26 = vsel %vm2880_vm6, %v11503_v47, %v7326_v17  ;;  %v2046_v58 = vmul.f32 %v11497_v3, %v8727_v15 }
 0x1ed   : > { %3576 = vmatprep.mubr.bf16.mxu1 %v3080_v48  ;;  %v7351_v48 = vunpack.i.h.bf16 %v7349_v61  ;;  %v11517_v2 = vld [vmem:[#allocation28_spill] sm:$0xff]  ;;  %v2967_v39 = vsel %vm2880_vm6, %v11518_v29, %v7350_v57  ;;  %v3084_v3 = vpack.c.bf16 %v2912_v26, %v2911_v38  ;;  %v11531_v29 = vld [vmem:[#allocation131_spill] sm:$0xff] }
 0x1ee   : > { %v2059_v8 = vmul.f32 %v11517_v2, %v11516_v12  ;;  %v11522_v11 = vld [vmem:[#allocation76_spill] sm:$0xff]  ;;  %v3001_v4 = vsel %vm2880_vm6, %v2046_v58, %v7315_v62  ;;  %v11526_v12 = vld [vmem:[#allocation81_spill] sm:$0xff]  ;;  %v2048_v2 = vmul.f32 %v11502_v40, %v11499_v43 }
 0x1ef   : > { %3698 = vmatmul.mubr.bf16.gmra.mrb[68].mxu0 %v3056_v54  ;;  %v3085_v54 = vpack.c.bf16 %v2944_v14, %v2943_v34  ;;  %v2968_v41 = vsel %vm2880_vm6, %v11519_v23, %v7351_v48  ;;  %v11520_v34 = vld [vmem:[#allocation55_spill] sm:$0xff]  ;;  %v3072_v48 = vpack.c.bf16 %v2910_v35, %v3001_v4  ;;  %v11527_v62 = vld [vmem:[#allocation33_spill] sm:$0xff]  ;;  %v11532_v23 = vld [vmem:[#allocation132_spill] sm:$0xff] }
 0x1f0   : > { %3705 = vmatprep.mubr.bf16.mxu0 %v3062_v56  ;;  %v2055_v56 = vmul.f32 %v11514_v60, %v11513_v46  ;;  %v11521_v14 = vrot.slane %v11520_v34, 2  ;;  %v3066_v60 = vpack.c.bf16 %v2968_v41, %v2967_v39  ;;  %v2792_v17 = vrot.slane %v2059_v8, 2  ;;  %v11528_v58 = vld [vmem:[#allocation77_spill] sm:$0xff]  ;;  %v11530_v8 = vld [vmem:[#allocation36_spill] sm:$0xff]  ;;  %v11533_v34 = vld [vmem:[#allocation143_spill] sm:$0xff] }
 0x1f1   : > { %v2062_v38 = vmul.f32 %v11527_v62, %v11526_v12  ;;  %v2064_v35 = vmul.f32 %v11530_v8, %v11458_v53  ;;  %v2050_v62 = vmul.f32 %v11508_v0, %v11504_v16  ;;  %v11544_v0 = vld [vmem:[#allocation42_spill] sm:$0xff] }
 0x1f2   : > { %v2784_v20 = vrot.slane %v2055_v56, 2 }
 0x1f3   : > { %v2798_v4 = vrot.slane %v2062_v38, 2 }
 0x1f4   : > { %3577 = vmatmul.mubr.bf16.gmra.mrb[56].mxu1 %v3079_v21  ;;  %v2787_v61 = vsel %vm2283_vm3, %v2784_v20, %v11521_v14  ;;  %v11523_v21 = vld [vmem:[#allocation29_spill] sm:$0xff]  ;;  %v2785_v46 = vsel %vm2283_vm3, %v2783_v27, %v2784_v20  ;;  %v11529_v27 = vld [vmem:[#allocation34_spill] sm:$0xff]  ;;  %v11534_v14 = vrot.slane %v11533_v34, 2  ;;  %v2068_v34 = vmul.f32 %v11544_v0, %v11472_v31 }
 0x1f5   : > { %3584 = vmatprep.mubr.bf16.mxu1 %v3085_v54  ;;  %v2060_v33 = vmul.f32 %v11523_v21, %v11522_v11  ;;  %v3013_v56 = vpack.c.bf16 %v2787_v61, %v2785_v46  ;;  %v7355_v54 = vunpack.i.l.bf16 %v7354_v1  ;;  %v2063_v20 = vmul.f32 %v11529_v27, %v11528_v58  ;;  %v7359_v21 = vpop.permute.xlu1 %7358  ;;  %v11538_v27 = vld [vmem:[#allocation92_spill] sm:$0xff] }
 0x1f6   : > { %v2793_v61 = vsel %vm2283_vm3, %v11534_v14, %v2792_v17 }
 0x1f7   : > { %3706 = vmatmul.mubr.bf16.gmra.mrb[72].mxu0 %v3061_v63  ;;  %v7356_v63 = vunpack.i.h.bf16 %v7354_v1  ;;  %v2794_v57 = vrot.slane %v2060_v33, 2  ;;  %v2969_v39 = vsel %vm2880_vm6, %v11531_v29, %v7355_v54  ;;  %v3003_v33 = vsel %vm2880_vm6, %v2048_v2, %v7325_v37  ;;  %v7364_v1 = vpop.permute.xlu0 %7363  ;;  %v11540_v2 = vld [vmem:[#allocation39_spill] sm:$0xff] }
 0x1f8   : > { %3713 = vmatprep.mubr.bf16.mxu0 %v3067_v49  ;;  %v11524_v49 = vld [vmem:[#allocation80_spill] sm:$0xff]  ;;  %v7360_v54 = vunpack.i.l.bf16 %v7359_v21  ;;  %v7366_v12 = vunpack.i.h.bf16 %v7364_v1  ;;  %v2066_v8 = vmul.f32 %v11540_v2, %v11465_v9  ;;  %v11552_v2 = vld [vmem:[#allocation135_spill] sm:$0xff] }
 0x1f9   : > { %v2061_v52 = vmul.f32 %v11525_v45, %v11524_v49  ;;  %v2970_v41 = vsel %vm2880_vm6, %v11532_v23, %v7356_v63  ;;  %v2795_v11 = vsel %vm2283_vm3, %v2792_v17, %v2794_v57  ;;  %v11536_v63 = vld [vmem:[#allocation144_spill] sm:$0xff]  ;;  %v3077_v45 = vpack.c.bf16 %v2912_v26, %v3003_v33  ;;  %v11543_v23 = vld [vmem:[#allocation138_spill] sm:$0xff]  ;;  %v7369_v14 = vpop.permute.xlu1 %7368 }
 0x1fa   : > { %v3071_v53 = vpack.c.bf16 %v2970_v41, %v2969_v39  ;;  %v3023_v46 = vpack.c.bf16 %v2795_v11, %v2793_v61  ;;  %v7365_v17 = vunpack.i.l.bf16 %v7364_v1  ;;  %v11542_v39 = vld [vmem:[#allocation137_spill] sm:$0xff]  ;;  %v11545_v11 = vld [vmem:[#allocation136_spill] sm:$0xff] }
 0x1fb   : > { %v2796_v40 = vrot.slane %v2061_v52, 2  ;;  %v7374_v33 = vpop.permute.xlu0 %7373 }
 0x1fc   : > { %3585 = vmatmul.mubr.bf16.gmra.mrb[60].mxu1 %v3084_v3  ;;  %v2800_v3 = vrot.slane %v2063_v20, 2  ;;  %v11539_v20 = vld [vmem:[#allocation37_spill] sm:$0xff]  ;;  %v3005_v61 = vsel %vm2880_vm6, %v2050_v62, %v7365_v17  ;;  %v7375_v31 = vunpack.i.l.bf16 %v7374_v33  ;;  %v11549_v62 = vld [vmem:[#allocation52_spill] sm:$0xff] }
 0x1fd   : > { %6923 = vmatprep.mubr.msk.bf16.mxu1 %vm2880_vm6, %v3013_v56  ;;  %v7361_v56 = vunpack.i.h.bf16 %v7359_v21  ;;  %v2797_v37 = vsel %vm2283_vm3, %v2794_v57, %v2796_v40  ;;  %v2799_v52 = vsel %vm2283_vm3, %v2796_v40, %v2798_v4  ;;  %v2065_v26 = vmul.f32 %v11539_v20, %v11538_v27  ;;  %v11551_v20 = vld [vmem:[#allocation140_spill] sm:$0xff] }
 0x1fe   : > { %v2801_v38 = vsel %vm2283_vm3, %v2798_v4, %v2800_v3  ;;  %v2971_v57 = vsel %vm2880_vm6, %v11542_v39, %v7360_v54  ;;  %v3006_v21 = vsel %vm2880_vm6, %v11545_v11, %v7366_v12  ;;  %v3028_v9 = vpack.c.bf16 %v2799_v52, %v2797_v37  ;;  %v11548_v37 = vld [vmem:[#allocation51_spill] sm:$0xff] }
 0x1ff   : > { %3714 = vmatmul.mubr.bf16.gmra.mrb[76].mxu0 %v3066_v60  ;;  %v2802_v60 = vrot.slane %v2064_v35, 2  ;;  %v11541_v35 = vld [vmem:[#allocation41_spill] sm:$0xff]  ;;  %v2972_v41 = vsel %vm2880_vm6, %v11543_v23, %v7361_v56  ;;  %v2806_v4 = vrot.slane %v2066_v8, 2  ;;  %v3082_v56 = vpack.c.bf16 %v3006_v21, %v3005_v61 }
 0x200   : > { %3721 = vmatprep.mubr.bf16.mxu0 %v3072_v48  ;;  %v11535_v48 = vld [vmem:[#allocation21_spill] sm:$0xff]  ;;  %v2067_v29 = vmul.f32 %v11541_v35, %v11470_v18  ;;  %v3076_v40 = vpack.c.bf16 %v2972_v41, %v2971_v57  ;;  %v2804_v18 = vrot.slane %v2065_v26, 2  ;;  %v2810_v54 = vrot.slane %v2068_v34, 2  ;;  %v11553_v41 = vld [vmem:[#allocation14_spill] sm:$0xff] }
 0x201   : > { %v11537_v49 = vpack.c.bf16 %v11535_v48, %v11536_v63  ;;  %v2803_v58 = vsel %vm2283_vm3, %v2800_v3, %v2802_v60  ;;  %v11546_v48 = vld [vmem:[#allocation45_spill] sm:$0xff]  ;;  %v2071_v52 = vmul.f32 %v11548_v37, %v11484_v50  ;;  %v7376_v23 = vunpack.i.h.bf16 %v7374_v33 }
 0x202   : > { %v3033_v1 = vpack.c.bf16 %v2803_v58, %v2801_v38  ;;  %v2808_v3 = vrot.slane %v2067_v29, 2  ;;  %v2069_v63 = vmul.f32 %v11546_v48, %v11477_v19  ;;  %v2805_v12 = vsel %vm2283_vm3, %v2802_v60, %v2804_v18  ;;  %v11550_v58 = vld [vmem:[#allocation139_spill] sm:$0xff] }
 0x203   : > { %v2807_v17 = vsel %vm2283_vm3, %v2804_v18, %v2806_v4  ;;  %v2072_v38 = vmul.f32 %v11549_v62, %v11485_v36  ;;  %v3007_v60 = vsel %vm2880_vm6, %v11552_v2, %v7375_v31  ;;  %v2816_v57 = vrot.slane %v2071_v52, 2 }
 0x204   : > { %6924 = vmatmul.mubr.msk.bf16.vlgmr.msra.gmra.mrb[64].mxu1 %vm2880_vm6, %v11537_v49  ;;  %v11547_v49 = vld [vmem:[#allocation48_spill] sm:$0xff]  ;;  %v2809_v19 = vsel %vm2283_vm3, %v2806_v4, %v2808_v3  ;;  %v3038_v8 = vpack.c.bf16 %v2807_v17, %v2805_v12  ;;  %v2812_v35 = vrot.slane %v2069_v63, 2  ;;  %v11554_v0 = vunpack.i.l.bf16 %v11553_v41  ;;  %v11557_v4 = vld [vmem:[#allocation54_spill] sm:$0xff] }
 0x205   : > { %6927 = vmatprep.mubr.msk.bf16.mxu1 %vm2880_vm6, %v3023_v46  ;;  %v7370_v46 = vunpack.i.l.bf16 %v7369_v14  ;;  %v2818_v36 = vrot.slane %v2072_v38, 2  ;;  %v11561_v63 = vld [vmem:[#allocation58_spill] sm:$0xff] }
 0x206   : > { %v6284_v34 = vpack.c.bf16 %v11554_v0, %v3007_v60  ;;  %v2813_v21 = vsel %vm2283_vm3, %v2810_v54, %v2812_v35 }
 0x207   : > { %3722 = vmatmul.mubr.bf16.gmra.mrb[80].mxu0 %v3071_v53  ;;  %v7371_v53 = vunpack.i.h.bf16 %v7369_v14  ;;  %v2973_v27 = vsel %vm2880_vm6, %v11550_v58, %v7370_v46  ;;  %v2707_v14 = vpop.permute.xlu1 %2706  ;;  %v2819_v33 = vsel %vm2283_vm3, %v2816_v57, %v2818_v36 }
 0x208   : > { %3729 = vmatprep.mubr.bf16.mxu0 %v3077_v45  ;;  %v2070_v45 = vmul.f32 %v11547_v49, %v11479_v28  ;;  %v2811_v28 = vsel %vm2283_vm3, %v2808_v3, %v2810_v54  ;;  %v2074_v3 = vmul.f32 %v11557_v4, %v8632_v5  ;;  %v11560_v54 = vld [vmem:[#allocation56_spill] sm:$0xff]  ;;  %v2076_v49 = vmul.f32 %v11561_v63, %v8688_v44 }
 0x209   : > { %v2974_v26 = vsel %vm2880_vm6, %v11551_v20, %v7371_v53  ;;  %v3043_v39 = vpack.c.bf16 %v2811_v28, %v2809_v19  ;;  %v11558_v53 = vld [vmem:[#allocation59_spill] sm:$0xff]  ;;  %v2075_v48 = vmul.f32 %v11560_v54, %v8656_v13  ;;  %v2077_v13 = vmul.f32 %v8761_v10, %v8717_v24 }
 0x20a   : > { %v2814_v29 = vrot.slane %v2070_v45, 2  ;;  %v3081_v50 = vpack.c.bf16 %v2974_v26, %v2973_v27  ;;  %v2975_v46 = vsel %vm2880_vm6, %v11558_v53, %v7376_v23  ;;  %v2826_v52 = vrot.slane %v2076_v49, 2 }
 0x20b   : > { %v2824_v5 = vrot.slane %v2075_v48, 2  ;;  %v2078_v44 = vmul.f32 %v8870_v25, %v8727_v15  ;;  %v2079_v20 = vmul.f32 %v8876_v55, %v11498_v51  ;;  %v2080_v26 = vmul.f32 %v8914_v32, %v11499_v43 }
 0x20c   : > { %6928 = vmatmul.mubr.msk.bf16.gmra.mrb[68].mxu1 %vm2880_vm6, %v3028_v9  ;;  %v2815_v9 = vsel %vm2283_vm3, %v2812_v35, %v2814_v29  ;;  %v2828_v2 = vrot.slane %v2077_v13, 2  ;;  %v2081_v55 = vmul.f32 %v8921_v7, %v11503_v47  ;;  %v2082_v32 = vmul.f32 %v8884_v6, %v11504_v16 }
 0x20d   : > { %6931 = vmatprep.mubr.msk.bf16.mxu1 %vm2880_vm6, %v3033_v1  ;;  %v2817_v1 = vsel %vm2283_vm3, %v2814_v29, %v2816_v57  ;;  %v3048_v45 = vpack.c.bf16 %v2815_v9, %v2813_v21  ;;  %v2827_v27 = vsel %vm2283_vm3, %v2824_v5, %v2826_v52  ;;  %v2830_v60 = vrot.slane %v2078_v44, 2  ;;  %v11562_v57 = vld [vmem:[#allocation129_spill] sm:$0xff] }
 0x20e   : > { %v3053_v17 = vpack.c.bf16 %v2819_v33, %v2817_v1  ;;  %v2832_v24 = vrot.slane %v2079_v20, 2  ;;  %v2834_v10 = vrot.slane %v2080_v26, 2  ;;  %v2829_v15 = vsel %vm2283_vm3, %v2826_v52, %v2828_v2 }
 0x20f   : > { %3730 = vmatmul.mubr.bf16.gmra.mrb[84].mxu0 %v3076_v40  ;;  %v11556_v40 = vld [vmem:[#allocation53_spill] sm:$0xff]  ;;  %v2831_v25 = vsel %vm2283_vm3, %v2828_v2, %v2830_v60  ;;  %v2085_v47 = vmul.f32 0.0, %v8942_v22  ;;  %v2086_v16 = vmul.f32 0.0, %v11505_v30 }
 0x210   : > { %3737 = vmatprep.mubr.bf16.mxu0 %v3082_v56  ;;  %v2073_v18 = vmul.f32 %v11556_v40, %v8621_v59  ;;  %v11559_v56 = vld [vmem:[#allocation142_spill] sm:$0xff]  ;;  %v2822_v59 = vrot.slane %v2074_v3, 2  ;;  %v2833_v51 = vsel %vm2283_vm3, %v2830_v60, %v2832_v24  ;;  %v2835_v43 = vsel %vm2283_vm3, %v2832_v24, %v2834_v10 }
 0x211   : > { %v2976_v31 = vsel %vm2880_vm6, %v11559_v56, %v2707_v14  ;;  %v3068_v35 = vpack.c.bf16 %v2831_v25, %v2829_v15  ;;  %v3073_v29 = vpack.c.bf16 %v2835_v43, %v2833_v51  ;;  %v2846_v14 = vrot.slane %v2086_v16, 2 }
 0x212   : > { %v3086_v12 = vpack.c.bf16 %v2976_v31, %v2975_v46  ;;  %v2820_v37 = vrot.slane %v2073_v18, 2  ;;  %v2825_v58 = vsel %vm2283_vm3, %v2822_v59, %v2824_v5 }
 0x213   : > { %v3063_v28 = vpack.c.bf16 %v2827_v27, %v2825_v58 }
 0x214   : > { %6932 = vmatmul.mubr.msk.bf16.gmra.mrb[72].mxu1 %vm2880_vm6, %v3038_v8  ;;  %v2821_v62 = vsel %vm2283_vm3, %v2818_v36, %v2820_v37  ;;  %v2823_v38 = vsel %vm2283_vm3, %v2820_v37, %v2822_v59  ;;  %v2083_v8 = vmul.f32 %v8618_v42, %v11545_v11  ;;  %v2842_v36 = vrot.slane %v11562_v57, 2 }
 0x215   : > { %6935 = vmatprep.mubr.msk.bf16.mxu1 %vm2880_vm6, %v3043_v39  ;;  %v3058_v19 = vpack.c.bf16 %v2823_v38, %v2821_v62  ;;  %v2838_v39 = vrot.slane %v2082_v32, 2  ;;  %v9601_v38 = vld [vmem:[%s10979_s4] ss:$0 sm:$0xff] }
 0x216   : > { %v2840_v23 = vrot.slane %v2083_v8, 2 }
 0x217   : > { %3738 = vmatmul.mubr.bf16.gmra.mrb[88].mxu0 %v3081_v50  ;;  %v2836_v50 = vrot.slane %v2081_v55, 2 }
 0x218   : > { %6285 = vmatprep.mubr.msk.bf16.mxu0 %vm9051_vm10, %v6284_v34  ;;  %v2841_v42 = vsel %vm2283_vm3, %v2838_v39, %v2840_v23  ;;  %v2843_v11 = vsel %vm2283_vm3, %v2840_v23, %v2842_v36  ;;  %v2844_v34 = vrot.slane %v2085_v47, 2 }
 0x219   : > { %v2837_v6 = vsel %vm2283_vm3, %v2834_v10, %v2836_v50  ;;  %v2839_v7 = vsel %vm2283_vm3, %v2836_v50, %v2838_v39  ;;  %v3083_v0 = vpack.c.bf16 %v2843_v11, %v2841_v42 }
 0x21a   : > { %v3078_v41 = vpack.c.bf16 %v2839_v7, %v2837_v6  ;;  %v2845_v61 = vsel %vm2283_vm3, %v2842_v36, %v2844_v34  ;;  %v2847_v21 = vsel %vm2283_vm3, %v2844_v34, %v2846_v14 }
 0x21b   : > { %v3088_v9 = vpack.c.bf16 %v2847_v21, %v2845_v61 }
 0x21c   : > { %6936 = vmatmul.mubr.msk.bf16.gmra.mrb[76].mxu1 %vm2880_vm6, %v3048_v45 }
 0x21d   : > { %6939 = vmatprep.mubr.msk.bf16.mxu1 %vm2880_vm6, %v3053_v17 }
 0x21f   : > { %3746 = vmatmul.mubr.bf16.gmra.mrb[92].mxu0 %v3086_v12 }
 0x224   : > { %6940 = vmatmul.mubr.msk.bf16.gmra.mrb[80].mxu1 %vm2880_vm6, %v3058_v19 }
 0x225   : > { %6943 = vmatprep.mubr.msk.bf16.mxu1 %vm2880_vm6, %v3063_v28 }
 0x22c   : > { %6944 = vmatmul.mubr.msk.bf16.gmra.mrb[84].mxu1 %vm2880_vm6, %v3068_v35 }
 0x22d   : > { %6947 = vmatprep.mubr.msk.bf16.mxu1 %vm2880_vm6, %v3073_v29 }
 0x234   : > { %6948 = vmatmul.mubr.msk.bf16.gmra.mrb[88].mxu1 %vm2880_vm6, %v3078_v41 }
 0x235   : > { %6951 = vmatprep.mubr.msk.bf16.mxu1 %vm2880_vm6, %v3083_v0 }
 0x23c   : > { %6952 = vmatmul.mubr.msk.bf16.gmra.mrb[92].mxu1 %vm2880_vm6, %v3088_v9 }
 0x257   : > { %v6434_v22 = vpop.f32.mrb[0].mxu1 }
 0x258   : > { %v6435_v30 = vpop.f32.mrb[1].mxu1 }
 0x259   : > { %v6436_v1 = vadd.f32 %v6435_v30, %v6434_v22  ;;  %v6437_v33 = vpop.f32.mrb[2].mxu1 }
 0x25a   : > { %v6438_v40 = vpop.f32.mrb[3].mxu1 }
 0x25b   : > { %v6439_v18 = vadd.f32 %v6438_v40, %v6437_v33  ;;  %v3467_v19 = vadd.f32 %v6436_v1, %v9601_v38 }
 0x25d   : > { %v3470_v15 = vadd.f32 %v6439_v18, %v9601_v38 }
 0x25f   : > { %v6440_v4 = vpop.f32.mrb[4].mxu1 }
 0x260   : > { %v6441_v3 = vpop.f32.mrb[5].mxu1 }
 0x261   : > { %v6442_v53 = vadd.f32 %v6441_v3, %v6440_v4  ;;  %v6443_v46 = vpop.f32.mrb[6].mxu1 }
 0x262   : > { %v6444_v56 = vpop.f32.mrb[7].mxu1 }
 0x263   : > { %v6445_v31 = vadd.f32 %v6444_v56, %v6443_v46  ;;  %v3475_v39 = vadd.f32 %v6442_v53, %v9601_v38 }
 0x265   : > { %v3478_v47 = vadd.f32 %v6445_v31, %v9601_v38 }
 0x267   : > { %v6446_v54 = vpop.f32.mrb[8].mxu1 }
 0x268   : > { %v6447_v48 = vpop.f32.mrb[9].mxu1 }
 0x269   : > { %v6448_v63 = vadd.f32 %v6447_v48, %v6446_v54  ;;  %v6449_v49 = vpop.f32.mrb[10].mxu1 }
 0x26a   : > { %v6450_v45 = vpop.f32.mrb[11].mxu1 }
 0x26b   : > { %v6451_v12 = vadd.f32 %v6450_v45, %v6449_v49  ;;  %v3483_v9 = vadd.f32 %v6448_v63, %v9601_v38 }
 0x26d   : > { %v3486_v18 = vadd.f32 %v6451_v12, %v9601_v38 }
 0x26f   : > { %v6452_v17 = vpop.f32.mrb[12].mxu1 }
 0x270   : > { %v6453_v37 = vpop.f32.mrb[13].mxu1 }
 0x271   : > { %v6454_v59 = vadd.f32 %v6453_v37, %v6452_v17  ;;  %v6455_v5 = vpop.f32.mrb[14].mxu1 }
 0x272   : > { %v6456_v52 = vpop.f32.mrb[15].mxu1 }
 0x273   : > { %v6457_v62 = vadd.f32 %v6456_v52, %v6455_v5  ;;  %v3491_v49 = vadd.f32 %v6454_v59, %v9601_v38 }
 0x275   : > { %v3494_v52 = vadd.f32 %v6457_v62, %v9601_v38 }
 0x277   : > { %v6458_v13 = vpop.f32.mrb[16].mxu1 }
 0x278   : > { %v6459_v58 = vpop.f32.mrb[17].mxu1 }
 0x279   : > { %v9603_v27 = vadd.f32 %v6459_v58, %v6458_v13  ;;  %v6461_v26 = vpop.f32.mrb[18].mxu1 }
 0x27a   : > { %v6546_v44 = vpop.f32.mrb[32].mxu0  ;;  %v6462_v60 = vpop.f32.mrb[19].mxu1 }
 0x27b   : > { %v6547_v20 = vpop.f32.mrb[33].mxu0  ;;  %v9606_v24 = vadd.f32 %v6462_v60, %v6461_v26  ;;  %v3499_v60 = vadd.f32 %v9603_v27, %v9601_v38 }
 0x27c   : > { %v6548_v28 = vadd.f32 %v6547_v20, %v6546_v44  ;;  %v6549_v2 = vpop.f32.mrb[34].mxu0 }
 0x27d   : > { %v6550_v10 = vpop.f32.mrb[35].mxu0 }
 0x27e   : > { %v6551_v25 = vadd.f32 %v6550_v10, %v6549_v2  ;;  %v9609_v55 = vadd.f32 %v6548_v28, %v3467_v19 }
 0x27f   : > { %v6464_v51 = vpop.f32.mrb[20].mxu1 }
 0x280   : > { %v9611_v32 = vadd.f32 %v6551_v25, %v3470_v15  ;;  %v6465_v8 = vpop.f32.mrb[21].mxu1 }
 0x281   : > { %v9613_v35 = vadd.f32 %v6465_v8, %v6464_v51  ;;  %v6467_v50 = vpop.f32.mrb[22].mxu1 }
 0x282   : > { %v6552_v43 = vpop.f32.mrb[36].mxu0  ;;  %v6468_v23 = vpop.f32.mrb[23].mxu1 }
 0x283   : > { %v6553_v29 = vpop.f32.mrb[37].mxu0  ;;  %v9616_v6 = vadd.f32 %v6468_v23, %v6467_v50 }
 0x284   : > { %v6554_v57 = vadd.f32 %v6553_v29, %v6552_v43  ;;  %v6555_v36 = vpop.f32.mrb[38].mxu0  ;;  %v3502_v43 = vadd.f32 %v9606_v24, %v9601_v38 }
 0x285   : > { %v6556_v7 = vpop.f32.mrb[39].mxu0 }
 0x286   : > { %v6557_v16 = vadd.f32 %v6556_v7, %v6555_v36  ;;  %v9619_v42 = vadd.f32 %v6554_v57, %v3475_v39 }
 0x287   : > { %v6470_v41 = vpop.f32.mrb[24].mxu1 }
 0x288   : > { %v9621_v11 = vadd.f32 %v6557_v16, %v3478_v47  ;;  %v6471_v34 = vpop.f32.mrb[25].mxu1  ;;  %v3507_v47 = vadd.f32 %v9613_v35, %v9601_v38 }
 0x289   : > { %v9623_v14 = vadd.f32 %v6471_v34, %v6470_v41  ;;  %v6473_v21 = vpop.f32.mrb[26].mxu1 }
 0x28a   : > { %v6558_v0 = vpop.f32.mrb[40].mxu0  ;;  %v6474_v1 = vpop.f32.mrb[27].mxu1 }
 0x28b   : > { %v6559_v61 = vpop.f32.mrb[41].mxu0  ;;  %v9626_v33 = vadd.f32 %v6474_v1, %v6473_v21 }
 0x28c   : > { %v6560_v22 = vadd.f32 %v6559_v61, %v6558_v0  ;;  %v6561_v30 = vpop.f32.mrb[42].mxu0  ;;  %v3510_v61 = vadd.f32 %v9616_v6, %v9601_v38 }
 0x28d   : > { %v6562_v40 = vpop.f32.mrb[43].mxu0 }
 0x28e   : > { %v6563_v4 = vadd.f32 %v6562_v40, %v6561_v30  ;;  %v9629_v3 = vadd.f32 %v6560_v22, %v3483_v9 }
 0x28f   : > { %v6476_v46 = vpop.f32.mrb[28].mxu1 }
 0x290   : > { %v9631_v53 = vadd.f32 %v6563_v4, %v3486_v18  ;;  %v6477_v31 = vpop.f32.mrb[29].mxu1 }
 0x291   : > { %v9633_v54 = vadd.f32 %v6477_v31, %v6476_v46  ;;  %v6479_v63 = vpop.f32.mrb[30].mxu1  ;;  %v3515_v46 = vadd.f32 %v9623_v14, %v9601_v38 }
 0x292   : > { %v6564_v56 = vpop.f32.mrb[44].mxu0  ;;  %v6480_v37 = vpop.f32.mrb[31].mxu1 }
 0x293   : > { %v6565_v48 = vpop.f32.mrb[45].mxu0  ;;  %v9636_v5 = vadd.f32 %v6480_v37, %v6479_v63  ;;  %v4174_v37 = vld [vmem:[%s10985_s10 + $0x8] sm:$0xff] }
 0x294   : > { %v6566_v45 = vadd.f32 %v6565_v48, %v6564_v56  ;;  %v6567_v17 = vpop.f32.mrb[46].mxu0  ;;  %4253 = vmatprep.mubr.f32.mxu0 %v4174_v37 }
 0x295   : > { %v6568_v12 = vpop.f32.mrb[47].mxu0 }
 0x296   : > { %v6569_v13 = vadd.f32 %v6568_v12, %v6567_v17  ;;  %v9639_v44 = vadd.f32 %v6566_v45, %v3491_v49  ;;  %v3518_v49 = vadd.f32 %v9626_v33, %v9601_v38  ;;  %v3523_v33 = vadd.f32 %v9633_v54, %v9601_v38 }
 0x297   : > { %v6482_v20 = vpop.f32.mrb[32].mxu1 }
 0x298   : > { %v9641_v58 = vadd.f32 %v6569_v13, %v3494_v52  ;;  %v6483_v19 = vpop.f32.mrb[33].mxu1 }
 0x299   : > { %v9643_v28 = vadd.f32 %v6483_v19, %v6482_v20  ;;  %v6485_v59 = vpop.f32.mrb[34].mxu1 }
 0x29a   : > { %v6570_v26 = vpop.f32.mrb[48].mxu0  ;;  %v6486_v25 = vpop.f32.mrb[35].mxu1 }
 0x29b   : > { %v6571_v2 = vpop.f32.mrb[49].mxu0  ;;  %v9647_v51 = vadd.f32 %v6486_v25, %v6485_v59  ;;  %v3526_v25 = vadd.f32 %v9636_v5, %v9601_v38 }
 0x29c   : > { %v6572_v10 = vadd.f32 %v6571_v2, %v6570_v26  ;;  %v6573_v15 = vpop.f32.mrb[50].mxu0 }
 0x29d   : > { %v6574_v62 = vpop.f32.mrb[51].mxu0 }
 0x29e   : > { %v6575_v8 = vadd.f32 %v6574_v62, %v6573_v15  ;;  %v9651_v29 = vadd.f32 %v6572_v10, %v3499_v60 }
 0x29f   : > { %v6488_v39 = vpop.f32.mrb[36].mxu1 }
 0x2a0   : > { %v9653_v50 = vadd.f32 %v6575_v8, %v3502_v43  ;;  %v6489_v36 = vpop.f32.mrb[37].mxu1 }
 0x2a1   : > { %v9655_v23 = vadd.f32 %v6489_v36, %v6488_v39  ;;  %v6491_v7 = vpop.f32.mrb[38].mxu1 }
 0x2a2   : > { %v6576_v57 = vpop.f32.mrb[52].mxu0  ;;  %v6492_v0 = vpop.f32.mrb[39].mxu1 }
 0x2a3   : > { %v6577_v27 = vpop.f32.mrb[53].mxu0  ;;  %v9659_v34 = vadd.f32 %v6492_v0, %v6491_v7 }
 0x2a4   : > { %v6578_v16 = vadd.f32 %v6577_v27, %v6576_v57  ;;  %v6579_v41 = vpop.f32.mrb[54].mxu0 }
 0x2a5   : > { %v6580_v24 = vpop.f32.mrb[55].mxu0  ;;  %v3542_v37 = vadd.f32 %v9659_v34, %v9601_v38 }
 0x2a6   : > { %v6581_v21 = vadd.f32 %v6580_v24, %v6579_v41  ;;  %v9663_v9 = vadd.f32 %v6578_v16, %v3507_v47  ;;  %v3531_v47 = vadd.f32 %v9643_v28, %v9601_v38 }
 0x2a7   : > { %v6494_v30 = vpop.f32.mrb[40].mxu1 }
 0x2a8   : > { %v9665_v22 = vadd.f32 %v6581_v21, %v3510_v61  ;;  %v6495_v40 = vpop.f32.mrb[41].mxu1  ;;  %v3534_v61 = vadd.f32 %v9647_v51, %v9601_v38 }
 0x2a9   : > { %v9667_v18 = vadd.f32 %v6495_v40, %v6494_v30  ;;  %v6497_v4 = vpop.f32.mrb[42].mxu1 }
 0x2aa   : > { %v6582_v1 = vpop.f32.mrb[56].mxu0  ;;  %v6498_v48 = vpop.f32.mrb[43].mxu1 }
 0x2ab   : > { %v6583_v35 = vpop.f32.mrb[57].mxu0  ;;  %v9671_v63 = vadd.f32 %v6498_v48, %v6497_v4 }
 0x2ac   : > { %v6584_v56 = vadd.f32 %v6583_v35, %v6582_v1  ;;  %v6585_v31 = vpop.f32.mrb[58].mxu0 }
 0x2ad   : > { %v6586_v6 = vpop.f32.mrb[59].mxu0 }
 0x2ae   : > { %v6587_v45 = vadd.f32 %v6586_v6, %v6585_v31  ;;  %v9675_v17 = vadd.f32 %v6584_v56, %v3515_v46  ;;  %v3539_v31 = vadd.f32 %v9655_v23, %v9601_v38 }
 0x2af   : > { %v6500_v14 = vpop.f32.mrb[44].mxu1 }
 0x2b0   : > { %v9680_v12 = vadd.f32 %v6587_v45, %v3518_v49  ;;  %v6501_v13 = vpop.f32.mrb[45].mxu1 }
 0x2b1   : > { %v9682_v20 = vadd.f32 %v6501_v13, %v6500_v14  ;;  %v6503_v19 = vpop.f32.mrb[46].mxu1 }
 0x2b2   : > { %v6588_v52 = vpop.f32.mrb[60].mxu0  ;;  %v6504_v60 = vpop.f32.mrb[47].mxu1 }
 0x2b3   : > { %v6589_v26 = vpop.f32.mrb[61].mxu0  ;;  %v9686_v10 = vadd.f32 %v6504_v60, %v6503_v19  ;;  %v3547_v60 = vadd.f32 %v9667_v18, %v9601_v38 }
 0x2b4   : > { %v6590_v2 = vadd.f32 %v6589_v26, %v6588_v52  ;;  %v6591_v59 = vpop.f32.mrb[62].mxu0 }
 0x2b5   : > { %v6592_v15 = vpop.f32.mrb[63].mxu0 }
 0x2b6   : > { %v6593_v62 = vadd.f32 %v6592_v15, %v6591_v59  ;;  %v9690_v43 = vadd.f32 %v6590_v2, %v3523_v33 }
 0x2b7   : > { %v6506_v39 = vpop.f32.mrb[48].mxu1 }
 0x2b8   : > { %v9692_v8 = vadd.f32 %v6593_v62, %v3526_v25  ;;  %v6507_v36 = vpop.f32.mrb[49].mxu1 }
 0x2b9   : > { %v9694_v27 = vadd.f32 %v6507_v36, %v6506_v39  ;;  %v6509_v7 = vpop.f32.mrb[50].mxu1 }
 0x2ba   : > { %v6594_v57 = vpop.f32.mrb[64].mxu0  ;;  %v6510_v0 = vpop.f32.mrb[51].mxu1 }
 0x2bb   : > { %v6595_v54 = vpop.f32.mrb[65].mxu0  ;;  %v9698_v24 = vadd.f32 %v6510_v0, %v6509_v7 }
 0x2bc   : > { %v6596_v16 = vadd.f32 %v6595_v54, %v6594_v57  ;;  %v6597_v41 = vpop.f32.mrb[66].mxu0  ;;  %v3550_v57 = vadd.f32 %v9671_v63, %v9601_v38 }
 0x2bd   : > { %v6598_v5 = vpop.f32.mrb[67].mxu0 }
 0x2be   : > { %v6599_v21 = vadd.f32 %v6598_v5, %v6597_v41  ;;  %v9702_v30 = vadd.f32 %v6596_v16, %v3531_v47 }
 0x2bf   : > { %v6512_v40 = vpop.f32.mrb[52].mxu1 }
 0x2c0   : > { %v9704_v1 = vadd.f32 %v6599_v21, %v3534_v61  ;;  %v6513_v4 = vpop.f32.mrb[53].mxu1  ;;  %v3555_v61 = vadd.f32 %v9682_v20, %v9601_v38 }
 0x2c1   : > { %v9706_v46 = vadd.f32 %v6513_v4, %v6512_v40  ;;  %v6515_v56 = vpop.f32.mrb[54].mxu1 }
 0x2c2   : > { %v6600_v35 = vpop.f32.mrb[68].mxu0  ;;  %v6516_v49 = vpop.f32.mrb[55].mxu1 }
 0x2c3   : > { %v6601_v28 = vpop.f32.mrb[69].mxu0  ;;  %v9710_v45 = vadd.f32 %v6516_v49, %v6515_v56 }
 0x2c4   : > { %v6602_v48 = vadd.f32 %v6601_v28, %v6600_v35  ;;  %v6603_v6 = vpop.f32.mrb[70].mxu0  ;;  %v3558_v28 = vadd.f32 %v9686_v10, %v9601_v38 }
 0x2c5   : > { %v6604_v51 = vpop.f32.mrb[71].mxu0 }
 0x2c6   : > { %v6605_v14 = vadd.f32 %v6604_v51, %v6603_v6  ;;  %v9714_v52 = vadd.f32 %v6602_v48, %v3539_v31 }
 0x2c7   : > { %v6518_v26 = vpop.f32.mrb[56].mxu1 }
 0x2c8   : > { %v9716_v13 = vadd.f32 %v6605_v14, %v3542_v37  ;;  %v6519_v33 = vpop.f32.mrb[57].mxu1 }
 0x2c9   : > { %v9718_v2 = vadd.f32 %v6519_v33, %v6518_v26  ;;  %v6521_v59 = vpop.f32.mrb[58].mxu1  ;;  %v11563_v33 = vld [vmem:[#allocation43_spill] sm:$0xff] }
 0x2ca   : > { %v6606_v19 = vpop.f32.mrb[72].mxu0  ;;  %v6522_v62 = vpop.f32.mrb[59].mxu1 }
 0x2cb   : > { %v6607_v23 = vpop.f32.mrb[73].mxu0  ;;  %v9722_v39 = vadd.f32 %v6522_v62, %v6521_v59  ;;  %v3566_v62 = vadd.f32 %v9698_v24, %v9601_v38 }
 0x2cc   : > { %v6608_v15 = vadd.f32 %v6607_v23, %v6606_v19  ;;  %v6609_v25 = vpop.f32.mrb[74].mxu0  ;;  %v3563_v19 = vadd.f32 %v9694_v27, %v9601_v38  ;;  %v11564_v23 = vmax.f32 %v11563_v33, 0.0 }
 0x2cd   : > { %v6610_v34 = vpop.f32.mrb[75].mxu0 }
 0x2ce   : > { %v6611_v36 = vadd.f32 %v6610_v34, %v6609_v25  ;;  %v9726_v54 = vadd.f32 %v6608_v15, %v3547_v60 }
 0x2cf   : > { %v6524_v47 = vpop.f32.mrb[60].mxu1 }
 0x2d0   : > { %v9728_v7 = vadd.f32 %v6611_v36, %v3550_v57  ;;  %v6525_v41 = vpop.f32.mrb[61].mxu1 }
 0x2d1   : > { %v9730_v0 = vadd.f32 %v6525_v41, %v6524_v47  ;;  %v6527_v5 = vpop.f32.mrb[62].mxu1 }
 0x2d2   : > { %v6612_v16 = vpop.f32.mrb[76].mxu0  ;;  %v6528_v35 = vpop.f32.mrb[63].mxu1 }
 0x2d3   : > { %v6613_v18 = vpop.f32.mrb[77].mxu0  ;;  %v9734_v4 = vadd.f32 %v6528_v35, %v6527_v5 }
 0x2d4   : > { %v6614_v21 = vadd.f32 %v6613_v18, %v6612_v16  ;;  %v6615_v40 = vpop.f32.mrb[78].mxu0  ;;  %v11567_v16 = vld [vmem:[#allocation46_spill] sm:$0xff] }
 0x2d5   : > { %v6616_v63 = vpop.f32.mrb[79].mxu0  ;;  %v11568_v27 = vmax.f32 %v11567_v16, 0.0 }
 0x2d6   : > { %v6617_v56 = vadd.f32 %v6616_v63, %v6615_v40  ;;  %v9738_v31 = vadd.f32 %v6614_v21, %v3555_v61  ;;  %v11569_v21 = vld [vmem:[#allocation49_spill] sm:$0xff] }
 0x2d7   : > { %v6925_v6 = vpop.f32.mrb[64].mxu1 }
 0x2d8   : > { %v9740_v48 = vadd.f32 %v6617_v56, %v3558_v28  ;;  %v3797_v51 = vadd.f32 %v6925_v6, %v9619_v42  ;;  %v3788_v37 = vpop.f32.mrb[65].mxu1  ;;  %v11565_v42 = vld [vmem:[#allocation44_spill] sm:$0xff]  ;;  %v3571_v56 = vadd.f32 %v9706_v46, %v9601_v38 }
 0x2d9   : > { %v3789_v14 = vadd.f32 %v3788_v37, %v9609_v55  ;;  %v6926_v26 = vpop.f32.mrb[66].mxu1  ;;  %v11566_v34 = vmax.f32 %v11565_v42, 0.0 }
 0x2da   : > { %v6618_v49 = vpop.f32.mrb[80].mxu0  ;;  %v3917_v10 = vadd.f32 %v3797_v51, %v11564_v23  ;;  %v3800_v15 = vadd.f32 %v6926_v26, %v9621_v11  ;;  %v3791_v25 = vpop.f32.mrb[67].mxu1  ;;  %v11570_v11 = vmax.f32 %v11569_v21, 0.0 }
 0x2db   : > { %v6619_v20 = vpop.f32.mrb[81].mxu0  ;;  %v3915_v57 = vadd.f32 %v3789_v14, %v11566_v34  ;;  %v3792_v55 = vadd.f32 %v3791_v25, %v9611_v32 }
 0x2dc   : > { %v6620_v59 = vadd.f32 %v6619_v20, %v6618_v49  ;;  %v6621_v60 = vpop.f32.mrb[82].mxu0  ;;  %v3949_v47 = vmax.f32 %v3917_v10, 0.0  ;;  %v3918_v41 = vadd.f32 %v3800_v15, %v11568_v27  ;;  %v3574_v20 = vadd.f32 %v9710_v45, %v9601_v38 }
 0x2dd   : > { %v6622_v36 = vpop.f32.mrb[83].mxu0  ;;  %v3947_v61 = vmax.f32 %v3915_v57, 0.0  ;;  %v3916_v40 = vadd.f32 %v3792_v55, %v11570_v11  ;;  %v11573_v57 = vld [vmem:[#allocation61_spill] sm:$0xff] }
 0x2de   : > { %v6623_v18 = vadd.f32 %v6622_v36, %v6621_v60  ;;  %v9756_v5 = vadd.f32 %v6620_v59, %v3563_v19  ;;  %v3950_v35 = vmax.f32 %v3918_v41, 0.0  ;;  %v4014_v32 = vrot.slane %v3949_v47, 1  ;;  %v11571_v59 = vld [vmem:[#allocation57_spill] sm:$0xff] }
 0x2df   : > { %v3948_v24 = vmax.f32 %v3916_v40, 0.0  ;;  %v6929_v28 = vpop.f32.mrb[68].mxu1  ;;  %v4011_v14 = vrot.slane %v3947_v61, 1  ;;  %v11572_v60 = vmax.f32 %v11571_v59, 0.0  ;;  %v11574_v36 = vmax.f32 %v11573_v57, 0.0 }
 0x2e0   : > { %v9760_v63 = vadd.f32 %v6623_v18, %v3566_v62  ;;  %v4016_v6 = vrot.slane %v3950_v35, 1  ;;  %v3813_v51 = vadd.f32 %v6929_v28, %v9639_v44  ;;  %v3804_v37 = vpop.f32.mrb[69].mxu1  ;;  %v11575_v18 = vld [vmem:[#allocation63_spill] sm:$0xff] }
 0x2e1   : > { %v4012_v26 = vrot.slane %v3948_v24, 1  ;;  %v3805_v33 = vadd.f32 %v3804_v37, %v9629_v3  ;;  %v6930_v23 = vpop.f32.mrb[70].mxu1  ;;  %v11576_v21 = vmax.f32 %v11575_v18, 0.0  ;;  %v11577_v37 = vld [vmem:[#allocation64_spill] sm:$0xff] }
 0x2e2   : > { %v6624_v49 = vpop.f32.mrb[84].mxu0  ;;  %v4017_v10 = vsel %vm2089_vm15, %v4014_v32, %v4016_v6  ;;  %v3921_v46 = vadd.f32 %v3813_v51, %v11572_v60  ;;  %v3816_v62 = vadd.f32 %v6930_v23, %v9641_v58  ;;  %v3807_v44 = vpop.f32.mrb[71].mxu1 }
 0x2e3   : > { %v6625_v19 = vpop.f32.mrb[85].mxu0  ;;  %v9772_v42 = vmax.f32 %v3949_v47, %v4017_v10  ;;  %v4013_v45 = vsel %vm2089_vm15, %v4011_v14, %v4012_v26  ;;  %v4015_v34 = vsel %vm2089_vm15, %v4012_v26, %v4014_v32  ;;  %v3919_v3 = vadd.f32 %v3805_v33, %v11574_v36 }
 0x2e4   : > { %v6626_v15 = vadd.f32 %v6625_v19, %v6624_v49  ;;  %v6627_v25 = vpop.f32.mrb[86].mxu0  ;;  %v9778_v16 = vmax.f32 %v3947_v61, %v4013_v45  ;;  %v9780_v27 = vmax.f32 %v3948_v24, %v4015_v34  ;;  %v3953_v41 = vmax.f32 %v3921_v46, 0.0 }
 0x2e5   : > { %v6628_v55 = vpop.f32.mrb[87].mxu0  ;;  %v9784_v11 = vadd.f32 %v3816_v62, %v11576_v21  ;;  %v3951_v58 = vmax.f32 %v3919_v3, 0.0  ;;  %v3808_v40 = vadd.f32 %v3807_v44, %v9631_v53  ;;  %v3579_v32 = vadd.f32 %v9718_v2, %v9601_v38  ;;  %v11579_v44 = vld [vmem:[#allocation69_spill] sm:$0xff] }
 0x2e6   : > { %v6629_v47 = vadd.f32 %v6628_v55, %v6627_v25  ;;  %v9787_v28 = vadd.f32 %v6626_v15, %v3571_v56  ;;  %v4141_v61 = vmax.f32 %v9778_v16, %v9772_v42  ;;  %v3582_v24 = vadd.f32 %v9722_v39, %v9601_v38 }
 0x2e7   : > { %v3954_v49 = vmax.f32 %v9784_v11, 0.0  ;;  %v4018_v51 = vrot.slane %v3951_v58, 1  ;;  %v11578_v14 = vmax.f32 %v11577_v37, 0.0  ;;  %v6933_v19 = vpop.f32.mrb[72].mxu1  ;;  %v9802_v53 = vadd.f32 %v9730_v0, %v9601_v38 }
 0x2e8   : > { %v9798_v33 = vadd.f32 %v6629_v47, %v3574_v20  ;;  %v4022_v2 = vrot.slane %v3953_v41, 1  ;;  %v3829_v10 = vadd.f32 %v6933_v19, %v9663_v9  ;;  %v3820_v59 = vpop.f32.mrb[73].mxu1  ;;  %v9807_v39 = vadd.f32 %v9734_v4, %v9601_v38  ;;  %v11581_v4 = vld [vmem:[#allocation70_spill] sm:$0xff] }
 0x2e9   : > { %v3920_v26 = vadd.f32 %v3808_v40, %v11578_v14  ;;  %v4024_v56 = vrot.slane %v3954_v49, 1  ;;  %v4019_v60 = vsel %vm2089_vm15, %v4016_v6, %v4018_v51  ;;  %v3821_v20 = vadd.f32 %v3820_v59, %v9651_v29  ;;  %v6934_v25 = vpop.f32.mrb[74].mxu1 }
 0x2ea   : > { %v6630_v23 = vpop.f32.mrb[88].mxu0  ;;  %v9812_v62 = vmax.f32 %v3950_v35, %v4019_v60  ;;  %v11580_v45 = vmax.f32 %v11579_v44, 0.0  ;;  %v3823_v36 = vpop.f32.mrb[75].mxu1  ;;  %v11582_v6 = vmax.f32 %v11581_v4, 0.0  ;;  %v3832_v16 = vadd.f32 %v6934_v25, %v9665_v22 }
 0x2eb   : > { %v3952_v46 = vmax.f32 %v3920_v26, 0.0  ;;  %v6631_v15 = vpop.f32.mrb[89].mxu0  ;;  %v4025_v0 = vsel %vm2089_vm15, %v4022_v2, %v4024_v56  ;;  %v3824_v35 = vadd.f32 %v3823_v36, %v9653_v50 }
 0x2ec   : > { %v3925_v34 = vadd.f32 %v3829_v10, %v11580_v45  ;;  %v6632_v9 = vadd.f32 %v6631_v15, %v6630_v23  ;;  %v6633_v57 = vpop.f32.mrb[90].mxu0  ;;  %v9816_v3 = vmax.f32 %v3953_v41, %v4025_v0  ;;  %v3923_v55 = vadd.f32 %v3821_v20, %v11582_v6  ;;  %v11583_v41 = vld [vmem:[#allocation71_spill] sm:$0xff]  ;;  %v11585_v10 = vld [vmem:[#allocation73_spill] sm:$0xff] }
 0x2ed   : > { %v4020_v38 = vrot.slane %v3952_v46, 1  ;;  %v6634_v29 = vpop.f32.mrb[91].mxu0  ;;  %v11584_v14 = vmax.f32 %v11583_v41, 0.0  ;;  %v11586_v59 = vmax.f32 %v11585_v10, 0.0 }
 0x2ee   : > { %v3957_v18 = vmax.f32 %v3925_v34, 0.0  ;;  %v6635_v21 = vadd.f32 %v6634_v29, %v6633_v57  ;;  %v9822_v11 = vadd.f32 %v6632_v9, %v3579_v32  ;;  %v3955_v37 = vmax.f32 %v3923_v55, 0.0  ;;  %v11589_v29 = vld [vmem:[#allocation82_spill] sm:$0xff] }
 0x2ef   : > { %v4021_v47 = vsel %vm2089_vm15, %v4018_v51, %v4020_v38  ;;  %v4023_v40 = vsel %vm2089_vm15, %v4020_v38, %v4022_v2  ;;  %v3926_v26 = vadd.f32 %v3832_v16, %v11584_v14  ;;  %v3924_v60 = vadd.f32 %v3824_v35, %v11586_v59  ;;  %v6937_v32 = vpop.f32.mrb[76].mxu1  ;;  %v11591_v59 = vld [vmem:[#allocation83_spill] sm:$0xff] }
 0x2f0   : > { %v9828_v19 = vmax.f32 %v3951_v58, %v4021_v47  ;;  %v9830_v23 = vmax.f32 %v3952_v46, %v4023_v40  ;;  %v4030_v22 = vrot.slane %v3957_v18, 1  ;;  %v4026_v15 = vrot.slane %v3955_v37, 1  ;;  %v3836_v0 = vpop.f32.mrb[77].mxu1 }
 0x2f1   : > { %v3958_v50 = vmax.f32 %v3926_v26, 0.0  ;;  %v4142_v51 = vmax.f32 %v9780_v27, %v9812_v62  ;;  %v9836_v20 = vadd.f32 %v6635_v21, %v3582_v24  ;;  %v3956_v25 = vmax.f32 %v3924_v60, 0.0  ;;  %v6938_v27 = vpop.f32.mrb[78].mxu1 }
 0x2f2   : > { %v4144_v2 = vmax.f32 %v9812_v62, %v9830_v23  ;;  %v6636_v58 = vpop.f32.mrb[92].mxu0  ;;  %v3845_v46 = vadd.f32 %v6937_v32, %v9690_v43  ;;  %v4143_v44 = vmax.f32 %v9772_v42, %v9828_v19  ;;  %v4027_v45 = vsel %vm2089_vm15, %v4024_v56, %v4026_v15  ;;  %v11587_v62 = vld [vmem:[#allocation78_spill] sm:$0xff]  ;;  %v3839_v16 = vpop.f32.mrb[79].mxu1 }
 0x2f3   : > { %v4032_v34 = vrot.slane %v3958_v50, 1  ;;  %v6637_v9 = vpop.f32.mrb[93].mxu0  ;;  %v3837_v57 = vadd.f32 %v3836_v0, %v9675_v17  ;;  %v9845_v24 = vpack.c.bf16 %v4142_v51, %v4141_v61  ;;  %v4028_v36 = vrot.slane %v3956_v25, 1 }
 0x2f4   : > { %v9847_v38 = vmax.f32 %v3954_v49, %v4027_v45  ;;  %v11588_v4 = vmax.f32 %v11587_v62, 0.0  ;;  %v6638_v43 = vadd.f32 %v6637_v9, %v6636_v58  ;;  %v6639_v55 = vpop.f32.mrb[94].mxu0  ;;  %v11590_v56 = vmax.f32 %v11589_v29, 0.0 }
 0x2f5   : > { %v4033_v42 = vsel %vm2089_vm15, %v4030_v22, %v4032_v34  ;;  %v3848_v35 = vadd.f32 %v6938_v27, %v9692_v8  ;;  %v6640_v17 = vpop.f32.mrb[95].mxu0  ;;  %v3840_v61 = vadd.f32 %v3839_v16, %v9680_v12  ;;  %v4029_v49 = vsel %vm2089_vm15, %v4026_v15, %v4028_v36 }
 0x2f6   : > { %v3929_v6 = vadd.f32 %v3845_v46, %v11588_v4  ;;  %v3927_v21 = vadd.f32 %v3837_v57, %v11590_v56  ;;  %v9856_v47 = vmax.f32 %v3957_v18, %v4033_v42  ;;  %v4031_v40 = vsel %vm2089_vm15, %v4028_v36, %v4030_v22  ;;  %v11593_v46 = vld [vmem:[#allocation85_spill] sm:$0xff] }
 0x2f7   : > { %v4115_v14 = vmax.f32 %v3955_v37, %v4029_v49  ;;  %v4116_v26 = vmax.f32 %v3956_v25, %v4031_v40  ;;  %v11592_v60 = vmax.f32 %v11591_v59, 0.0  ;;  %v6641_v58 = vadd.f32 %v6640_v17, %v6639_v55  ;;  %v6941_v22 = vpop.f32.mrb[80].mxu1  ;;  %v11595_v55 = vld [vmem:[#allocation91_spill] sm:$0xff]  ;;  %v11599_v49 = vld [vmem:[#allocation96_spill] sm:$0xff] }
 0x2f8   : > { %v3961_v41 = vmax.f32 %v3929_v6, 0.0  ;;  %v3959_v10 = vmax.f32 %v3927_v21, 0.0  ;;  %v11594_v8 = vmax.f32 %v11593_v46, 0.0  ;;  %v9865_v12 = vadd.f32 %v6638_v43, %v9802_v53  ;;  %v3852_v57 = vpop.f32.mrb[81].mxu1 }
 0x2f9   : > { %v3930_v32 = vadd.f32 %v3848_v35, %v11592_v60  ;;  %v4148_v18 = vmax.f32 %v9847_v38, %v4116_v26  ;;  %v9868_v9 = vpack.c.bf16 %v4144_v2, %v4143_v44  ;;  %v3861_v25 = vadd.f32 %v6941_v22, %v9714_v52  ;;  %v6942_v6 = vpop.f32.mrb[82].mxu1 }
 0x2fa   : > { %v4038_v51 = vrot.slane %v3961_v41, 1  ;;  %v3928_v0 = vadd.f32 %v3840_v61, %v11594_v8  ;;  %v4034_v15 = vrot.slane %v3959_v10, 1  ;;  %v9872_v27 = vadd.f32 %v6641_v58, %v9807_v39  ;;  %v3855_v42 = vpop.f32.mrb[83].mxu1 }
 0x2fb   : > { %v3962_v45 = vmax.f32 %v3930_v32, 0.0  ;;  %v4145_v36 = vmax.f32 %v9828_v19, %v9816_v3  ;;  %v3853_v4 = vadd.f32 %v3852_v57, %v9702_v30  ;;  %v4146_v2 = vmax.f32 %v9830_v23, %v9847_v38  ;;  %v11597_v19 = vld [vmem:[#allocation94_spill] sm:$0xff] }
 0x2fc   : > { %v3960_v37 = vmax.f32 %v3928_v0, 0.0  ;;  %v4035_v53 = vsel %vm2089_vm15, %v4032_v34, %v4034_v15  ;;  %v11596_v52 = vmax.f32 %v11595_v55, 0.0  ;;  %v3864_v39 = vadd.f32 %v6942_v6, %v9716_v13  ;;  %v11601_v32 = vld [vmem:[#allocation98_spill] sm:$0xff] }
 0x2fd   : > { %v4040_v62 = vrot.slane %v3962_v45, 1  ;;  %v4118_v43 = vmax.f32 %v3958_v50, %v4035_v53  ;;  %v11598_v56 = vmax.f32 %v11597_v19, 0.0  ;;  %v3856_v21 = vadd.f32 %v3855_v42, %v9704_v1 }
 0x2fe   : > { %v4036_v44 = vrot.slane %v3960_v37, 1  ;;  %v3933_v16 = vadd.f32 %v3861_v25, %v11596_v52  ;;  %v9887_v30 = vpack.c.bf16 %v4146_v2, %v4145_v36  ;;  %v11600_v40 = vmax.f32 %v11599_v49, 0.0  ;;  %v11605_v52 = vld [vmem:[#allocation105_spill] sm:$0xff] }
 0x2ff   : > { %v4041_v29 = vsel %vm2089_vm15, %v4038_v51, %v4040_v62  ;;  %v3931_v34 = vadd.f32 %v3853_v4, %v11598_v56  ;;  %v11602_v58 = vmax.f32 %v11601_v32, 0.0  ;;  %v4147_v1 = vmax.f32 %v9816_v3, %v4115_v14  ;;  %v6945_v22 = vpop.f32.mrb[84].mxu1 }
 0x300   : > { %v9889_v35 = vmax.f32 %v3961_v41, %v4041_v29  ;;  %v4037_v23 = vsel %vm2089_vm15, %v4034_v15, %v4036_v44  ;;  %v4039_v50 = vsel %vm2089_vm15, %v4036_v44, %v4038_v51  ;;  %v3965_v38 = vmax.f32 %v3933_v16, 0.0 }
 0x301   : > { %v4119_v17 = vmax.f32 %v3959_v10, %v4037_v23  ;;  %v4120_v61 = vmax.f32 %v3960_v37, %v4039_v50  ;;  %v3963_v13 = vmax.f32 %v3931_v34, 0.0  ;;  %v3934_v59 = vadd.f32 %v3864_v39, %v11600_v40  ;;  %v3868_v37 = vpop.f32.mrb[85].mxu1  ;;  %v11609_v23 = vld [vmem:[#allocation110_spill] sm:$0xff] }
 0x302   : > { %v4046_v60 = vrot.slane %v3965_v38, 1  ;;  %v3932_v46 = vadd.f32 %v3856_v21, %v11602_v58  ;;  %v4149_v41 = vmax.f32 %v4115_v14, %v9856_v47  ;;  %v4150_v51 = vmax.f32 %v4116_v26, %v4118_v43  ;;  %v6946_v6 = vpop.f32.mrb[86].mxu1  ;;  %v11603_v26 = vld [vmem:[#allocation102_spill] sm:$0xff] }
 0x303   : > { %v4152_v8 = vmax.f32 %v4118_v43, %v4120_v61  ;;  %v4042_v0 = vrot.slane %v3963_v13, 1  ;;  %v3966_v15 = vmax.f32 %v3934_v59, 0.0  ;;  %v3877_v10 = vadd.f32 %v6945_v22, %v9738_v31 }
 0x304   : > { %v3964_v25 = vmax.f32 %v3932_v46, 0.0  ;;  %v9900_v57 = vpack.c.bf16 %v4148_v18, %v4147_v1  ;;  %v4151_v36 = vmax.f32 %v9856_v47, %v4119_v17  ;;  %v3869_v3 = vadd.f32 %v3868_v37, %v9726_v54  ;;  %v3871_v18 = vpop.f32.mrb[87].mxu1 }
 0x305   : > { %v4043_v53 = vsel %vm2089_vm15, %v4040_v62, %v4042_v0  ;;  %v4048_v4 = vrot.slane %v3966_v15, 1  ;;  %v9905_v14 = vpack.c.bf16 %v4150_v51, %v4149_v41  ;;  %v11604_v43 = vmax.f32 %v11603_v26, 0.0 }
 0x306   : > { %v4044_v2 = vrot.slane %v3964_v25, 1  ;;  %v9907_v44 = vmax.f32 %v3962_v45, %v4043_v53  ;;  %v3880_v31 = vadd.f32 %v6946_v6, %v9740_v48  ;;  %v11606_v16 = vmax.f32 %v11605_v52, 0.0  ;;  %v11607_v45 = vld [vmem:[#allocation107_spill] sm:$0xff]  ;;  %v11611_v53 = vld [vmem:[#allocation114_spill] sm:$0xff]  ;;  %v11615_v52 = vld [vmem:[#allocation116_spill] sm:$0xff] }
 0x307   : > { %v3937_v55 = vadd.f32 %v3877_v10, %v11604_v43  ;;  %v3872_v62 = vadd.f32 %v3871_v18, %v9728_v7  ;;  %v4049_v39 = vsel %vm2089_vm15, %v4046_v60, %v4048_v4  ;;  %v9916_v54 = vpack.c.bf16 %v4152_v8, %v4151_v36  ;;  %v6949_v41 = vpop.f32.mrb[88].mxu1 }
 0x308   : > { %v3935_v47 = vadd.f32 %v3869_v3, %v11606_v16  ;;  %v4047_v42 = vsel %vm2089_vm15, %v4044_v2, %v4046_v60  ;;  %v11608_v19 = vmax.f32 %v11607_v45, 0.0  ;;  %v4045_v34 = vsel %vm2089_vm15, %v4042_v0, %v4044_v2  ;;  %v3884_v51 = vpop.f32.mrb[89].mxu1 }
 0x309   : > { %v3969_v29 = vmax.f32 %v3937_v55, 0.0  ;;  %v4124_v48 = vmax.f32 %v3964_v25, %v4047_v42  ;;  %v11610_v50 = vmax.f32 %v11609_v23, 0.0  ;;  %v4123_v40 = vmax.f32 %v3963_v13, %v4045_v34 }
 0x30a   : > { %v9921_v56 = vadd.f32 %v3880_v31, %v11608_v19  ;;  %v3967_v21 = vmax.f32 %v3935_v47, 0.0  ;;  %v4125_v32 = vmax.f32 %v3965_v38, %v4049_v39  ;;  %v4153_v58 = vmax.f32 %v4119_v17, %v9889_v35  ;;  %v6950_v38 = vpop.f32.mrb[90].mxu1  ;;  %v11617_v39 = vld [vmem:[#allocation117_spill] sm:$0xff] }
 0x30b   : > { %v3936_v49 = vadd.f32 %v3872_v62, %v11610_v50  ;;  %v4054_v7 = vrot.slane %v3969_v29, 1  ;;  %v4156_v60 = vmax.f32 %v9907_v44, %v4124_v48  ;;  %v4154_v8 = vmax.f32 %v4120_v61, %v9907_v44  ;;  %v3887_v2 = vpop.f32.mrb[91].mxu1 }
 0x30c   : > { %v3970_v59 = vmax.f32 %v9921_v56, 0.0  ;;  %v4050_v46 = vrot.slane %v3967_v21, 1  ;;  %v3893_v22 = vadd.f32 %v6949_v41, %v9787_v28  ;;  %v4157_v25 = vmax.f32 %v4123_v40, %v4125_v32 }
 0x30d   : > { %v3968_v1 = vmax.f32 %v3936_v49, 0.0  ;;  %v4155_v13 = vmax.f32 %v9889_v35, %v4123_v40  ;;  %v3885_v37 = vadd.f32 %v3884_v51, %v9756_v5  ;;  %v9934_v36 = vpack.c.bf16 %v4154_v8, %v4153_v58  ;;  %v11613_v35 = vld [vmem:[#allocation115_spill] sm:$0xff] }
 0x30e   : > { %v4056_v0 = vrot.slane %v3970_v59, 1  ;;  %v4051_v17 = vsel %vm2089_vm15, %v4048_v4, %v4050_v46  ;;  %v11612_v3 = vmax.f32 %v11611_v53, 0.0  ;;  %v3896_v61 = vadd.f32 %v6950_v38, %v9798_v33 }
 0x30f   : > { %v4052_v10 = vrot.slane %v3968_v1, 1  ;;  %v4126_v44 = vmax.f32 %v3966_v15, %v4051_v17  ;;  %v11614_v43 = vmax.f32 %v11613_v35, 0.0  ;;  %v3888_v5 = vadd.f32 %v3887_v2, %v9760_v63  ;;  %v6953_v63 = vpop.f32.mrb[92].mxu1 }
 0x310   : > { %v3941_v6 = vadd.f32 %v3893_v22, %v11612_v3  ;;  %v4057_v28 = vsel %vm2089_vm15, %v4054_v7, %v4056_v0  ;;  %v11616_v16 = vmax.f32 %v11615_v52, 0.0  ;;  %v11618_v15 = vmax.f32 %v11617_v39, 0.0  ;;  %v3900_v41 = vpop.f32.mrb[93].mxu1 }
 0x311   : > { %v4055_v26 = vsel %vm2089_vm15, %v4052_v10, %v4054_v7  ;;  %v3939_v55 = vadd.f32 %v3885_v37, %v11614_v43  ;;  %v4053_v4 = vsel %vm2089_vm15, %v4050_v46, %v4052_v10  ;;  %v4158_v62 = vmax.f32 %v4124_v48, %v4126_v44 }
 0x312   : > { %v4128_v31 = vmax.f32 %v3968_v1, %v4055_v26  ;;  %v3973_v18 = vmax.f32 %v3941_v6, 0.0  ;;  %v3942_v47 = vadd.f32 %v3896_v61, %v11616_v16  ;;  %v3940_v42 = vadd.f32 %v3888_v5, %v11618_v15  ;;  %v11623_v61 = vld [vmem:[#allocation124_spill] sm:$0xff] }
 0x313   : > { %v3971_v33 = vmax.f32 %v3939_v55, 0.0  ;;  %v4127_v45 = vmax.f32 %v3967_v21, %v4053_v4  ;;  %v4129_v19 = vmax.f32 %v3969_v29, %v4057_v28  ;;  %v7034_v34 = vpack.c.bf16 %v4158_v62, %v4157_v25  ;;  %v6954_v29 = vpop.f32.mrb[94].mxu1  ;;  %v11619_v25 = vld [vmem:[#allocation121_spill] sm:$0xff] }
 0x314   : > { %v3974_v56 = vmax.f32 %v3942_v47, 0.0  ;;  %v4160_v23 = vmax.f32 %v4126_v44, %v4128_v31  ;;  %v3972_v49 = vmax.f32 %v3940_v42, 0.0  ;;  %v4062_v58 = vrot.slane %v3973_v18, 1  ;;  %v3903_v38 = vpop.f32.mrb[95].mxu1 }
 0x315   : > { %v4058_v50 = vrot.slane %v3971_v33, 1  ;;  %v4159_v40 = vmax.f32 %v4125_v32, %v4127_v45  ;;  %v4161_v7 = vmax.f32 %v4127_v45, %v4129_v19  ;;  %v3909_v1 = vadd.f32 %v6953_v63, %v9865_v12  ;;  %7035 = vmatprep.subr.bf16.mxu0 %v7034_v34  ;;  %v11627_v34 = vld [vmem:[#allocation18_spill] sm:$0xff] }
 0x316   : > { %v4064_v46 = vrot.slane %v3974_v56, 1  ;;  %v9950_v48 = vpack.c.bf16 %v4156_v60, %v4155_v13  ;;  %v4060_v8 = vrot.slane %v3972_v49, 1  ;;  %v3901_v21 = vadd.f32 %v3900_v41, %v9822_v11  ;;  %7037 = vmatpush3.bf16.msra.mxu0 %v9845_v24  ;;  %v11621_v13 = vld [vmem:[#allocation123_spill] sm:$0xff] }
 0x317   : > { %v7038_v22 = vpack.c.bf16 %v4160_v23, %v4159_v40  ;;  %v4059_v51 = vsel %vm2089_vm15, %v4056_v0, %v4058_v50  ;;  %v11620_v32 = vmax.f32 %v11619_v25, 0.0  ;;  %v3912_v37 = vadd.f32 %v6954_v29, %v9872_v27  ;;  %v4176_v25 = vld [vmem:[%s10985_s10 + $0x18] sm:$0xff] }
 0x318   : > { %v4130_v12 = vmax.f32 %v3970_v59, %v4059_v51  ;;  %v4065_v17 = vsel %vm2089_vm15, %v4062_v58, %v4064_v46  ;;  %v4063_v60 = vsel %vm2089_vm15, %v4060_v8, %v4062_v58  ;;  %v11622_v53 = vmax.f32 %v11621_v13, 0.0  ;;  %v11625_v59 = vld [vmem:[#allocation125_spill] sm:$0xff] }
 0x319   : > { %v3945_v10 = vadd.f32 %v3909_v1, %v11620_v32  ;;  %v3904_v3 = vadd.f32 %v3903_v38, %v9836_v20  ;;  %7039 = vmatprep.subr.bf16.mxu0 %v7038_v22  ;;  %v4061_v24 = vsel %vm2089_vm15, %v4058_v50, %v4060_v8  ;;  %v4132_v0 = vmax.f32 %v3972_v49, %v4063_v60  ;;  %v4179_v32 = vld [vmem:[%s10985_s10 + $0x30] sm:$0xff]  ;;  %v4184_v38 = vld [vmem:[%s10985_s10 + $0x58] sm:$0xff]  ;;  %v4185_v60 = vld [vmem:[%s10985_s10 + $0x60] sm:$0xff] }
 0x31a   : > { %v3943_v11 = vadd.f32 %v3901_v21, %v11622_v53  ;;  %v11624_v2 = vmax.f32 %v11623_v61, 0.0  ;;  %v4162_v27 = vmax.f32 %v4128_v31, %v4130_v12  ;;  %v11626_v26 = vmax.f32 %v11625_v59, 0.0  ;;  %7041 = vmatpush3.bf16.msra.mxu0 %v9868_v9  ;;  %v4188_v13 = vld [vmem:[%s10985_s10 + $0x78] sm:$0xff]  ;;  %v4187_v53 = vld [vmem:[%s10985_s10 + $0x70] sm:$0xff] }
 0x31b   : > { %v3977_v6 = vmax.f32 %v3945_v10, 0.0  ;;  %v4131_v43 = vmax.f32 %v3971_v33, %v4061_v24  ;;  %v4133_v55 = vmax.f32 %v3973_v18, %v4065_v17  ;;  %v4164_v20 = vmax.f32 %v4130_v12, %v4132_v0  ;;  %v4182_v10 = vld [vmem:[%s10985_s10 + $0x48] sm:$0xff]  ;;  %v4183_v12 = vld [vmem:[%s10985_s10 + $0x50] sm:$0xff]  ;;  %v7517_v59 = vld [vmem:[%s10980_s5 + $0x58] sm:$0xff]  }
 0x31c   : > { %v3946_v44 = vadd.f32 %v3912_v37, %v11624_v2  ;;  %v3975_v28 = vmax.f32 %v3943_v11, 0.0  ;;  %v3944_v35 = vadd.f32 %v3904_v3, %v11626_v26  ;;  %v7042_v4 = vpack.c.bf16 %v4162_v27, %v4161_v7  ;;  %v4181_v37 = vld [vmem:[%s10985_s10 + $0x40] sm:$0xff]  ;;  %v4186_v17 = vld [vmem:[%s10985_s10 + $0x68] sm:$0xff]  ;;  %v7515_v61 = vld [vmem:[%s10980_s5 + $0x50] sm:$0xff]  }
 0x31d   : > { %v4163_v47 = vmax.f32 %v4129_v19, %v4131_v43  ;;  %v4165_v62 = vmax.f32 %v4131_v43, %v4133_v55  ;;  %v4070_v39 = vrot.slane %v3977_v6, 1  ;;  %v9972_v9 = vmax.f32 %v11627_v34, 0.0  ;;  %v7511_v11 = vld [vmem:[%s10980_s5 + $0x40] sm:$0xff]   ;;  %v7513_v24 = vld [vmem:[%s10980_s5 + $0x48] sm:$0xff]   ;;  %v7518_v26 = vld [vmem:[%s10980_s5 + $0x18] sm:$0xff]  }
 0x31e   : > { %v3978_v5 = vmax.f32 %v3946_v44, 0.0  ;;  %v4066_v52 = vrot.slane %v3975_v28, 1  ;;  %v3976_v16 = vmax.f32 %v3944_v35, 0.0  ;;  %7043 = vmatprep.subr.bf16.mxu0 %v7042_v4  ;;  %v7512_v3 = vld [vmem:[%s10980_s5] sm:$0xff]   ;;  %6718 = vmatprep.subr.bf16.mxu1 %v7511_v11  ;;  %v7525_v44 = vld [vmem:[%s10980_s5 + $0xc8] sm:$0xff]   ;;  %v7526_v4 = vld [vmem:[%s10980_s5 + $0x70] sm:$0xff]  }
 0x31f   : > { %7045 = vmatpush3.bf16.msra.mxu0 %v9887_v30  ;;  %v7046_v31 = vpack.c.bf16 %v4164_v20, %v4163_v47  ;;  %11628 = vst [vmem:[#allocation15_spill] sm:$0xff] %v9972_v9  ;;  %6719 = vmatpush3.bf16.msra.mxu1 %v7512_v3  ;;  %v7523_v2 = vld [vmem:[%s10980_s5 + $0x80] sm:$0xff]   ;;  %v7527_v27 = vld [vmem:[%s10980_s5 + $0x88] sm:$0xff]   ;;  %v7528_v20 = vld [vmem:[%s10980_s5 + $0x30] sm:$0xff]  }
 0x320   : > { %v4072_v15 = vrot.slane %v3978_v5, 1  ;;  %v4068_v42 = vrot.slane %v3976_v16, 1  ;;  %v4067_v45 = vsel %vm2089_vm15, %v4064_v46, %v4066_v52  ;;  %6720 = vmatprep.subr.bf16.mxu1 %v7513_v24  ;;  %v7519_v35 = vld [vmem:[%s10980_s5 + $0x60] sm:$0xff]   ;;  %v11630_v47 = vld [vmem:[#allocation8_spill] sm:$0xff] }
 0x321   : > { %v4134_v33 = vmax.f32 %v3974_v56, %v4067_v45  ;;  %7047 = vmatprep.subr.bf16.mxu0 %v7046_v31  ;;  %v7520_v43 = vld [vmem:[%s10980_s5 + $0x20] sm:$0xff]  }
 0x322   : > { %v4074_v18 = vsel %vm2089_vm15, %v4072_v15, %v11627_v34  ;;  %v4073_v23 = vsel %vm2089_vm15, %v4070_v39, %v4072_v15  ;;  %v4071_v50 = vsel %vm2089_vm15, %v4068_v42, %v4070_v39  ;;  %v4069_v49 = vsel %vm2089_vm15, %v4066_v52, %v4068_v42  ;;  %v11629_v52 = vld [vmem:[#allocation7_spill] sm:$0xff]  ;;  %v11631_v39 = vld [vmem:[#allocation16_spill] sm:$0xff]  ;;  %v11632_v42 = vld [vmem:[#allocation9_spill] sm:$0xff] }
 0x323   : > { %v4138_v19 = vmax.f32 %v3978_v5, %v4074_v18  ;;  %v4137_v63 = vmax.f32 %v3977_v6, %v4073_v23  ;;  %v4136_v30 = vmax.f32 %v3976_v16, %v4071_v50  ;;  %v4166_v40 = vmax.f32 %v4132_v0, %v4134_v33  ;;  %7049 = vmatpush3.bf16.msra.mxu0 %v9900_v57  ;;  %v4173_v57 = vld [vmem:[%s10985_s10] sm:$0xff]  ;;  %v7514_v0 = vld [vmem:[%s10980_s5 + $0x8] sm:$0xff]  }
 0x324   : > { %v4135_v7 = vmax.f32 %v3975_v28, %v4069_v49  ;;  %v7521_v6 = vld [vmem:[%s10980_s5 + $0xc0] sm:$0xff]   ;;  %6721 = vmatpush3.bf16.msra.mxu1 %v7514_v0  ;;  %v7516_v28 = vld [vmem:[%s10980_s5 + $0x10] sm:$0xff]   ;;  %v7524_v5 = vld [vmem:[%s10980_s5 + $0x28] sm:$0xff]   ;;  %v1079_v16 = vand.u32 7, %v11629_v52  ;;  %v1128_v15 = vand.u32 7, %v11631_v39  ;;  %v1093_v31 = vand.u32 7, %v11632_v42 }
 0x325   : > { %v4171_v58 = vmax.f32 %v4137_v63, %v9972_v9  ;;  %v4172_v46 = vmax.f32 %v4138_v19, %v9972_v9  ;;  %v7050_v1 = vpack.c.bf16 %v4166_v40, %v4165_v62  ;;  %v4168_v41 = vmax.f32 %v4134_v33, %v4136_v30  ;;  %6722 = vmatprep.subr.bf16.mxu1 %v7515_v61  ;;  %v11633_v45 = vld [vmem:[#allocation10_spill] sm:$0xff]  ;;  %v11635_v50 = vld [vmem:[#allocation12_spill] sm:$0xff]  ;;  %v11637_v40 = vld [vmem:[#allocation13_spill] sm:$0xff] }
 0x326   : > { %v4167_v56 = vmax.f32 %v4133_v55, %v4135_v7  ;;  %v4169_v8 = vmax.f32 %v4135_v7, %v4137_v63  ;;  %v4170_v21 = vmax.f32 %v4136_v30, %v4138_v19  ;;  %v7522_v55 = vld [vmem:[%s10980_s5 + $0x68] sm:$0xff]   ;;  %v1086_v62 = vand.u32 7, %v11630_v47 }
 0x327   : > { %v7062_v29 = vpack.c.bf16 %v4172_v46, %v4171_v58  ;;  %7051 = vmatprep.subr.bf16.mxu0 %v7050_v1  ;;  %vm1195_vm12 = vcmp.lt.s32.totalorder %v1079_v16, 7  ;;  %v1100_v18 = vand.u32 7, %v11633_v45  ;;  %v11634_v33 = vmov 0.0   ;;  %v11636_v63 = vld [vmem:[#allocation11_spill] sm:$0xff] }
 0x328   : > { %v7054_v22 = vpack.c.bf16 %v4168_v41, %v4167_v56  ;;  %7053 = vmatpush3.bf16.msra.mxu0 %v9905_v14  ;;  %v7058_v51 = vpack.c.bf16 %v4170_v21, %v4169_v8  ;;  %v4175_v14 = vld [vmem:[%s10985_s10 + $0x10] sm:$0xff]  ;;  %6723 = vmatpush3.bf16.msra.mxu1 %v7516_v28  ;;  %vm1196_vm13 = vcmp.lt.s32.totalorder %v1086_v62, 7  ;;  %v6194_v23 = vsel %vm1195_vm12, 1.0, %v11634_v33  ;;  %v7530_v28 = vld [vmem:[%s10980_s5 + $0x78] sm:$0xff]  }
 0x329   : > { %6724 = vmatprep.subr.bf16.mxu1 %v7517_v59  ;;  %v6195_v19 = vsel %vm1196_vm13, 1.0, %v11634_v33  ;;  %v1121_v49 = vand.u32 7, %v11635_v50  ;;  %v1107_v30 = vand.u32 7, %v11636_v63  ;;  %v1114_v7 = vand.u32 7, %v11637_v40  ;;  %v7531_v59 = vld [vmem:[%s10980_s5 + $0x90] sm:$0xff]  }
 0x32a   : > { %7055 = vmatprep.subr.bf16.mxu0 %v7054_v22  ;;  %vm1202_vm14 = vcmp.lt.s32.totalorder %v1128_v15, 7  ;;  %v10095_v58 = vrot.slane %v6194_v23, 6  ;;  %v4345_v46 = vrot.slane %v6195_v19, 6  ;;  %vm1197_vm0 = vcmp.lt.s32.totalorder %v1093_v31, 7  ;;  %v7534_v19 = vld [vmem:[%s10980_s5 + $0x98] sm:$0xff]  }
 0x32b   : > { %vm1198_vm1 = vcmp.lt.s32.totalorder %v1100_v18, 7  ;;  %vm1171_vm2 = vcmp.gt.s32.totalorder %v1079_v16, 0  ;;  %vm1172_vm4 = vcmp.gt.s32.totalorder %v1086_v62, 0  ;;  %vm1201_vm5 = vcmp.lt.s32.totalorder %v1121_v49, 7 }
 0x32c   : > { %7057 = vmatpush3.bf16.msra.mxu0 %v9916_v54  ;;  %v4178_v54 = vld [vmem:[%s10985_s10 + $0x28] sm:$0xff]  ;;  %6725 = vmatpush3.bf16.msra.mxu1 %v7518_v26  ;;  %v6201_v1 = vsel %vm1202_vm14, 1.0, %v11634_v33  ;;  %vm1199_vm8 = vcmp.lt.s32.totalorder %v1107_v30, 7  ;;  %vm1200_vm9 = vcmp.lt.s32.totalorder %v1114_v7, 7  ;;  %vm1173_vm10 = vcmp.gt.s32.totalorder %v1093_v31, 0 }
 0x32d   : > { %7059 = vmatprep.subr.bf16.mxu0 %v7058_v51  ;;  %6726 = vmatprep.subr.bf16.mxu1 %v7519_v35  ;;  %v6196_v41 = vsel %vm1197_vm0, 1.0, %v11634_v33  ;;  %v6197_v8 = vsel %vm1198_vm1, 1.0, %v11634_v33  ;;  %v10105_v22 = vsel %vm1171_vm2, 1.0, %v11634_v33  ;;  %v10108_v51 = vsel %vm1172_vm4, 1.0, %v11634_v33 }
 0x32e   : > { %vm10117_vm12 = vcmp.gt.s32.totalorder %v1100_v18, 0  ;;  %vm10125_vm13 = vcmp.gt.s32.totalorder %v1121_v49, 0  ;;  %vm10129_vm14 = vcmp.gt.s32.totalorder %v1128_v15, 0  ;;  %vm10133_vm0 = vcmp.gt.s32.totalorder %v1107_v30, 0 }
 0x32f   : > { %vm10137_vm1 = vcmp.gt.s32.totalorder %v1114_v7, 0  ;;  %v10186_v62 = vsel %vm10133_vm0, 1.0, %v11634_v33  ;;  %v10196_v15 = vsel %vm10129_vm14, 1.0, %v11634_v33 }
 0x330   : > { %7061 = vmatpush3.bf16.msra.mxu0 %v9934_v36  ;;  %v4177_v36 = vld [vmem:[%s10985_s10 + $0x20] sm:$0xff]  ;;  %6727 = vmatpush3.bf16.msra.mxu1 %v7520_v43  ;;  %v10191_v39 = vsel %vm10137_vm1, 1.0, %v11634_v33 }
 0x331   : > { %7063 = vmatprep.subr.bf16.mxu0 %v7062_v29  ;;  %6728 = vmatprep.subr.bf16.mxu1 %v7522_v55  ;;  %v10102_v29 = vsel %vm1827_vm7, %v10095_v58, %v4345_v46  ;;  %v10174_v55 = vsel %vm10125_vm13, 1.0, %v11634_v33 }
 0x334   : > { %7065 = vmatpush3.bf16.msra.mxu0 %v9950_v48  ;;  %v4180_v48 = vld [vmem:[%s10985_s10 + $0x38] sm:$0xff]  ;;  %6729 = vmatpush3.bf16.msra.mxu1 %v7524_v5 }
 0x335   : > { %6758 = vmatprep.subr.bf16.mxu0 %v7521_v6  ;;  %6730 = vmatprep.subr.bf16.mxu1 %v7526_v4  ;;  %v7532_v5 = vld [vmem:[%s10980_s5 + $0x38] sm:$0xff]  }
 0x336   : > { %v7533_v4 = vld [vmem:[%s10980_s5 + $0xd8] sm:$0xff]  }
 0x337   : > { %4254 = vmatmul.mubr.f32.vlgmr.msra.gmra.mrb[96].mxu0 %v4173_v57  ;;  %v6200_v57 = vsel %vm1201_vm5, 1.0, %v11634_v33 }
 0x338   : > { %4258 = vmatprep.mubr.f32.mxu0 %v4176_v25  ;;  %6759 = vmatpush3.bf16.msra.mxu0 %v7523_v2  ;;  %v10147_v2 = vsel %vm10117_vm12, 1.0, %v11634_v33  ;;  %vm5485_vm12 = vcmask 1042432  }
 0x339   : > { %6760 = vmatprep.subr.bf16.mxu0 %v7525_v44  ;;  %6731 = vmatpush3.bf16.msra.mxu1 %v7528_v20 }
 0x33a   : > { %6732 = vmatprep.subr.bf16.mxu1 %v7530_v28 }
 0x33b   : > { %4259 = vmatmul.mubr.f32.gmra.mrb[98].mxu0 %v4175_v14  ;;  %v10113_v14 = vrot.slane %v6201_v1, 6 }
 0x33c   : > { %4263 = vmatprep.mubr.f32.mxu0 %v4178_v54  ;;  %6761 = vmatpush3.bf16.msra.mxu0 %v7527_v27  ;;  %v6198_v54 = vsel %vm1199_vm8, 1.0, %v11634_v33  ;;  %v7529_v27 = vld [vmem:[%s10980_s5 + $0xd0] sm:$0xff]  }
 0x33d   : > { %v4351_v24 = vrot.slane %v6198_v54, 6  ;;  %6762 = vmatprep.subr.bf16.mxu0 %v7529_v27  ;;  %6733 = vmatpush3.bf16.msra.mxu1 %v7532_v5 }
 0x33f   : > { %4264 = vmatmul.mubr.f32.gmra.mrb[100].mxu0 %v4177_v36  ;;  %v6199_v36 = vsel %vm1200_vm9, 1.0, %v11634_v33  ;;  %vm5400_vm9 = vcmask 1044480  }
 0x340   : > { %4268 = vmatprep.mubr.f32.mxu0 %v4180_v48  ;;  %v4353_v0 = vrot.slane %v6199_v36, 6  ;;  %6763 = vmatpush3.bf16.msra.mxu0 %v7531_v59 }
 0x341   : > { %6764 = vmatprep.subr.bf16.mxu0 %v7533_v4 }
 0x342   : > { %v10205_v23 = vsel %vm1827_vm7, %v4351_v24, %v4353_v0 }
 0x343   : > { %4269 = vmatmul.mubr.f32.gmra.mrb[102].mxu0 %v4179_v32  ;;  %v10122_v32 = vsel %vm1173_vm10, 1.0, %v11634_v33  ;;  %vm5424_vm10 = vcmask 1043456  }
 0x344   : > { %4273 = vmatprep.mubr.f32.mxu0 %v4182_v10  ;;  %v4347_v10 = vrot.slane %v6196_v41, 6  ;;  %6765 = vmatpush3.bf16.msra.mxu0 %v7534_v19 }
 0x346   : > { %v10169_v43 = vsel %vm1827_vm7, %v4345_v46, %v4347_v10 }
 0x347   : > { %4274 = vmatmul.mubr.f32.gmra.mrb[104].mxu0 %v4181_v37  ;;  %v4349_v37 = vrot.slane %v6197_v8, 6 }
 0x348   : > { %4278 = vmatprep.mubr.f32.mxu0 %v4184_v38 }
 0x349   : > { %v10199_v45 = vsel %vm1827_vm7, %v4347_v10, %v4349_v37  ;;  %v10202_v18 = vsel %vm1827_vm7, %v4349_v37, %v4351_v24 }
 0x34b   : > { %4279 = vmatmul.mubr.f32.gmra.mrb[106].mxu0 %v4183_v12 }
 0x34c   : > { %4283 = vmatprep.mubr.f32.mxu0 %v4186_v17  ;;  %v4355_v17 = vrot.slane %v6200_v57, 6 }
 0x34e   : > { %v10151_v44 = vsel %vm1827_vm7, %v4355_v17, %v10113_v14  ;;  %v10230_v57 = vsel %vm1827_vm7, %v4353_v0, %v4355_v17  ;;  %v7537_v0 = vld [vmem:[%s10980_s5 + $0xe8] sm:$0xff]  }
 0x34f   : > { %4284 = vmatmul.mubr.f32.gmra.mrb[108].mxu0 %v4185_v60 }
 0x350   : > { %4288 = vmatprep.mubr.f32.mxu0 %v4188_v13 }
 0x353   : > { %4289 = vmatmul.mubr.f32.gmra.mrb[110].mxu0 %v4187_v53 }
 0x40a   : > { %v6694_v56 = vpop.f32.mrb[96].mxu0 }
 0x40b   : > { %v6695_v21 = vpop.f32.mrb[97].mxu0 }
 0x40c   : > { %v10111_v25 = vadd.f32 %v6695_v21, %v6694_v56  ;;  %v7535_v56 = vld [vmem:[%s10980_s5 + $0xe0] sm:$0xff]  }
 0x40d   : > { %6766 = vmatprep.subr.bf16.mxu0 %v7535_v56 }
 0x40e   : > { %11638 = vst [vmem:[#allocation19_spill] sm:$0xff] %v10111_v25  ;;  %v4302_v38 = vrot.slane %v10111_v25, 7  ;;  %v6697_v12 = vpop.f32.mrb[98].mxu0 }
 0x40f   : > { %v6698_v53 = vpop.f32.mrb[99].mxu0 }
 0x410   : > { %v4326_v6 = vsel %vm1664_vm11, 0.0, %v4302_v38  ;;  %v10142_v61 = vadd.f32 %v6698_v53, %v6697_v12  ;;  %v7536_v12 = vld [vmem:[%s10980_s5 + $0xa0] sm:$0xff]  }
 0x411   : > { %v10163_v26 = vmul.f32 %v10102_v29, %v4326_v6  ;;  %v10166_v35 = vmul.f32 %v10108_v51, %v4326_v6  ;;  %v4412_v31 = vrot.slane %v4326_v6, 1  ;;  %v4377_v63 = vmul.f32 %v10105_v22, %v4326_v6  ;;  %6767 = vmatpush3.bf16.msra.mxu0 %v7536_v12 }
 0x412   : > { %11649 = vst [vmem:[#allocation22_spill] sm:$0xff] %v10142_v61  ;;  %v4303_v20 = vrot.slane %v10142_v61, 7  ;;  %v6700_v16 = vpop.f32.mrb[100].mxu0  ;;  %v4385_v30 = vmul.f32 %v10095_v58, %v4326_v6  ;;  %6768 = vmatprep.subr.bf16.mxu0 %v7537_v0  ;;  %v7540_v0 = vld [vmem:[%s10980_s5 + $0xb0] sm:$0xff]  }
 0x413   : > { %v6701_v42 = vpop.f32.mrb[101].mxu0  ;;  %v11206_v41 = vrot.slane %v10163_v26, 2  ;;  %v4413_v10 = vsel %vm2089_vm15, %v11627_v34, %v4412_v31 }
 0x414   : > { %v10211_v50 = vsel %vm1664_vm11, %v4302_v38, %v4303_v20  ;;  %v10213_v49 = vadd.f32 %v6701_v42, %v6700_v16  ;;  %v4538_v24 = vrot.slane %v4385_v30, 2 }
 0x415   : > { %v4378_v40 = vmul.f32 %v10108_v51, %v10211_v50  ;;  %v4414_v7 = vrot.slane %v10211_v50, 1  ;;  %v4386_v46 = vmul.f32 %v10102_v29, %v10211_v50  ;;  %v4370_v1 = vmul.f32 %v10169_v43, %v10211_v50 }
 0x416   : > { %11650 = vst [vmem:[#allocation23_spill] sm:$0xff] %v10213_v49  ;;  %v4305_v8 = vrot.slane %v10213_v49, 7  ;;  %v6703_v21 = vpop.f32.mrb[102].mxu0  ;;  %v10234_v54 = vmul.f32 %v10122_v32, %v10211_v50  ;;  %v10255_v6 = vmul.f32 %v10095_v58, %v10211_v50 }
 0x417   : > { %v6704_v36 = vpop.f32.mrb[103].mxu0  ;;  %v7377_v48 = vpack.i.bf16 %v4378_v40, %v4377_v63  ;;  %v10239_v37 = vsel %vm2089_vm15, %v4412_v31, %v4414_v7  ;;  %v4464_v38 = vrot.slane %v4370_v1, 2  ;;  %v4539_v53 = vrot.slane %v4386_v46, 2  ;;  %v7538_v31 = vld [vmem:[%s10980_s5 + $0xa8] sm:$0xff]  }
 0x418   : > { %11651 = vst [vmem:[#allocation89_spill] sm:$0xff] %v10239_v37  ;;  %v4306_v17 = vsel %vm1664_vm11, %v4303_v20, %v4305_v8  ;;  %v10245_v60 = vadd.f32 %v6704_v36, %v6703_v21  ;;  %v7382_v13 = vpack.i.bf16 %v10239_v37, %v4413_v10  ;;  %6769 = vmatpush3.bf16.msra.mxu0 %v7538_v31 }
 0x419   : > { %7378 = vrot.lane.b32.xlu0 %v7377_v48, %s11653_s28  ;;  %v4416_v11 = vrot.slane %v4306_v17, 1  ;;  %v4387_v3 = vmul.f32 %v10169_v43, %v4306_v17  ;;  %v10262_v59 = vsel %vm2283_vm3, %v11206_v41, %v4464_v38  ;;  %v4371_v5 = vmul.f32 %v10199_v45, %v4306_v17 }
 0x41a   : > { %11652 = vst [vmem:[#allocation67_spill] sm:$0xff] %v10245_v60  ;;  %v4307_v27 = vrot.slane %v10245_v60, 7  ;;  %7383 = vrot.lane.b32.xlu1 %v7382_v13, %s11653_s28  ;;  %v6706_v28 = vpop.f32.mrb[104].mxu0  ;;  %v10266_v4 = vmul.f32 %v10147_v2, %v4306_v17  ;;  %v4379_v16 = vmul.f32 %v10122_v32, %v4306_v17  ;;  %v10273_v19 = vmul.f32 %v10108_v51, %v4306_v17 }
 0x41b   : > { %v6707_v20 = vpop.f32.mrb[105].mxu0  ;;  %v4541_v42 = vrot.slane %v4387_v3, 2  ;;  %v10276_v63 = vmul.f32 %v10102_v29, %v4306_v17  ;;  %v10284_v46 = vsel %vm2283_vm3, %v4538_v24, %v4539_v53  ;;  %v4466_v1 = vrot.slane %v4371_v5, 2 }
 0x41c   : > { %v10279_v30 = vsel %vm1664_vm11, %v4305_v8, %v4307_v27  ;;  %v10281_v40 = vadd.f32 %v6707_v20, %v6706_v28  ;;  %v10289_v21 = vsel %vm2089_vm15, %v4414_v7, %v4416_v11  ;;  %v7539_v8 = vld [vmem:[%s10980_s5 + $0xf0] sm:$0xff]  }
 0x41d   : > { %v4380_v56 = vmul.f32 %v10147_v2, %v10279_v30  ;;  %v4418_v51 = vrot.slane %v10279_v30, 1  ;;  %v4388_v29 = vmul.f32 %v10199_v45, %v10279_v30  ;;  %v10299_v10 = vsel %vm2283_vm3, %v4539_v53, %v4541_v42  ;;  %6770 = vmatprep.subr.bf16.mxu0 %v7539_v8 }
 0x41e   : > { %11654 = vst [vmem:[#allocation65_spill] sm:$0xff] %v10281_v40  ;;  %v4309_v36 = vrot.slane %v10281_v40, 7  ;;  %v6709_v48 = vpop.f32.mrb[106].mxu0  ;;  %v4372_v12 = vmul.f32 %v10202_v18, %v10279_v30  ;;  %v10304_v7 = vsel %vm2283_vm3, %v4464_v38, %v4466_v1  ;;  %v10314_v53 = vmul.f32 %v10186_v62, %v10279_v30  ;;  %6771 = vmatpush3.bf16.msra.mxu0 %v7540_v0 }
 0x41f   : > { %v6710_v17 = vpop.f32.mrb[107].mxu0  ;;  %v7387_v13 = vpack.i.bf16 %v4380_v56, %v4379_v16  ;;  %v10307_v3 = vsel %vm2089_vm15, %v4416_v11, %v4418_v51  ;;  %v4543_v24 = vrot.slane %v4388_v29, 2  ;;  %v10354_v11 = vld [vmem:[%s10980_s5 + $0x100] sm:$0xff]   ;;  %v10363_v47 = vmul.f32 %v10122_v32, %v10279_v30 }
 0x420   : > { %11655 = vst [vmem:[#allocation24_spill] sm:$0xff] %v10307_v3  ;;  %v4310_v28 = vsel %vm1664_vm11, %v4307_v27, %v4309_v36  ;;  %v10317_v5 = vadd.f32 %v6710_v17, %v6709_v48  ;;  %v7392_v38 = vpack.i.bf16 %v10307_v3, %v10289_v21  ;;  %v4468_v20 = vrot.slane %v4372_v12, 2  ;;  %6955 = vmatprep.subr.bf16.mxu1 %v10354_v11 }
 0x421   : > { %7388 = vrot.lane.b32.xlu0 %v7387_v13, %s11653_s28  ;;  %v10325_v16 = vmul.f32 %v10202_v18, %v4310_v28  ;;  %v10328_v31 = vmul.f32 %v10199_v45, %v4310_v28  ;;  %v4420_v48 = vrot.slane %v4310_v28, 1  ;;  %v4373_v12 = vmul.f32 %v10205_v23, %v4310_v28 }
 0x422   : > { %11656 = vst [vmem:[#allocation93_spill] sm:$0xff] %v10317_v5  ;;  %v4311_v56 = vrot.slane %v10317_v5, 7  ;;  %7393 = vrot.lane.b32.xlu1 %v7392_v38, %s11653_s28  ;;  %v6712_v29 = vpop.f32.mrb[108].mxu0  ;;  %v10334_v8 = vsel %vm2283_vm3, %v4466_v1, %v4468_v20  ;;  %v4381_v13 = vmul.f32 %v10186_v62, %v4310_v28  ;;  %v10339_v41 = vsel %vm2283_vm3, %v4541_v42, %v4543_v24  ;;  %v7541_v38 = vld [vmem:[%s10980_s5 + $0xf8] sm:$0xff]  }
 0x423   : > { %v6713_v17 = vpop.f32.mrb[109].mxu0  ;;  %v4545_v45 = vrot.slane %v10325_v16, 2  ;;  %v10346_v27 = vmul.f32 %v10191_v39, %v4310_v28  ;;  %v7542_v1 = vld [vmem:[%s10980_s5 + $0xb8] sm:$0xff]   ;;  %v4470_v16 = vrot.slane %v4373_v12, 2  ;;  %6772 = vmatprep.subr.bf16.mxu0 %v7541_v38  ;;  %v10378_v32 = vsel %vm2089_vm15, %v4418_v51, %v4420_v48 }
 0x424   : > { %v10357_v42 = vsel %vm1664_vm11, %v4309_v36, %v4311_v56  ;;  %v10359_v0 = vadd.f32 %v6713_v17, %v6712_v29  ;;  %11658 = vst [vmem:[#allocation74_spill] sm:$0xff] %v10378_v32  ;;  %6773 = vmatpush3.bf16.msra.mxu0 %v7542_v1 }
 0x425   : > { %v4382_v52 = vmul.f32 %v10191_v39, %v10357_v42  ;;  %v4422_v9 = vrot.slane %v10357_v42, 1  ;;  %v10370_v5 = vmul.f32 %v10202_v18, %v10357_v42  ;;  %v10373_v40 = vsel %vm2283_vm3, %v4543_v24, %v4545_v45 }
 0x426   : > { %11657 = vst [vmem:[#allocation72_spill] sm:$0xff] %v10359_v0  ;;  %v4313_v36 = vrot.slane %v10359_v0, 7  ;;  %v6715_v29 = vpop.f32.mrb[110].mxu0  ;;  %v4390_v12 = vmul.f32 %v10205_v23, %v10357_v42  ;;  %v4374_v17 = vmul.f32 %v10230_v57, %v10357_v42  ;;  %v10389_v60 = vsel %vm2283_vm3, %v4468_v20, %v4470_v16 }
 0x427   : > { %v6716_v18 = vpop.f32.mrb[111].mxu0  ;;  %v7397_v61 = vpack.i.bf16 %v4382_v52, %v4381_v13  ;;  %v10385_v24 = vsel %vm2089_vm15, %v4420_v48, %v4422_v9  ;;  %v7422_v49 = vpack.i.bf16 %v10373_v40, %v10339_v41 }
 0x428   : > { %11659 = vst [vmem:[#allocation25_spill] sm:$0xff] %v10385_v24  ;;  %v4314_v51 = vsel %vm1664_vm11, %v4311_v56, %v4313_v36  ;;  %v10392_v0 = vadd.f32 %v6716_v18, %v6715_v29  ;;  %v7407_v25 = vpack.i.bf16 %v10385_v24, %v10378_v32  ;;  %v4547_v13 = vrot.slane %v4390_v12, 2 }
 0x429   : > { %7398 = vrot.lane.b32.xlu0 %v7397_v61, %s11653_s28  ;;  %v4391_v48 = vmul.f32 %v10230_v57, %v4314_v51  ;;  %v4472_v20 = vrot.slane %v4374_v17, 2  ;;  %v4383_v56 = vmul.f32 %v10174_v55, %v4314_v51  ;;  %v10405_v29 = vmul.f32 %v10147_v2, %v4310_v28 }
 0x42a   : > { %11660 = vst [vmem:[#allocation90_spill] sm:$0xff] %v10392_v0  ;;  %v4315_v1 = vrot.slane %v10392_v0, 7  ;;  %7408 = vrot.lane.b32.xlu1 %v7407_v25, %s11653_s28  ;;  %v4375_v18 = vmul.f32 %v10151_v44, %v4314_v51  ;;  %v4424_v41 = vrot.slane %v4314_v51, 1  ;;  %v10413_v12 = vmul.f32 %v10174_v55, %v10357_v42 }
 0x42b   : > { %v4549_v40 = vrot.slane %v4391_v48, 2  ;;  %v10409_v61 = vsel %vm2283_vm3, %v4470_v16, %v4472_v20  ;;  %v10418_v52 = vmul.f32 %v10196_v15, %v4314_v51  ;;  %v11663_v16 = vpack.i.bf16 %v10299_v10, %v10284_v46 }
 0x42c   : > { %11661 = vst [vmem:[#allocation101_spill] sm:$0xff] %v10413_v12  ;;  %v4316_v17 = vsel %vm1664_vm11, %v4313_v36, %v4315_v1  ;;  %v4327_v25 = vsel %vm1664_vm11, %v4315_v1, 0.0  ;;  %v4474_v38 = vrot.slane %v4375_v18, 2  ;;  %v4548_v36 = vsel %vm2283_vm3, %v4545_v45, %v4547_v13 }
 0x42d   : > { %11662 = vst [vmem:[#allocation75_spill] sm:$0xff] %v10418_v52  ;;  %v4393_v2 = vmul.f32 %v10113_v14, %v4327_v25  ;;  %v4409_v28 = vmul.f32 %v10151_v44, %v4327_v25  ;;  %v4519_v48 = vrot.slane %v4327_v25, 1  ;;  %7403 = vrot.lane.b32.xlu0 %v11663_v16, %s11653_s28  ;;  %v4384_v0 = vmul.f32 %v10196_v15, %v4316_v17 }
 0x42e   : > { %v4426_v24 = vrot.slane %v4316_v17, 1  ;;  %v4392_v1 = vmul.f32 %v10151_v44, %v4316_v17  ;;  %v4376_v18 = vmul.f32 %v10113_v14, %v4316_v17  ;;  %v10431_v52 = vsel %vm2089_vm15, %v4422_v9, %v4424_v41 }
 0x42f   : > { %v4553_v32 = vrot.slane %v4393_v2, 2  ;;  %v7412_v3 = vpack.i.bf16 %v4384_v0, %v4383_v56  ;;  %v4550_v12 = vsel %vm2283_vm3, %v4547_v13, %v4549_v40  ;;  %v4579_v10 = vsel %vm2089_vm15, %v4519_v48, %v11627_v34 }
 0x430   : > { %v10435_v37 = vsel %vm2089_vm15, %v4424_v41, %v4426_v24  ;;  %v10438_v46 = vsel %vm2089_vm15, %v4426_v24, %v4519_v48  ;;  %v4551_v45 = vrot.slane %v4392_v1, 2  ;;  %v4608_v44 = vrot.slane %v4409_v28, 2 }
 0x431   : > { %7413 = vrot.lane.b32.xlu1 %v7412_v3, %s11653_s28  ;;  %v7417_v0 = vpack.i.bf16 %v10435_v37, %v10431_v52  ;;  %v10446_v9 = vsel %vm2283_vm3, %v4472_v20, %v4474_v38  ;;  %v4476_v13 = vrot.slane %v4376_v18, 2  ;;  %v7427_v56 = vpack.i.bf16 %v4550_v12, %v4548_v36 }
 0x432   : > { %v7432_v41 = vpack.i.bf16 %v4579_v10, %v10438_v46  ;;  %v4404_v24 = vmul.f32 %v10169_v43, %v10279_v30  ;;  %v4596_v2 = vrot.slane %v10276_v63, 2  ;;  %v4552_v28 = vsel %vm2283_vm3, %v4549_v40, %v4551_v45 }
 0x433   : > { %7418 = vrot.lane.b32.xlu0 %v7417_v0, %s11653_s28  ;;  %v10455_v3 = vsel %vm2283_vm3, %v4474_v38, %v4476_v13  ;;  %v10459_v20 = vmul.f32 %v10186_v62, %v10357_v42  ;;  %v10462_v12 = vmul.f32 %v10191_v39, %v4314_v51  ;;  %v11664_v48 = vrot.slane %v10255_v6, 2 }
 0x434   : > { %v4598_v63 = vrot.slane %v4404_v24, 2  ;;  %v11665_v30 = vrot.slane %v10370_v5, 2  ;;  %v11666_v40 = vrot.slane %v10328_v31, 2  ;;  %v4407_v16 = vmul.f32 %v10205_v23, %v4314_v51 }
 0x435   : > { %v10467_v43 = vsel %vm2283_vm3, %v11664_v48, %v4596_v2  ;;  %7423 = vrot.lane.b32.xlu1 %v7422_v49, %s11653_s28  ;;  %v4408_v62 = vmul.f32 %v10230_v57, %v4316_v17  ;;  %v10480_v39 = vmul.f32 %v10174_v55, %v4316_v17  ;;  %v10483_v6 = vmul.f32 %v10196_v15, %v4327_v25 }
 0x436   : > { %v10474_v38 = vsel %vm2283_vm3, %v11666_v40, %v11665_v30  ;;  %v4410_v42 = vmul.f32 0.0, %v10113_v14  ;;  %v4554_v36 = vsel %vm2283_vm3, %v4551_v45, %v4553_v32  ;;  %v10488_v1 = vsel %vm2283_vm3, %v4596_v2, %v4598_v63 }
 0x437   : > { %v11667_v18 = vmov %v11666_v40  ;;  %v4604_v49 = vrot.slane %v4407_v16, 2  ;;  %7428 = vrot.lane.b32.xlu0 %v7427_v56, %s11653_s28  ;;  %v4656_v55 = vpack.c.bf16 %v10488_v1, %v10467_v43  ;;  %v4606_v14 = vrot.slane %v4408_v62, 2 }
 0x438   : > { %v10493_v23 = vsel %vm2283_vm3, %v4598_v63, %v11667_v18  ;;  %v4610_v57 = vrot.slane %v4410_v42, 2  ;;  %v11668_v32 = vmov %v11665_v30  ;;  %v7437_v31 = vpack.i.bf16 %v4554_v36, %v4552_v28  ;;  %v7544_v18 = vld [vmem:[%s10980_s5 + $0x108] sm:$0xff]  }
 0x439   : > { %v4661_v15 = vpack.c.bf16 %v10474_v38, %v10493_v23  ;;  %v10503_v51 = vsel %vm2283_vm3, %v11668_v32, %v4604_v49  ;;  %7433 = vrot.lane.b32.xlu1 %v7432_v41, %s11653_s28  ;;  %v10507_v17 = vsel %vm2283_vm3, %v4604_v49, %v4606_v14  ;;  %v10510_v25 = vsel %vm2283_vm3, %v4606_v14, %v4608_v44 }
 0x43a   : > { %v10513_v10 = vsel %vm2283_vm3, %v4608_v44, %v4610_v57  ;;  %v4666_v45 = vpack.c.bf16 %v10507_v17, %v10503_v51  ;;  %v4368_v0 = vmul.f32 0.0, %v10095_v58  ;;  %v4328_v56 = vmul.f32 0.0, %v10105_v22 }
 0x43b   : > { %v4671_v5 = vpack.c.bf16 %v10513_v10, %v10510_v25  ;;  %7438 = vrot.lane.b32.xlu0 %v7437_v31, %s11653_s28  ;;  %v11669_v63 = vrot.slane %v10163_v26, 2  ;;  %v4394_v31 = vmul.f32 %v10105_v22, %v10211_v50  ;;  %v7546_v50 = vld [vmem:[%s10980_s5 + $0x118] sm:$0xff]   ;;  %vm7663_vm11 = vmmov 0  }
 0x43c   : > { %v4461_v13 = vrot.slane %v4368_v0, 2 }
 0x43e   : > { %v4463_v30 = vsel %vm2283_vm3, %v4461_v13, %v11669_v63 }
 0x48b   : > { %v7379_v41 = vpop.permute.xlu0 %7378 }
 0x48c   : > { %v7381_v24 = vunpack.i.h.bf16 %v7379_v41  ;;  %v7380_v2 = vunpack.i.l.bf16 %v7379_v41  ;;  %v7384_v28 = vpop.permute.xlu1 %7383 }
 0x48d   : > { %v7386_v48 = vunpack.i.h.bf16 %v7384_v28  ;;  %v7385_v44 = vunpack.i.l.bf16 %v7384_v28 }
 0x48e   : > { %v4628_v40 = vsel %vm2880_vm6, %v4463_v30, %v7380_v2  ;;  %v4629_v16 = vsel %vm2880_vm6, %v10262_v59, %v7381_v24 }
 0x48f   : > { %v4621_v58 = vsel %vm2880_vm6, %v10166_v35, %v7386_v48  ;;  %v4620_v62 = vsel %vm2880_vm6, %v4328_v56, %v7385_v44  ;;  %v4653_v42 = vpack.c.bf16 %v4629_v16, %v4628_v40  ;;  %v7545_v35 = vld [vmem:[%s10980_s5 + $0x110] sm:$0xff]  }
 0x490   : > { %v4652_v36 = vpack.c.bf16 %v4621_v58, %v4620_v62 }
 0x491   : > { %5011 = vmatprep.mubr.bf16.mxu1 %v4653_v42 }
 0x492   : > { %5012 = vmatmul.mubr.bf16.vlgmr.msra.gmra.mrb[96].mxu1 %v4652_v36 }
 0x493   : > { %v7389_v26 = vpop.permute.xlu0 %7388  ;;  %6956 = vmatpush3.bf16.msra.mxu1 %v10354_v11 }
 0x494   : > { %v7391_v49 = vunpack.i.h.bf16 %v7389_v26  ;;  %v7390_v14 = vunpack.i.l.bf16 %v7389_v26  ;;  %v7394_v57 = vpop.permute.xlu1 %7393  ;;  %6957 = vmatprep.subr.bf16.mxu1 %v7544_v18  ;;  %v11670_v26 = vld [vmem:[#allocation89_spill] sm:$0xff] }
 0x495   : > { %v7396_v59 = vunpack.i.h.bf16 %v7394_v57  ;;  %v7395_v32 = vunpack.i.l.bf16 %v7394_v57 }
 0x496   : > { %v4630_v0 = vsel %vm2880_vm6, %v10304_v7, %v7390_v14  ;;  %v4631_v13 = vsel %vm2880_vm6, %v10334_v8, %v7391_v49 }
 0x497   : > { %v4658_v11 = vpack.c.bf16 %v4631_v13, %v4630_v0  ;;  %v4622_v56 = vsel %vm2880_vm6, %v10234_v54, %v7395_v32  ;;  %v4623_v41 = vsel %vm2880_vm6, %v10266_v4, %v7396_v59  ;;  %v4644_v24 = vsel %vm2880_vm6, %v4394_v31, %v7395_v32  ;;  %6958 = vmatpush3.bf16.msra.mxu1 %v7544_v18 }
 0x498   : > { %v4657_v2 = vpack.c.bf16 %v4623_v41, %v4622_v56  ;;  %v4645_v22 = vsel %vm2880_vm6, %v10273_v19, %v7396_v59  ;;  %6959 = vmatprep.subr.bf16.mxu1 %v7545_v35  ;;  %v11671_v56 = vld [vmem:[#allocation101_spill] sm:$0xff] }
 0x499   : > { %5019 = vmatprep.mubr.bf16.mxu1 %v4658_v11  ;;  %v4655_v7 = vpack.c.bf16 %v4645_v22, %v4644_v24  ;;  %v11672_v24 = vld [vmem:[#allocation75_spill] sm:$0xff] }
 0x49a   : > { %5020 = vmatmul.mubr.bf16.gmra.mrb[100].mxu1 %v4657_v2 }
 0x49b   : > { %5076 = vmatprep.mubr.bf16.mxu0 %v4655_v7  ;;  %v7399_v54 = vpop.permute.xlu0 %7398  ;;  %6960 = vmatpush3.bf16.msra.mxu1 %v7545_v35 }
 0x49c   : > { %v7401_v8 = vunpack.i.h.bf16 %v7399_v54  ;;  %v7400_v4 = vunpack.i.l.bf16 %v7399_v54  ;;  %v7409_v28 = vpop.permute.xlu1 %7408  ;;  %6961 = vmatprep.subr.bf16.mxu1 %v7546_v50 }
 0x49d   : > { %v7411_v48 = vunpack.i.h.bf16 %v7409_v28  ;;  %v7410_v44 = vunpack.i.l.bf16 %v7409_v28 }
 0x49e   : > { %v4632_v19 = vsel %vm2880_vm6, %v10389_v60, %v7400_v4  ;;  %v4633_v63 = vsel %vm2880_vm6, %v10409_v61, %v7401_v8  ;;  %v11674_v8 = vld [vmem:[#allocation74_spill] sm:$0xff] }
 0x49f   : > { %v7404_v30 = vpop.permute.xlu0 %7403  ;;  %v4663_v40 = vpack.c.bf16 %v4633_v63, %v4632_v19  ;;  %v4624_v16 = vsel %vm2880_vm6, %v10314_v53, %v7410_v44  ;;  %v4625_v58 = vsel %vm2880_vm6, %v10346_v27, %v7411_v48  ;;  %v4646_v62 = vsel %vm2880_vm6, %v10363_v47, %v7410_v44  ;;  %6962 = vmatpush3.bf16.msra.mxu1 %v7546_v50 }
 0x4a0   : > { %v7406_v42 = vunpack.i.h.bf16 %v7404_v30  ;;  %v7405_v36 = vunpack.i.l.bf16 %v7404_v30  ;;  %v4662_v18 = vpack.c.bf16 %v4625_v58, %v4624_v16  ;;  %v4647_v60 = vsel %vm2880_vm6, %v10405_v29, %v7411_v48  ;;  %6990 = vmatprep.subr.bf16.mxu1 %v11634_v33  ;;  %v11675_v58 = vld [vmem:[#allocation25_spill] sm:$0xff] }
 0x4a1   : > { %5027 = vmatprep.mubr.bf16.mxu1 %v4663_v40  ;;  %v4660_v61 = vpack.c.bf16 %v4647_v60, %v4646_v62 }
 0x4a2   : > { %v4637_v53 = vsel %vm2880_vm6, %v10289_v21, %v7406_v42  ;;  %v4636_v27 = vsel %vm2880_vm6, %v11670_v26, %v7405_v36  ;;  %5028 = vmatmul.mubr.bf16.gmra.mrb[104].mxu1 %v4662_v18  ;;  %v10622_v26 = vld [vmem:[%s10981_s6] ss:$0 sm:$0xff] }
 0x4a3   : > { %v4654_v49 = vpack.c.bf16 %v4637_v53, %v4636_v27  ;;  %v7414_v47 = vpop.permute.xlu1 %7413 }
 0x4a4   : > { %v7416_v14 = vunpack.i.h.bf16 %v7414_v47  ;;  %v7415_v57 = vunpack.i.l.bf16 %v7414_v47 }
 0x4a5   : > { %v7419_v35 = vpop.permute.xlu0 %7418  ;;  %5077 = vmatmul.mubr.bf16.vlgmr.msra.gmra.mrb[112].mxu0 %v4654_v49 }
 0x4a6   : > { %v7421_v59 = vunpack.i.h.bf16 %v7419_v35  ;;  %v7420_v32 = vunpack.i.l.bf16 %v7419_v35  ;;  %5084 = vmatprep.mubr.bf16.mxu0 %v4660_v61  ;;  %v4634_v29 = vsel %vm2880_vm6, %v10446_v9, %v7415_v57  ;;  %v4635_v31 = vsel %vm2880_vm6, %v10455_v3, %v7416_v14  ;;  %v11673_v3 = vld [vmem:[#allocation24_spill] sm:$0xff] }
 0x4a7   : > { %v7424_v21 = vpop.permute.xlu1 %7423  ;;  %v4668_v0 = vpack.c.bf16 %v4635_v31, %v4634_v29 }
 0x4a8   : > { %v7426_v13 = vunpack.i.h.bf16 %v7424_v21  ;;  %v7425_v11 = vunpack.i.l.bf16 %v7424_v21  ;;  %v4626_v41 = vsel %vm2880_vm6, %v11671_v56, %v7420_v32  ;;  %v4627_v2 = vsel %vm2880_vm6, %v11672_v24, %v7421_v59 }
 0x4a9   : > { %v7429_v22 = vpop.permute.xlu0 %7428  ;;  %5035 = vmatprep.mubr.bf16.mxu1 %v4668_v0  ;;  %v4667_v50 = vpack.c.bf16 %v4627_v2, %v4626_v41  ;;  %v4648_v7 = vsel %vm2880_vm6, %v10459_v20, %v7420_v32  ;;  %v4649_v9 = vsel %vm2880_vm6, %v10462_v12, %v7421_v59 }
 0x4aa   : > { %v4638_v54 = vsel %vm2880_vm6, %v11673_v3, %v7425_v11  ;;  %v4639_v4 = vsel %vm2880_vm6, %v11674_v8, %v7426_v13  ;;  %v4665_v44 = vpack.c.bf16 %v4649_v9, %v4648_v7  ;;  %v7431_v19 = vunpack.i.h.bf16 %v7429_v22 }
 0x4ab   : > { %5036 = vmatmul.mubr.bf16.gmra.mrb[108].mxu1 %v4667_v50  ;;  %v7434_v28 = vpop.permute.xlu1 %7433  ;;  %v4659_v48 = vpack.c.bf16 %v4639_v4, %v4638_v54  ;;  %v7430_v63 = vunpack.i.l.bf16 %v7429_v22 }
 0x4ac   : > { %v7436_v30 = vunpack.i.h.bf16 %v7434_v28  ;;  %v7435_v40 = vunpack.i.l.bf16 %v7434_v28  ;;  %6963 = vmatprep.mubr.msk.bf16.mxu1 %vm2880_vm6, %v4656_v55  ;;  %v4641_v42 = vsel %vm2880_vm6, %v10431_v52, %v7431_v19 }
 0x4ad   : > { %5085 = vmatmul.mubr.bf16.gmra.mrb[116].mxu0 %v4659_v48  ;;  %v4640_v62 = vsel %vm2880_vm6, %v11675_v58, %v7430_v63  ;;  %v7439_v36 = vpop.permute.xlu0 %7438  ;;  %v11676_v58 = vld [vmem:[#allocation23_spill] sm:$0xff] }
 0x4ae   : > { %5092 = vmatprep.mubr.bf16.mxu0 %v4665_v44  ;;  %v4650_v20 = vsel %vm2880_vm6, %v10480_v39, %v7435_v40  ;;  %v4651_v12 = vsel %vm2880_vm6, %v10483_v6, %v7436_v30  ;;  %v4664_v43 = vpack.c.bf16 %v4641_v42, %v4640_v62  ;;  %v7441_v1 = vunpack.i.h.bf16 %v7439_v36  ;;  %v5238_v6 = vld [vmem:[%s10986_s11] sm:$0xff] }
 0x4af   : > { %v4670_v16 = vpack.c.bf16 %v4651_v12, %v4650_v20  ;;  %v7440_v55 = vunpack.i.l.bf16 %v7439_v36 }
 0x4b0   : > { %v4643_v52 = vsel %vm2880_vm6, %v10438_v46, %v7441_v1 }
 0x4b1   : > { %v4642_v39 = vsel %vm2880_vm6, %v10435_v37, %v7440_v55  ;;  %v11677_v55 = vld [vmem:[#allocation19_spill] sm:$0xff] }
 0x4b2   : > { %v4669_v38 = vpack.c.bf16 %v4643_v52, %v4642_v39 }
 0x4b3   : > { %6964 = vmatmul.mubr.msk.bf16.vlgmr.msra.gmra.mrb[112].mxu1 %vm2880_vm6, %v4661_v15 }
 0x4b4   : > { %6967 = vmatprep.mubr.msk.bf16.mxu1 %vm2880_vm6, %v4666_v45 }
 0x4b5   : > { %5093 = vmatmul.mubr.bf16.gmra.mrb[120].mxu0 %v4664_v43 }
 0x4b6   : > { %5100 = vmatprep.mubr.bf16.mxu0 %v4670_v16 }
 0x4bb   : > { %6968 = vmatmul.mubr.msk.bf16.gmra.mrb[116].mxu1 %vm2880_vm6, %v4671_v5 }
 0x4bc   : > { %6998 = vmatprep.mubr.msk.bf16.mxu1 %vm7663_vm11, %v11634_v33 }
 0x4bd   : > { %5101 = vmatmul.mubr.bf16.gmra.mrb[124].mxu0 %v4669_v38 }
 0x4be   : > { %6987 = vmatprep.mubr.msk.f32.mxu0 %vm2880_vm6, %v5238_v6 }
 0x565   : > { %v6734_v23 = vpop.f32.mrb[96].mxu1 }
 0x566   : > { %v6735_v15 = vpop.f32.mrb[97].mxu1 }
 0x567   : > { %v6736_v51 = vadd.f32 %v6735_v15, %v6734_v23  ;;  %v6737_v37 = vpop.f32.mrb[98].mxu1  ;;  %v11678_v15 = vld [vmem:[#allocation67_spill] sm:$0xff] }
 0x568   : > { %v6738_v17 = vpop.f32.mrb[99].mxu1 }
 0x569   : > { %v6739_v45 = vadd.f32 %v6738_v17, %v6737_v37  ;;  %v5014_v59 = vadd.f32 %v6736_v51, %v10622_v26 }
 0x56b   : > { %v5017_v21 = vadd.f32 %v6739_v45, %v10622_v26  ;;  %v11679_v45 = vld [vmem:[#allocation22_spill] sm:$0xff] }
 0x56d   : > { %v6740_v46 = vpop.f32.mrb[100].mxu1 }
 0x56e   : > { %v6741_v18 = vpop.f32.mrb[101].mxu1 }
 0x56f   : > { %v6742_v60 = vadd.f32 %v6741_v18, %v6740_v46  ;;  %v6743_v25 = vpop.f32.mrb[102].mxu1 }
 0x570   : > { %v6744_v10 = vpop.f32.mrb[103].mxu1 }
 0x571   : > { %v6745_v5 = vadd.f32 %v6744_v10, %v6743_v25  ;;  %v5022_v9 = vadd.f32 %v6742_v60, %v10622_v26 }
 0x573   : > { %v5025_v28 = vadd.f32 %v6745_v5, %v10622_v26 }
 0x575   : > { %v6746_v61 = vpop.f32.mrb[104].mxu1 }
 0x576   : > { %v6747_v53 = vpop.f32.mrb[105].mxu1 }
 0x577   : > { %v6748_v27 = vadd.f32 %v6747_v53, %v6746_v61  ;;  %v6749_v49 = vpop.f32.mrb[106].mxu1 }
 0x578   : > { %v6750_v47 = vpop.f32.mrb[107].mxu1  ;;  %v6774_v14 = vpop.f32.mrb[112].mxu0 }
 0x579   : > { %v6751_v57 = vadd.f32 %v6750_v47, %v6749_v49  ;;  %v6775_v35 = vpop.f32.mrb[113].mxu0  ;;  %v5030_v1 = vadd.f32 %v6748_v27, %v10622_v26 }
 0x57a   : > { %v6776_v32 = vadd.f32 %v6775_v35, %v6774_v14  ;;  %v6777_v29 = vpop.f32.mrb[114].mxu0 }
 0x57b   : > { %v6778_v31 = vpop.f32.mrb[115].mxu0  ;;  %v5033_v17 = vadd.f32 %v6751_v57, %v10622_v26 }
 0x57c   : > { %v6779_v0 = vadd.f32 %v6778_v31, %v6777_v29  ;;  %v5079_v13 = vadd.f32 %v6776_v32, %v5014_v59 }
 0x57e   : > { %v6752_v11 = vpop.f32.mrb[108].mxu1  ;;  %v5082_v56 = vadd.f32 %v6779_v0, %v5017_v21 }
 0x57f   : > { %v6753_v41 = vpop.f32.mrb[109].mxu1 }
 0x580   : > { %v6754_v24 = vadd.f32 %v6753_v41, %v6752_v11  ;;  %v6755_v2 = vpop.f32.mrb[110].mxu1  ;;  %v6780_v22 = vpop.f32.mrb[116].mxu0  ;;  %v11680_v11 = vld [vmem:[#allocation65_spill] sm:$0xff] }
 0x581   : > { %v6756_v50 = vpop.f32.mrb[111].mxu1  ;;  %v6781_v7 = vpop.f32.mrb[117].mxu0 }
 0x582   : > { %v6757_v3 = vadd.f32 %v6756_v50, %v6755_v2  ;;  %v6782_v54 = vadd.f32 %v6781_v7, %v6780_v22  ;;  %v6783_v8 = vpop.f32.mrb[118].mxu0  ;;  %v5038_v29 = vadd.f32 %v6754_v24, %v10622_v26 }
 0x583   : > { %v6784_v4 = vpop.f32.mrb[119].mxu0 }
 0x584   : > { %v6785_v48 = vadd.f32 %v6784_v4, %v6783_v8  ;;  %v5087_v44 = vadd.f32 %v6782_v54, %v5022_v9  ;;  %v5041_v50 = vadd.f32 %v6757_v3, %v10622_v26  ;;  %v11681_v4 = vld [vmem:[#allocation93_spill] sm:$0xff] }
 0x586   : > { %v6965_v19 = vpop.f32.mrb[112].mxu1  ;;  %v5090_v63 = vadd.f32 %v6785_v48, %v5025_v28 }
 0x587   : > { %v5152_v30 = vadd.f32 %v6965_v19, %v5087_v44  ;;  %v5143_v40 = vpop.f32.mrb[113].mxu1 }
 0x588   : > { %v5144_v20 = vadd.f32 %v5143_v40, %v5079_v13  ;;  %v6966_v12 = vpop.f32.mrb[114].mxu1  ;;  %v6786_v16 = vpop.f32.mrb[120].mxu0 }
 0x589   : > { %v5176_v62 = vadd.f32 %v11676_v58, %v5152_v30  ;;  %v5155_v42 = vadd.f32 %v6966_v12, %v5090_v63  ;;  %v5146_v36 = vpop.f32.mrb[115].mxu1  ;;  %v6787_v43 = vpop.f32.mrb[121].mxu0 }
 0x58a   : > { %v5174_v39 = vadd.f32 %v11677_v55, %v5144_v20  ;;  %v5147_v52 = vadd.f32 %v5146_v36, %v5082_v56  ;;  %v6788_v38 = vadd.f32 %v6787_v43, %v6786_v16  ;;  %v6789_v6 = vpop.f32.mrb[122].mxu0  ;;  %v11683_v55 = vld [vmem:[#allocation90_spill] sm:$0xff] }
 0x58b   : > { %v5184_v23 = vmax.f32 %v5176_v62, 0.0  ;;  %v5177_v51 = vadd.f32 %v11678_v15, %v5155_v42  ;;  %v6790_v37 = vpop.f32.mrb[123].mxu0  ;;  %v11682_v62 = vld [vmem:[#allocation72_spill] sm:$0xff] }
 0x58c   : > { %v5175_v46 = vadd.f32 %v11679_v45, %v5147_v52  ;;  %v6791_v18 = vadd.f32 %v6790_v37, %v6789_v6  ;;  %v5095_v60 = vadd.f32 %v6788_v38, %v5030_v1  ;;  %v5182_v25 = vmax.f32 %v5174_v39, 0.0 }
 0x58d   : > { %v5185_v10 = vmax.f32 %v5177_v51, 0.0  ;;  %v5201_v27 = vrot.slane %v5184_v23, 1 }
 0x58e   : > { %v5183_v5 = vmax.f32 %v5175_v46, 0.0  ;;  %v6969_v61 = vpop.f32.mrb[116].mxu1  ;;  %v5098_v53 = vadd.f32 %v6791_v18, %v5033_v17  ;;  %v5198_v31 = vrot.slane %v5182_v25, 1 }
 0x58f   : > { %v5203_v49 = vrot.slane %v5185_v10, 1  ;;  %v5159_v47 = vpop.f32.mrb[117].mxu1 }
 0x590   : > { %v5199_v14 = vrot.slane %v5183_v5, 1  ;;  %v5160_v35 = vadd.f32 %v5159_v47, %v5095_v60  ;;  %v6970_v59 = vpop.f32.mrb[118].mxu1  ;;  %v6792_v32 = vpop.f32.mrb[124].mxu0 }
 0x591   : > { %v5162_v57 = vpop.f32.mrb[119].mxu1  ;;  %v6793_v21 = vpop.f32.mrb[125].mxu0  ;;  %v5204_v0 = vsel %vm2089_vm15, %v5201_v27, %v5203_v49 }
 0x592   : > { %v5202_v13 = vsel %vm2089_vm15, %v5199_v14, %v5201_v27  ;;  %v5178_v56 = vadd.f32 %v11680_v11, %v5160_v35  ;;  %v5163_v41 = vadd.f32 %v5162_v57, %v5098_v53  ;;  %v6794_v2 = vadd.f32 %v6793_v21, %v6792_v32  ;;  %v6795_v22 = vpop.f32.mrb[126].mxu0  ;;  %v11684_v27 = vld [vmem:[#allocation15_spill] sm:$0xff]  ;;  %v7563_v11 = vld [vmem:[%s10982_s7 + $0x10] sm:$0xff]  }
 0x593   : > { %v5223_v7 = vmax.f32 %v5183_v5, %v5202_v13  ;;  %v6796_v9 = vpop.f32.mrb[127].mxu0  ;;  %v5200_v54 = vsel %vm2089_vm15, %v5198_v31, %v5199_v14  ;;  %v5224_v8 = vmax.f32 %v5184_v23, %v5204_v0  ;;  %v5239_v35 = vld [vmem:[%s10986_s11 + $0x8] sm:$0xff]  ;;  %v7555_v31 = vld [vmem:[%s10982_s7] sm:$0xff]   ;;  %v7549_v0 = vld [vmem:[%s10984_s9 + $0x10] sm:$0xff]  }
 0x594   : > { %v5186_v24 = vmax.f32 %v5178_v56, 0.0  ;;  %v5179_v28 = vadd.f32 %v11681_v4, %v5163_v41  ;;  %v5103_v48 = vadd.f32 %v6794_v2, %v5038_v29  ;;  %v6797_v44 = vadd.f32 %v6796_v9, %v6795_v22  ;;  %v7548_v32 = vld [vmem:[%s10984_s9 + $0x8] sm:$0xff]   ;;  %v7553_v29 = vld [vmem:[%s10982_s7 + $0x40] sm:$0xff]   ;;  %v7561_v13 = vld [vmem:[%s10982_s7 + $0x50] sm:$0xff]  }
 0x595   : > { %v5222_v19 = vmax.f32 %v5182_v25, %v5200_v54  ;;  %v5231_v63 = vmax.f32 %v5223_v7, %v5224_v8  ;;  %v7557_v57 = vld [vmem:[%s10982_s7 + $0x48] sm:$0xff]   ;;  %v7550_v56 = vld [vmem:[%s10984_s9 + $0x18] sm:$0xff]   ;;  %v7551_v2 = vld [vmem:[%s10982_s7 + $0xc0] sm:$0xff]  }
 0x596   : > { %v5205_v30 = vrot.slane %v5186_v24, 1  ;;  %v5187_v40 = vmax.f32 %v5179_v28, 0.0  ;;  %v5168_v20 = vadd.f32 %v6969_v61, %v5103_v48  ;;  %v5106_v12 = vadd.f32 %v6797_v44, %v5041_v50  ;;  %v7559_v21 = vld [vmem:[%s10982_s7 + $0x8] sm:$0xff]   ;;  %v7565_v41 = vld [vmem:[%s10982_s7 + $0x58] sm:$0xff]   ;;  %v7569_v50 = vld [vmem:[%s10982_s7 + $0x60] sm:$0xff]  }
 0x597   : > { %v5230_v16 = vmax.f32 %v5222_v19, %v5223_v7  ;;  %v7567_v22 = vld [vmem:[%s10982_s7 + $0x18] sm:$0xff]   ;;  %v7571_v7 = vld [vmem:[%s10982_s7 + $0x20] sm:$0xff]   ;;  %v7573_v9 = vld [vmem:[%s10982_s7 + $0x68] sm:$0xff]  }
 0x598   : > { %v5207_v58 = vrot.slane %v5187_v40, 1  ;;  %v5180_v26 = vadd.f32 %v11682_v62, %v5168_v20  ;;  %v5171_v3 = vadd.f32 %v6970_v59, %v5106_v12  ;;  %v5206_v42 = vsel %vm2089_vm15, %v5203_v49, %v5205_v30  ;;  %v7547_v59 = vld [vmem:[%s10984_s9] sm:$0xff]   ;;  %v7575_v54 = vld [vmem:[%s10982_s7 + $0x28] sm:$0xff]  }
 0x599   : > { %v7066_v36 = vpack.c.bf16 %v5231_v63, %v5230_v16  ;;  %v5225_v43 = vmax.f32 %v5185_v10, %v5206_v42  ;;  %6991 = vmatpush3.bf16.msra.mxu1 %v7547_v59  ;;  %v11686_v4 = vld [vmem:[#allocation8_spill] sm:$0xff] }
 0x59a   : > { %v5188_v1 = vmax.f32 %v5180_v26, 0.0  ;;  %v5181_v39 = vadd.f32 %v11683_v55, %v5171_v3  ;;  %v5208_v52 = vsel %vm2089_vm15, %v5205_v30, %v5207_v58  ;;  %6992 = vmatprep.subr.bf16.mxu1 %v11634_v33  ;;  %v1230_v28 = vand.u32 3, %v11686_v4 }
 0x59b   : > { %7067 = vmatprep.subr.bf16.mxu0 %v7066_v36  ;;  %v5226_v38 = vmax.f32 %v5186_v24, %v5208_v52  ;;  %v5232_v6 = vmax.f32 %v5224_v8, %v5225_v43  ;;  %v11685_v8 = vld [vmem:[#allocation7_spill] sm:$0xff]  ;;  %v7577_v52 = vld [vmem:[%s10982_s7 + $0x70] sm:$0xff]  }
 0x59c   : > { %v5209_v23 = vrot.slane %v5188_v1, 1  ;;  %v5189_v15 = vmax.f32 %v5181_v39, 0.0  ;;  %7069 = vmatpush3.bf16.msra.mxu0 %v7066_v36  ;;  %v1223_v24 = vand.u32 3, %v11685_v8  ;;  %vm1250_vm4 = vcmp.lt.s32.totalorder %v1230_v28, 3  ;;  %v7552_v36 = vld [vmem:[%s10982_s7 + $0x80] sm:$0xff]   ;;  %v7554_v39 = vld [vmem:[%s10982_s7 + $0xc8] sm:$0xff]  }
 0x59d   : > { %v5233_v51 = vmax.f32 %v5225_v43, %v5226_v38  ;;  %6993 = vmatpush3.bf16.msra.mxu1 %v7548_v32  ;;  %v6205_v44 = vsel %vm1250_vm4, 1.0, %v11634_v33  ;;  %vm1244_vm8 = vcmp.gt.s32.totalorder %v1230_v28, 0 }
 0x59e   : > { %v5211_v37 = vrot.slane %v5189_v15, 1  ;;  %v5210_v17 = vsel %vm2089_vm15, %v5207_v58, %v5209_v23  ;;  %6994 = vmatprep.subr.bf16.mxu1 %v11634_v33  ;;  %vm1249_vm2 = vcmp.lt.s32.totalorder %v1223_v24, 3  ;;  %v10716_v63 = vrot.slane %v6205_v44, 6 }
 0x59f   : > { %v7070_v45 = vpack.c.bf16 %v5233_v51, %v5232_v6  ;;  %v5227_v46 = vmax.f32 %v5187_v40, %v5210_v17  ;;  %v6204_v48 = vsel %vm1249_vm2, 1.0, %v11634_v33  ;;  %vm1243_vm5 = vcmp.gt.s32.totalorder %v1223_v24, 0 }
 0x5a0   : > { %v5212_v18 = vsel %vm2089_vm15, %v5209_v23, %v5211_v37  ;;  %v5213_v60 = vsel %vm2089_vm15, %v5211_v37, %v11627_v34  ;;  %v10714_v19 = vrot.slane %v6204_v48, 6  ;;  %v10724_v40 = vsel %vm1243_vm5, 1.0, %v11634_v33 }
 0x5a1   : > { %7071 = vmatprep.subr.bf16.mxu0 %v7070_v45  ;;  %v5228_v25 = vmax.f32 %v5188_v1, %v5212_v18  ;;  %v5234_v10 = vmax.f32 %v5226_v38, %v5227_v46  ;;  %v5229_v5 = vmax.f32 %v5189_v15, %v5213_v60  ;;  %6995 = vmatpush3.bf16.msra.mxu1 %v7549_v0  ;;  %v10727_v20 = vsel %vm1244_vm8, 1.0, %v11634_v33  ;;  %v7579_v38 = vld [vmem:[%s10982_s7 + $0x30] sm:$0xff]  }
 0x5a2   : > { %7073 = vmatpush3.bf16.msra.mxu0 %v7070_v45  ;;  %6996 = vmatprep.subr.bf16.mxu1 %v11634_v33  ;;  %v10721_v30 = vsel %vm1827_vm7, %v10714_v19, %v10716_v63  ;;  %v5434_v12 = vrot.slane %v6204_v48, 2  ;;  %v5435_v16 = vrot.slane %v6205_v44, 2  ;;  %v5425_v58 = vrot.slane %v10724_v40, 4  ;;  %v7564_v48 = vld [vmem:[%s10982_s7 + $0x98] sm:$0xff]  }
 0x5a3   : > { %v5235_v61 = vmax.f32 %v5227_v46, %v5228_v25  ;;  %v5236_v53 = vmax.f32 %v5228_v25, %v5229_v5  ;;  %v5237_v49 = vmax.f32 %v5229_v5, %v11684_v27  ;;  %v5426_v62 = vrot.slane %v10727_v20, 4  ;;  %v7581_v46 = vld [vmem:[%s10982_s7 + $0x78] sm:$0xff]   ;;  %v7556_v5 = vld [vmem:[%s10982_s7 + $0x88] sm:$0xff]  }
 0x5a4   : > { %v5436_v55 = vsel %vm2283_vm3, %v5434_v12, %v5435_v16  ;;  %v10749_v15 = vmul.f32 0.0, %v10716_v63 }
 0x5a5   : > { %v7074_v47 = vpack.c.bf16 %v5235_v61, %v5234_v10  ;;  %v7078_v14 = vpack.c.bf16 %v5237_v49, %v5236_v53  ;;  %6997 = vmatpush3.bf16.msra.mxu1 %v7550_v56  ;;  %v5427_v23 = vsel %vm5424_vm10, %v5425_v58, %v5426_v62  ;;  %v7582_v61 = vld [vmem:[%s10982_s7 + $0x38] sm:$0xff]   ;;  %v7560_v56 = vld [vmem:[%s10982_s7 + $0x90] sm:$0xff]  }
 0x5a6   : > { %6843 = vmatprep.subr.bf16.mxu1 %v7551_v2  ;;  %v5517_v28 = vrot.slane %v10749_v15, 2  ;;  %v7574_v15 = vld [vmem:[%s10982_s7 + $0xf0] sm:$0xff]  }
 0x5a7   : > { %7075 = vmatprep.subr.bf16.mxu0 %v7074_v47 }
 0x5a8   : > { %7077 = vmatpush3.bf16.msra.mxu0 %v7074_v47 }
 0x5a9   : > { %7079 = vmatprep.subr.bf16.mxu0 %v7078_v14 }
 0x5ac   : > { %7081 = vmatpush3.bf16.msra.mxu0 %v7078_v14  ;;  %v7558_v14 = vld [vmem:[%s10982_s7 + $0xd0] sm:$0xff]  }
 0x5ad   : > { %6821 = vmatprep.subr.bf16.mxu0 %v7553_v29 }
 0x5af   : > { %6988 = vmatmul.mubr.msk.f32.vlgmr.msra.gmra.mrb[128].mxu0 %vm2880_vm6, %v5239_v35 }
 0x5b0   : > { %6822 = vmatpush3.bf16.msra.mxu0 %v7555_v31 }
 0x5b1   : > { %6823 = vmatprep.subr.bf16.mxu0 %v7557_v57 }
 0x5b4   : > { %6824 = vmatpush3.bf16.msra.mxu0 %v7559_v21 }
 0x5b5   : > { %6825 = vmatprep.subr.bf16.mxu0 %v7561_v13 }
 0x5b8   : > { %6826 = vmatpush3.bf16.msra.mxu0 %v7563_v11 }
 0x5b9   : > { %6827 = vmatprep.subr.bf16.mxu0 %v7565_v41 }
 0x5bc   : > { %6828 = vmatpush3.bf16.msra.mxu0 %v7567_v22 }
 0x5bd   : > { %6829 = vmatprep.subr.bf16.mxu0 %v7569_v50 }
 0x5c0   : > { %6830 = vmatpush3.bf16.msra.mxu0 %v7571_v7  ;;  %v7562_v7 = vld [vmem:[%s10982_s7 + $0xd8] sm:$0xff]  }
 0x5c1   : > { %6831 = vmatprep.subr.bf16.mxu0 %v7573_v9 }
 0x5c4   : > { %6832 = vmatpush3.bf16.msra.mxu0 %v7575_v54 }
 0x5c5   : > { %6833 = vmatprep.subr.bf16.mxu0 %v7577_v52 }
 0x5c8   : > { %6834 = vmatpush3.bf16.msra.mxu0 %v7579_v38 }
 0x5c9   : > { %6835 = vmatprep.subr.bf16.mxu0 %v7581_v46  ;;  %v7580_v46 = vld [vmem:[%s10982_s7 + $0xb8] sm:$0xff]  }
 0x5cc   : > { %6836 = vmatpush3.bf16.msra.mxu0 %v7582_v61 }
 0x5cd   : > { %7014 = vmatprep.subr.bf16.mxu0 %v11634_v33 }
 0x682   : > { %v6989_v26 = vpop.f32.mrb[128].mxu0 }
 0x683   : > { %v5402_v3 = vrot.slane %v6989_v26, 3  ;;  %v5312_v42 = vpop.f32.mrb[129].mxu0 }
 0x684   : > { %v5321_v43 = vpack.c.bf16 %v6989_v26, %v5312_v42  ;;  %v5401_v1 = vrot.slane %v5312_v42, 3 }
 0x685   : > { %v10745_v6 = vsel %vm5400_vm9, %v5402_v3, 0.0 }
 0x686   : > { %v10752_v51 = vsel %vm5400_vm9, %v5401_v1, %v5402_v3  ;;  %v10755_v37 = vsel %vm5400_vm9, 0.0, %v5401_v1  ;;  %v5453_v17 = vrot.slane %v10745_v6, 1  ;;  %v5442_v45 = vmul.f32 %v5435_v16, %v10745_v6  ;;  %6999 = vmatmul.mubr.msk.bf16.vlgmr.msra.gmra.mrb[120].mxu1 %vm2880_vm6, %v5321_v43 }
 0x687   : > { %v5486_v18 = vrot.slane %v10755_v37, 5  ;;  %v5451_v60 = vrot.slane %v10752_v51, 1  ;;  %v5440_v25 = vmul.f32 %v5434_v12, %v10755_v37  ;;  %v5441_v10 = vmul.f32 %v5436_v55, %v10752_v51  ;;  %6844 = vmatpush3.bf16.msra.mxu1 %v7552_v36 }
 0x688   : > { %v5507_v53 = vsel %vm2089_vm15, %v5453_v17, %v11627_v34  ;;  %v5499_v27 = vrot.slane %v5442_v45, 6  ;;  %v5431_v49 = vmul.f32 %v5425_v58, %v10755_v37  ;;  %v5432_v47 = vmul.f32 %v5427_v23, %v10752_v51  ;;  %6845 = vmatprep.subr.bf16.mxu1 %v7554_v39  ;;  %v7572_v23 = vld [vmem:[%s10982_s7 + $0xa8] sm:$0xff]   ;;  %v7578_v45 = vld [vmem:[%s10982_s7 + $0xf8] sm:$0xff]  }
 0x689   : > { %v5454_v35 = vsel %vm2089_vm15, %v5451_v60, %v5453_v17  ;;  %v5496_v59 = vrot.slane %v5440_v25, 6  ;;  %v5497_v32 = vrot.slane %v5441_v10, 6  ;;  %v5433_v29 = vmul.f32 %v5426_v62, %v10745_v6  ;;  %v7566_v62 = vld [vmem:[%s10982_s7 + $0xe0] sm:$0xff]   ;;  %v7576_v17 = vld [vmem:[%s10982_s7 + $0xb0] sm:$0xff]  }
 0x68a   : > { %v7442_v31 = vpack.i.bf16 %v5507_v53, %v5454_v35  ;;  %v5474_v57 = vrot.slane %v5431_v49, 4  ;;  %v5475_v34 = vrot.slane %v5432_v47, 4  ;;  %v5450_v21 = vrot.slane %v10755_v37, 1 }
 0x68b   : > { %v5498_v0 = vsel %vm1827_vm7, %v5496_v59, %v5497_v32  ;;  %v5500_v13 = vsel %vm1827_vm7, %v5497_v32, %v5499_v27  ;;  %v5477_v11 = vrot.slane %v5433_v29, 4  ;;  %6846 = vmatpush3.bf16.msra.mxu1 %v7556_v5  ;;  %v5487_v41 = vrot.slane %v10752_v51, 5 }
 0x68c   : > { %7443 = vrot.lane.b32.xlu1 %v7442_v31, %s11653_s28  ;;  %v7447_v2 = vpack.i.bf16 %v5500_v13, %v5498_v0  ;;  %v5476_v22 = vsel %vm5424_vm10, %v5474_v57, %v5475_v34  ;;  %v5452_v50 = vsel %vm2089_vm15, %v5450_v21, %v5451_v60  ;;  %6847 = vmatprep.subr.bf16.mxu1 %v7558_v14  ;;  %v5489_v9 = vrot.slane %v10745_v6, 5  ;;  %v7583_v0 = vld [vmem:[%s10982_s7 + $0x100] sm:$0xff]  }
 0x68d   : > { %v5478_v54 = vsel %vm5424_vm10, %v5475_v34, %v5477_v11  ;;  %v5488_v8 = vsel %vm5485_vm12, %v5486_v18, %v5487_v41  ;;  %v5419_v44 = vmul.f32 %v10714_v19, %v10755_v37  ;;  %v5420_v12 = vmul.f32 %v10721_v30, %v10752_v51 }
 0x68e   : > { %7448 = vrot.lane.b32.xlu0 %v7447_v2, %s11653_s28  ;;  %v7452_v24 = vpack.i.bf16 %v5478_v54, %v5476_v22  ;;  %v5490_v4 = vsel %vm5485_vm12, %v5487_v41, %v5489_v9  ;;  %v5421_v16 = vmul.f32 %v10716_v63, %v10745_v6  ;;  %v5446_v58 = vmul.f32 %v10721_v30, %v10745_v6  ;;  %v7568_v30 = vld [vmem:[%s10982_s7 + $0xa0] sm:$0xff]   ;;  %v7584_v41 = vld [vmem:[%s10982_s7 + $0x108] sm:$0xff]   ;;  %v7585_v22 = vld [vmem:[%s10982_s7 + $0x110] sm:$0xff]  }
 0x68f   : > { %6848 = vmatpush3.bf16.msra.mxu1 %v7560_v56  ;;  %v5445_v26 = vmul.f32 %v10714_v19, %v10752_v51  ;;  %v5464_v3 = vrot.slane %v5419_v44, 2  ;;  %v5465_v42 = vrot.slane %v5420_v12, 2  ;;  %v7570_v19 = vld [vmem:[%s10982_s7 + $0xe8] sm:$0xff]   ;;  %v5443_v10 = vmul.f32 %v10724_v40, %v10752_v51  ;;  %v7587_v56 = vld [vmem:[%s10987_s12] sm:$0xff]   ;;  %v7590_v9 = vld [vmem:[%s10987_s12 + $0x18] sm:$0xff]  }
 0x690   : > { %7453 = vrot.lane.b32.xlu1 %v7452_v24, %s11653_s28  ;;  %6849 = vmatprep.subr.bf16.mxu1 %v7562_v7  ;;  %v5467_v36 = vrot.slane %v5421_v16, 2  ;;  %v5515_v43 = vrot.slane %v5446_v58, 2  ;;  %v5444_v61 = vmul.f32 %v10727_v20, %v10745_v6  ;;  %v5409_v14 = vmul.f32 %v10724_v40, %v10755_v37  ;;  %v7588_v2 = vld [vmem:[%s10987_s12 + $0x8] sm:$0xff]   ;;  %v7589_v7 = vld [vmem:[%s10987_s12 + $0x10] sm:$0xff]   ;;  %v7591_v54 = vld [vmem:[%s10987_s12 + $0x20] sm:$0xff]  }
 0x691   : > { %v5514_v63 = vrot.slane %v5445_v26, 2  ;;  %v5466_v1 = vsel %vm2283_vm3, %v5464_v3, %v5465_v42  ;;  %v5410_v35 = vmul.f32 %v10727_v20, %v10752_v51  ;;  %v7593_v24 = vld [vmem:[%s10987_s12 + $0x30] sm:$0xff]   ;;  %vm6065_vm7 = vcmask 15360  }
 0x692   : > { %5455 = vrot.lane.b32.xlu0 %v5452_v50, %s11653_s28  ;;  %v5468_v55 = vsel %vm2283_vm3, %v5465_v42, %v5467_v36  ;;  %v10826_v39 = vsel %vm2283_vm3, %v5515_v43, %v5517_v28  ;;  %v7586_v50 = vld [vmem:[%s10982_s7 + $0x118] sm:$0xff]   ;;  %vm6078_vm15 = vcmask 8192   ;;  %s10933_s28 = scalar_lea.hbm %s10989_s14, %s6396_s25 }
 0x693   : > { %6850 = vmatpush3.bf16.msra.mxu1 %v7564_v48  ;;  %v10832_v52 = vsel %vm2283_vm3, %v5514_v63, %v5515_v43 }
 0x694   : > { %6851 = vmatprep.subr.bf16.mxu1 %v7566_v62  ;;  %v5533_v38 = vpack.c.bf16 %v10826_v39, %v10832_v52  ;;  %v6350_v62 = vld [vmem:[%s10983_s8] ss:$0 sm:$0xff] }
 0x697   : > { %6852 = vmatpush3.bf16.msra.mxu1 %v7568_v30 }
 0x698   : > { %6853 = vmatprep.subr.bf16.mxu1 %v7570_v19 }
 0x69b   : > { %6854 = vmatpush3.bf16.msra.mxu1 %v7572_v23 }
 0x69c   : > { %6855 = vmatprep.subr.bf16.mxu1 %v7574_v15 }
 0x69f   : > { %6856 = vmatpush3.bf16.msra.mxu1 %v7576_v17 }
 0x6a0   : > { %6857 = vmatprep.subr.bf16.mxu1 %v7578_v45 }
 0x6a3   : > { %6858 = vmatpush3.bf16.msra.mxu1 %v7580_v46 }
 0x6a4   : > { %7002 = vmatprep.subr.bf16.mxu1 %v11634_v33 }
 0x6fe   : > { %v7444_v18 = vpop.permute.xlu1 %7443 }
 0x6ff   : > { %v7446_v60 = vunpack.i.h.bf16 %v7444_v18  ;;  %v7445_v25 = vunpack.i.l.bf16 %v7444_v18 }
 0x700   : > { %v7449_v5 = vpop.permute.xlu0 %7448 }
 0x701   : > { %v7451_v53 = vunpack.i.h.bf16 %v7449_v5  ;;  %v7450_v27 = vunpack.i.l.bf16 %v7449_v5  ;;  %v5527_v49 = vsel %vm2880_vm6, %v5443_v10, %v7445_v25  ;;  %v5528_v59 = vsel %vm2880_vm6, %v5444_v61, %v7446_v60 }
 0x702   : > { %v7454_v47 = vpop.permute.xlu1 %7453  ;;  %v5532_v21 = vpack.c.bf16 %v5528_v59, %v5527_v49  ;;  %v5522_v37 = vsel %vm2880_vm6, %v5410_v35, %v7445_v25 }
 0x703   : > { %v5526_v32 = vsel %vm2880_vm6, %v5490_v4, %v7451_v53  ;;  %v5525_v29 = vsel %vm2880_vm6, %v5488_v8, %v7450_v27  ;;  %v7456_v31 = vunpack.i.h.bf16 %v7454_v47  ;;  %v7455_v57 = vunpack.i.l.bf16 %v7454_v47  ;;  %v7592_v8 = vld [vmem:[%s10987_s12 + $0x28] sm:$0xff]   ;;  %v7594_v4 = vld [vmem:[%s10987_s12 + $0x38] sm:$0xff]  }
 0x704   : > { %v5531_v6 = vpack.c.bf16 %v5526_v32, %v5525_v29  ;;  %v5456_v34 = vpop.permute.xlu0 %5455  ;;  %5905 = vmatprep.mubr.bf16.mxu1 %v5532_v21  ;;  %v6076_v32 = vld [vmem:[%s10988_s13] sm:$0x1] }
 0x705   : > { %v5521_v40 = vsel %vm2880_vm6, %v5409_v14, %v5456_v34  ;;  %v5523_v20 = vsel %vm2880_vm6, %v5466_v1, %v7455_v57  ;;  %v5524_v51 = vsel %vm2880_vm6, %v5468_v55, %v7456_v31 }
 0x706   : > { %v5529_v13 = vpack.c.bf16 %v5522_v37, %v5521_v40  ;;  %v5530_v11 = vpack.c.bf16 %v5524_v51, %v5523_v20  ;;  %5906 = vmatmul.mubr.bf16.vlgmr.msra.gmra.mrb[124].mxu1 %v5531_v6 }
 0x707   : > { %7003 = vmatpush3.bf16.msra.mxu1 %v7583_v0  ;;  %7010 = vmatprep.mubr.msk.bf16.mxu1 %vm7663_vm11, %v11634_v33 }
 0x708   : > { %5864 = vmatprep.mubr.bf16.mxu0 %v5530_v11  ;;  %7004 = vmatprep.subr.bf16.mxu1 %v11634_v33 }
 0x709   : > { %5865 = vmatmul.mubr.bf16.vlgmr.msra.gmra.mrb[132].mxu0 %v5529_v13 }
 0x70a   : > { %7015 = vmatpush3.bf16.msra.mxu0 %v7587_v56  ;;  %7030 = vmatprep.mubr.msk.bf16.mxu0 %vm7663_vm11, %v11634_v33 }
 0x70b   : > { %7016 = vmatprep.subr.bf16.mxu0 %v11634_v33  ;;  %7005 = vmatpush3.bf16.msra.mxu1 %v7584_v41 }
 0x70c   : > { %7006 = vmatprep.subr.bf16.mxu1 %v11634_v33 }
 0x70e   : > { %7017 = vmatpush3.bf16.msra.mxu0 %v7588_v2 }
 0x70f   : > { %7018 = vmatprep.subr.bf16.mxu0 %v11634_v33  ;;  %7007 = vmatpush3.bf16.msra.mxu1 %v7585_v22 }
 0x710   : > { %7008 = vmatprep.subr.bf16.mxu1 %v11634_v33 }
 0x712   : > { %7019 = vmatpush3.bf16.msra.mxu0 %v7589_v7 }
 0x713   : > { %7009 = vmatpush3.bf16.msra.mxu1 %v7586_v50  ;;  %7020 = vmatprep.subr.bf16.mxu0 %v11634_v33 }
 0x716   : > { %7011 = vmatmul.mubr.msk.bf16.vlgmr.msra.gmra.mrb[120].mxu1 %vm2880_vm6, %v5533_v38  ;;  %7021 = vmatpush3.bf16.msra.mxu0 %v7590_v9 }
 0x717   : > { %7022 = vmatprep.subr.bf16.mxu0 %v11634_v33 }
 0x71a   : > { %7023 = vmatpush3.bf16.msra.mxu0 %v7591_v54 }
 0x71b   : > { %7024 = vmatprep.subr.bf16.mxu0 %v11634_v33 }
 0x71e   : > { %7025 = vmatpush3.bf16.msra.mxu0 %v7592_v8 }
 0x71f   : > { %7026 = vmatprep.subr.bf16.mxu0 %v11634_v33 }
 0x722   : > { %7027 = vmatpush3.bf16.msra.mxu0 %v7593_v24 }
 0x723   : > { %7028 = vmatprep.subr.bf16.mxu0 %v11634_v33 }
 0x726   : > { %7029 = vmatpush3.bf16.msra.mxu0 %v7594_v4 }
 0x7d9   : > { %v6859_v28 = vpop.f32.mrb[124].mxu1 }
 0x7da   : > { %v6860_v48 = vpop.f32.mrb[125].mxu1 }
 0x7db   : > { %v6861_v44 = vadd.f32 %v6860_v48, %v6859_v28  ;;  %v6862_v12 = vpop.f32.mrb[126].mxu1 }
 0x7dc   : > { %v6837_v16 = vpop.f32.mrb[132].mxu0  ;;  %v6863_v58 = vpop.f32.mrb[127].mxu1 }
 0x7dd   : > { %v6838_v26 = vpop.f32.mrb[133].mxu0  ;;  %v6864_v3 = vadd.f32 %v6863_v58, %v6862_v12 }
 0x7de   : > { %v6839_v42 = vadd.f32 %v6838_v26, %v6837_v16  ;;  %v6840_v36 = vpop.f32.mrb[134].mxu0 }
 0x7df   : > { %v6841_v43 = vpop.f32.mrb[135].mxu0 }
 0x7e0   : > { %v5867_v63 = vadd.f32 %v6839_v42, %v6350_v62  ;;  %v6842_v30 = vadd.f32 %v6841_v43, %v6840_v36 }
 0x7e2   : > { %v5870_v1 = vadd.f32 %v6842_v30, %v6350_v62  ;;  %v5908_v33 = vadd.f32 %v6861_v44, %v5867_v63 }
 0x7e4   : > { %v5911_v55 = vadd.f32 %v6864_v3, %v5870_v1 }
 0x7e9   : > { %v5948_v39 = vpop.f32.mrb[120].mxu1 }
 0x7ea   : > { %v5949_v19 = vadd.f32 %v5948_v39, %v5908_v33  ;;  %v7012_v52 = vpop.f32.mrb[121].mxu1 }
 0x7eb   : > { %v5951_v38 = vpop.f32.mrb[122].mxu1 }
 0x7ec   : > { %v5952_v23 = vadd.f32 %v5951_v38, %v5911_v55  ;;  %v7013_v15 = vpop.f32.mrb[123].mxu1  ;;  %v5957_v17 = vmax.f32 %v5949_v19, 0.0 }
 0x7ee   : > { %v5958_v45 = vmax.f32 %v5952_v23, 0.0 }
 0x7f0   : > { %v5959_v46 = vpack.c.bf16 %v5958_v45, %v5957_v17 }
 0x7f2   : > { %7031 = vmatmul.mubr.bf16.vlgmr.msra.gmra.mrb[136].mxu0 %v5959_v46 }
 0x8c5   : > { %v6058_v18 = vpop.f32.mrb[136].mxu0 }
 0x8c6   : > { %v7032_v60 = vpop.f32.mrb[137].mxu0  ;;  %v6066_v10 = vsel %vm6065_vm7, %v6058_v18, 0.0 }
 0x8c7   : > { %v6061_v25 = vpop.f32.mrb[138].mxu0 }
 0x8c8   : > { %v6067_v5 = vsel %vm6065_vm7, %v6061_v25, 0.0  ;;  %v7033_v61 = vpop.f32.mrb[139].mxu0 }
 0x8c9   : > { %v6068_v53 = vadd.f32 %v6067_v5, %v6066_v10 }
 0x8cb   : > { %v6069_v27 = vrot.slane %v6068_v53, 4 }
 0x8cd   : > { %v6070_v49 = vadd.f32 %v6069_v27, %v6068_v53 }
 0x8cf   : > { %v6071_v47 = vrot.slane %v6070_v49, 2 }
 0x8d1   : > { %v6072_v14 = vadd.f32 %v6071_v47, %v6070_v49 }
 0x8d3   : > { %v6073_v35 = vrot.slane %v6072_v14, 1 }
 0x8d5   : > { %v6074_v59 = vadd.f32 %v6073_v35, %v6072_v14 }
 0x8d7   : > { %v6075_v29 = vmul.f32 0.0625, %v6074_v59 }
 0x8d9   : > { %v6077_v31 = vadd.f32 %v6076_v32, %v6075_v29 }
 0x8db   : > { %6079 = vst.msk [vmem:[%s459_s1] sm:$0x1] %vm6078_vm15, %v6077_v31 }
 0x8dc   : > { %7608 = shalt.err (!%p7605_p3)
}
 0x8dd   : > { %s7609_s15 = scalar_lea.hbm %s10933_s28, 16  ;;  %s7613_s27 = scalar_lea.hbm %s10989_s14, 32 }
 0x8de   : > { %p7610_p4 = scmp.ne.s32.totalorder %s10933_s28, %s7609_s15  ;;  %p7614_p9 = scmp.lt.u32.totalorder %s10933_s28, %s10989_s14 }
 0x8df   : > { %p7615_p10 = scmp.lt.u32.totalorder %s7613_s27, %s7609_s15  ;;  %p7617_p12 = scmp.lt.u32.totalorder %s7609_s15, %s10933_s28 }
 0x8e0   : > { %p7611_p7 = pnand %p7610_p4, %p7778_p5 }
 0x8e1   : > { %p7616_p11 = por %p7615_p10, %p7614_p9 }
 0x8e2   : > { %p7612_p8 = pneg %p7611_p7 }
 0x8e3   : > { %p7618_p13 = por %p7617_p12, %p7616_p11 }
 0x8e5   : > { %p7619_p0 = pnand %p7618_p13, %p7612_p8 }
 0x8e7   : > { %7622 = shalt.err (!%p7619_p0)
}
 0x8e8   : > { %7088 = dma.vmem_to_hbm [thread:$0]  (%p7778_p5), %s10935_s26, 16, %s10933_s28, %s6081_s20  }
 0x8e9 PF: > { %p7094_p1 = scmp.ge.s32.totalorder %s7657_s16, 2  ;;  %s6105_s21 = sand.u32 1, %s7645_s29  }
 0x8ea   : > { %s6106_s22 = scalar_lea.sflag [#allocation3], %s6105_s21 }
 0x8eb   : > { %p7091_p2 = pnand %p7094_p1, %p7782_p6 }
 0x8ed   : > { %7640 = dma.done.wait (!%p7091_p2), %s6106_s22, 16  }
 0x8ee   : > { %7642 = vsyncadd (!%p7091_p2), %s6106_s22, 4294967280  ;;  %s11687_s0 = sld [smem:[#allocation5_spill]]  ;;  %s11688_s15 = sld [smem:[#allocation6_spill]] }
 0x8ef   : > { %p24_p3 = scmp.ge.s32.totalorder %s7765_s19, 4   ;;  %s11689_s29 = smov %s7649_s30 }
 0x8f0   : > { %s11691_s16 = smov %s7765_s19 }
 0x8f1   :  { %26 = sbr.rel (!%p24_p3) target bundleno = 6 (0x6), region = 111 }
 0x8f4   : > { %s11690_s30 = smov %s11687_s0 }
 0x8f8   :  { %6110 = vsyncpa [#allocation3], 1 }
 0x8f9   :  { %6112 = vsyncpa [#allocation3 + $0x1], 1 }

</bundles_post_ra>
